<compile_context>
chip_gen: v6e
topology: v6e:2x2x1
jax: 0.10.0
libtpu: 0.0.40
codegen_flags: <defaults>
</compile_context>

<pallas_src>
import functools

import jax
import jax.numpy as jnp
from jax import lax
from jax.experimental import pallas as pl
from jax.experimental.pallas import tpu as pltpu


def _round_up(n, m):
    return ((n + m - 1) // m) * m


# ----------------------------------------------------------------------------
# Fused Pallas kernel: `num_layers` GRU layers over the full sequence,
# emitting only the last layer's final hidden state.
# ----------------------------------------------------------------------------
def make_fused_gru_kernel(num_layers):
    def kernel(*refs):
        # refs = [x] + [wih, whh, bih, bhh] * num_layers + [out]
        x_ref = refs[0]
        out_ref = refs[1 + 4 * num_layers]

        T, Bp, Ip = x_ref.shape
        Hp = refs[2].shape[0]                     # whh of layer 0 is [Hp, 3Hp]

        # Time-major sequence flattened to [T*Bp, feat] (bf16 MXU operand).
        seq = x_ref[...].reshape(T * Bp, Ip)

        h = None
        for l in range(num_layers):
            wih = refs[1 + 4 * l + 0][...]        # [in_pad, 3Hp]  bf16
            whh = refs[1 + 4 * l + 1][...]        # [Hp, 3Hp]      bf16
            bih = refs[1 + 4 * l + 2][...]        # [1, 3Hp]       f32
            bhh = refs[1 + 4 * l + 3][...]        # [1, 3Hp]       f32

            # Hoisted input projection for ALL timesteps: one big MXU matmul,
            # bias folded in once (not per iteration).
            gi_all = jnp.dot(seq, wih, preferred_element_type=jnp.float32) + bih
            # Hoist the recurrent-bias broadcast out of the time loop.
            bhh_b = jnp.broadcast_to(bhh, (Bp, 3 * Hp))

            h = jnp.zeros((Bp, Hp), jnp.float32)
            hs = []
            # T is small & static -> full static unroll.
            for t in range(T):
                gi = gi_all[t * Bp:(t + 1) * Bp, :]               # [Bp, 3Hp]
                gh = jnp.dot(h.astype(jnp.bfloat16), whh,
                             preferred_element_type=jnp.float32) + bhh_b
                # Gate slices land on 128-lane boundaries (Hp % 128 == 0).
                r = jax.nn.sigmoid(gi[:, 0:Hp] + gh[:, 0:Hp])
                z = jax.nn.sigmoid(gi[:, Hp:2 * Hp] + gh[:, Hp:2 * Hp])
                n = jnp.tanh(gi[:, 2 * Hp:3 * Hp] + r * gh[:, 2 * Hp:3 * Hp])
                h = (1.0 - z) * n + z * h
                if l < num_layers - 1:
                    hs.append(h)

            if l < num_layers - 1:
                # Next layer consumes the full hidden sequence straight from
                # VMEM-resident values (no HBM round trip).
                seq = jnp.concatenate(hs, axis=0).astype(jnp.bfloat16)

        # Lane-dense [Bp, Hp] store of the final hidden state only.
        out_ref[...] = h

    return kernel


def _vmem_spec():
    return pl.BlockSpec(memory_space=pltpu.MemorySpace.VMEM)


def fused_gru(x_pad, padded_layers, Hp):
    T, Bp, _ = x_pad.shape
    num_layers = len(padded_layers)
    inputs = [x_pad]
    for lp in padded_layers:
        inputs += [lp["wih_t"], lp["whh_t"], lp["bih"], lp["bhh"]]
    return pl.pallas_call(
        make_fused_gru_kernel(num_layers),
        out_shape=jax.ShapeDtypeStruct((Bp, Hp), jnp.float32),
        in_specs=[_vmem_spec()] * len(inputs),
        out_specs=_vmem_spec(),
    )(*inputs)


# ----------------------------------------------------------------------------
# Wrapper: slice features, pad to (8, 128)-aligned tiles, run fused kernel,
# then the tiny fc head in plain JAX.
# ----------------------------------------------------------------------------
def _pad_gru_layer(layer, in_sz, in_pad, H, Hp):
    """Pad per-gate so the (r|z|n) layout stays aligned after padding."""
    def pad_w(w_t, rows, rows_pad):                       # [rows, 3H]
        w3 = w_t.reshape(rows, 3, H)
        w3 = jnp.pad(w3, ((0, rows_pad - rows), (0, 0), (0, Hp - H)))
        return w3.reshape(rows_pad, 3 * Hp).astype(jnp.bfloat16)

    def pad_b(b):                                         # [1, 3H]
        b3 = b.reshape(1, 3, H)
        b3 = jnp.pad(b3, ((0, 0), (0, 0), (0, Hp - H)))
        return b3.reshape(1, 3 * Hp).astype(jnp.float32)

    return dict(
        wih_t=pad_w(layer["wih_t"], in_sz, in_pad),
        whh_t=pad_w(layer["whh_t"], H, Hp),
        bih=pad_b(layer["bih"]),
        bhh=pad_b(layer["bhh"]),
    )


@functools.partial(jax.jit, static_argnames=("gate_input_start_index",))
def gru_model_forward(x, params, gate_input_start_index):
    """Mirrors GRU.forward: slice features, 2-layer GRU, fc on last step."""
    src = x[:, :, :gate_input_start_index].astype(jnp.float32)   # [B, T, I]
    B, T, I = src.shape
    H = params["rnn"][0]["whh_t"].shape[0]
    Bp, Ip, Hp = _round_up(B, 8), _round_up(I, 128), _round_up(H, 128)

    x_tbi = jnp.transpose(src, (1, 0, 2))                        # [T, B, I]
    x_pad = jnp.pad(x_tbi, ((0, 0), (0, Bp - B), (0, Ip - I))
                    ).astype(jnp.bfloat16)                       # [T, Bp, Ip]

    padded_layers = []
    in_sz, in_pad = I, Ip
    for layer in params["rnn"]:
        padded_layers.append(_pad_gru_layer(layer, in_sz, in_pad, H, Hp))
        in_sz, in_pad = H, Hp

    h_last_pad = fused_gru(x_pad, padded_layers, Hp)             # [Bp, Hp]
    h_last = h_last_pad[:B, :H]                                  # [B, H]
    y = h_last @ params["fc_w_t"] + params["fc_b"]               # [B, 1] (plain JAX)
    return jnp.squeeze(y)                                        # [B]


# ----------------------------------------------------------------------------
# Deterministic parameter init (PyTorch-style uniform(-1/sqrt(H), 1/sqrt(H)))
# ----------------------------------------------------------------------------
def init_params(key, d_feat, hidden_size, num_layers):
    k = 1.0 / jnp.sqrt(hidden_size)
    layers = []
    for l in range(num_layers):
        in_size = d_feat if l == 0 else hidden_size
        key, k1, k2, k3, k4 = jax.random.split(key, 5)
        wih_t = jax.random.uniform(k1, (in_size, 3 * hidden_size),
                                   jnp.float32, -k, k)
        whh_t = jax.random.uniform(k2, (hidden_size, 3 * hidden_size),
                                   jnp.float32, -k, k)
        bih = jax.random.uniform(k3, (1, 3 * hidden_size), jnp.float32, -k, k)
        bhh = jax.random.uniform(k4, (1, 3 * hidden_size), jnp.float32, -k, k)
        layers.append(dict(wih_t=wih_t, whh_t=whh_t, bih=bih, bhh=bhh))
    key, k5, k6 = jax.random.split(key, 3)
    kf = 1.0 / jnp.sqrt(hidden_size)
    fc_w_t = jax.random.uniform(k5, (hidden_size, 1), jnp.float32, -kf, kf)
    fc_b = jax.random.uniform(k6, (1, 1), jnp.float32, -kf, kf)
    return dict(rnn=layers, fc_w_t=fc_w_t, fc_b=fc_b)


# ----------------------------------------------------------------------------
# Pure-JAX float32 reference (PyTorch-equivalent math) for correctness check
# ----------------------------------------------------------------------------
def reference_forward(x, params, gate_input_start_index):
    src = x[:, :, :gate_input_start_index].astype(jnp.float32)
    h_seq = jnp.transpose(src, (1, 0, 2))  # [T, B, I]
    for layer in params["rnn"]:
        H = layer["whh_t"].shape[0]
        B = h_seq.shape[1]

        def step(h, x_t, layer=layer, H=H):
            gi = x_t @ layer["wih_t"] + layer["bih"]
            gh = h @ layer["whh_t"] + layer["bhh"]
            r = jax.nn.sigmoid(gi[:, :H] + gh[:, :H])
            z = jax.nn.sigmoid(gi[:, H:2 * H] + gh[:, H:2 * H])
            n = jnp.tanh(gi[:, 2 * H:] + r * gh[:, 2 * H:])
            h_new = (1.0 - z) * n + z * h
            return h_new, h_new

        h0 = jnp.zeros((B, H), jnp.float32)
        _, h_seq = lax.scan(step, h0, h_seq)
    last = h_seq[-1]
    return jnp.squeeze(last @ params["fc_w_t"] + params["fc_b"])


# ----------------------------------------------------------------------------
if __name__ == "__main__":
    # Small shapes consistent with the module's forward.
    B, T = 2, 8
    D_FEAT = 16
    HIDDEN = 32
    NUM_LAYERS = 2
    GATE_START = 16            # == d_feat, matching the module's default relation
    F_TOTAL = 20               # input has extra features that get sliced away

    key = jax.random.PRNGKey(0)
    key, kx, kp = jax.random.split(key, 3)
    x = jax.random.normal(kx, (B, T, F_TOTAL), jnp.float32)
    params = init_params(kp, D_FEAT, HIDDEN, NUM_LAYERS)

    y = gru_model_forward(x, params, GATE_START)
    y = jax.block_until_ready(y)

    y_ref = reference_forward(x, params, GATE_START)
    assert y.shape == (B,), f"unexpected output shape {y.shape}"
    # Kernel uses bf16 matmul operands (f32 accumulate); reference is pure f32,
    # so allow a slightly looser tolerance than the bitwise-f32 version.
    assert jnp.allclose(y, y_ref, atol=3e-2, rtol=3e-2), (y, y_ref)

    print("KERNEL_OK")
</pallas_src>

<mosaic_0001>
module attributes {stable_mosaic.version = 11 : i64} {
  func.func @kernel(%arg0: memref<8x8x128xbf16, #tpu.memory_space<vmem>>, %arg1: memref<128x384xbf16, #tpu.memory_space<vmem>>, %arg2: memref<128x384xbf16, #tpu.memory_space<vmem>>, %arg3: memref<1x384xf32, #tpu.memory_space<vmem>>, %arg4: memref<1x384xf32, #tpu.memory_space<vmem>>, %arg5: memref<128x384xbf16, #tpu.memory_space<vmem>>, %arg6: memref<128x384xbf16, #tpu.memory_space<vmem>>, %arg7: memref<1x384xf32, #tpu.memory_space<vmem>>, %arg8: memref<1x384xf32, #tpu.memory_space<vmem>>, %arg9: memref<8x128xf32, #tpu.memory_space<vmem>>) attributes {dimension_semantics = [], scalar_prefetch = 0 : i64, scratch_operands = 0 : i64, tpu.core_type = #tpu.core_type<tc>} {
    %c0 = arith.constant 0 : index
    %c0_0 = arith.constant 0 : index
    %c0_1 = arith.constant 0 : index
    %0 = vector.load %arg0[%c0, %c0_0, %c0_1] : memref<8x8x128xbf16, #tpu.memory_space<vmem>>, vector<8x8x128xbf16>
    %1 = vector.shape_cast %0 : vector<8x8x128xbf16> to vector<64x128xbf16>
    %c0_2 = arith.constant 0 : index
    %c0_3 = arith.constant 0 : index
    %2 = vector.load %arg1[%c0_2, %c0_3] : memref<128x384xbf16, #tpu.memory_space<vmem>>, vector<128x384xbf16>
    %c0_4 = arith.constant 0 : index
    %c0_5 = arith.constant 0 : index
    %3 = vector.load %arg2[%c0_4, %c0_5] : memref<128x384xbf16, #tpu.memory_space<vmem>>, vector<128x384xbf16>
    %c0_6 = arith.constant 0 : index
    %c0_7 = arith.constant 0 : index
    %4 = vector.load %arg3[%c0_6, %c0_7] : memref<1x384xf32, #tpu.memory_space<vmem>>, vector<1x384xf32>
    %c0_8 = arith.constant 0 : index
    %c0_9 = arith.constant 0 : index
    %5 = vector.load %arg4[%c0_8, %c0_9] : memref<1x384xf32, #tpu.memory_space<vmem>>, vector<1x384xf32>
    %cst = arith.constant dense<0.000000e+00> : vector<64x384xf32>
    %6 = tpu.matmul %1, %2, %cst {dimension_numbers = #tpu.dot_dimension_numbers<[1], [0], [0], [1], [0, 0, 1, 1], [], []>} : vector<64x128xbf16>, vector<128x384xbf16>, vector<64x384xf32> -> vector<64x384xf32>
    %7 = vector.broadcast %4 : vector<1x384xf32> to vector<64x384xf32>
    %8 = arith.addf %6, %7 : vector<64x384xf32>
    %9 = vector.shape_cast %5 : vector<1x384xf32> to vector<1x384xf32>
    %10 = vector.broadcast %9 : vector<1x384xf32> to vector<8x384xf32>
    %cst_10 = arith.constant 0.000000e+00 : f32
    %11 = vector.broadcast %cst_10 : f32 to vector<8x128xf32>
    %12 = vector.extract_strided_slice %8 {offsets = [0, 0], sizes = [8, 384], strides = [1, 1]} : vector<64x384xf32> to vector<8x384xf32>
    %13 = arith.truncf %11 : vector<8x128xf32> to vector<8x128xbf16>
    %cst_11 = arith.constant dense<0.000000e+00> : vector<8x384xf32>
    %14 = tpu.matmul %13, %3, %cst_11 {dimension_numbers = #tpu.dot_dimension_numbers<[1], [0], [0], [1], [0, 0, 1, 1], [], []>} : vector<8x128xbf16>, vector<128x384xbf16>, vector<8x384xf32> -> vector<8x384xf32>
    %15 = arith.addf %14, %10 : vector<8x384xf32>
    %16 = vector.extract_strided_slice %12 {offsets = [0, 0], sizes = [8, 128], strides = [1, 1]} : vector<8x384xf32> to vector<8x128xf32>
    %17 = vector.extract_strided_slice %15 {offsets = [0, 0], sizes = [8, 128], strides = [1, 1]} : vector<8x384xf32> to vector<8x128xf32>
    %18 = arith.addf %16, %17 : vector<8x128xf32>
    %19 = arith.negf %18 : vector<8x128xf32>
    %20 = math.exp %19 : vector<8x128xf32>
    %cst_12 = arith.constant 1.000000e+00 : f32
    %21 = vector.broadcast %cst_12 : f32 to vector<8x128xf32>
    %22 = arith.addf %21, %20 : vector<8x128xf32>
    %23 = arith.divf %21, %22 : vector<8x128xf32>
    %24 = vector.extract_strided_slice %12 {offsets = [0, 128], sizes = [8, 128], strides = [1, 1]} : vector<8x384xf32> to vector<8x128xf32>
    %25 = vector.extract_strided_slice %15 {offsets = [0, 128], sizes = [8, 128], strides = [1, 1]} : vector<8x384xf32> to vector<8x128xf32>
    %26 = arith.addf %24, %25 : vector<8x128xf32>
    %27 = arith.negf %26 : vector<8x128xf32>
    %28 = math.exp %27 : vector<8x128xf32>
    %cst_13 = arith.constant 1.000000e+00 : f32
    %29 = vector.broadcast %cst_13 : f32 to vector<8x128xf32>
    %30 = arith.addf %29, %28 : vector<8x128xf32>
    %31 = arith.divf %29, %30 : vector<8x128xf32>
    %32 = vector.extract_strided_slice %12 {offsets = [0, 256], sizes = [8, 128], strides = [1, 1]} : vector<8x384xf32> to vector<8x128xf32>
    %33 = vector.extract_strided_slice %15 {offsets = [0, 256], sizes = [8, 128], strides = [1, 1]} : vector<8x384xf32> to vector<8x128xf32>
    %34 = arith.mulf %23, %33 : vector<8x128xf32>
    %35 = arith.addf %32, %34 : vector<8x128xf32>
    %36 = math.tanh %35 : vector<8x128xf32>
    %cst_14 = arith.constant 1.000000e+00 : f32
    %37 = vector.broadcast %cst_14 : f32 to vector<8x128xf32>
    %38 = arith.subf %37, %31 : vector<8x128xf32>
    %39 = arith.mulf %38, %36 : vector<8x128xf32>
    %40 = arith.mulf %31, %11 : vector<8x128xf32>
    %41 = arith.addf %39, %40 : vector<8x128xf32>
    %42 = vector.extract_strided_slice %8 {offsets = [8, 0], sizes = [8, 384], strides = [1, 1]} : vector<64x384xf32> to vector<8x384xf32>
    %43 = arith.truncf %41 : vector<8x128xf32> to vector<8x128xbf16>
    %cst_15 = arith.constant dense<0.000000e+00> : vector<8x384xf32>
    %44 = tpu.matmul %43, %3, %cst_15 {dimension_numbers = #tpu.dot_dimension_numbers<[1], [0], [0], [1], [0, 0, 1, 1], [], []>} : vector<8x128xbf16>, vector<128x384xbf16>, vector<8x384xf32> -> vector<8x384xf32>
    %45 = arith.addf %44, %10 : vector<8x384xf32>
    %46 = vector.extract_strided_slice %42 {offsets = [0, 0], sizes = [8, 128], strides = [1, 1]} : vector<8x384xf32> to vector<8x128xf32>
    %47 = vector.extract_strided_slice %45 {offsets = [0, 0], sizes = [8, 128], strides = [1, 1]} : vector<8x384xf32> to vector<8x128xf32>
    %48 = arith.addf %46, %47 : vector<8x128xf32>
    %49 = arith.negf %48 : vector<8x128xf32>
    %50 = math.exp %49 : vector<8x128xf32>
    %cst_16 = arith.constant 1.000000e+00 : f32
    %51 = vector.broadcast %cst_16 : f32 to vector<8x128xf32>
    %52 = arith.addf %51, %50 : vector<8x128xf32>
    %53 = arith.divf %51, %52 : vector<8x128xf32>
    %54 = vector.extract_strided_slice %42 {offsets = [0, 128], sizes = [8, 128], strides = [1, 1]} : vector<8x384xf32> to vector<8x128xf32>
    %55 = vector.extract_strided_slice %45 {offsets = [0, 128], sizes = [8, 128], strides = [1, 1]} : vector<8x384xf32> to vector<8x128xf32>
    %56 = arith.addf %54, %55 : vector<8x128xf32>
    %57 = arith.negf %56 : vector<8x128xf32>
    %58 = math.exp %57 : vector<8x128xf32>
    %cst_17 = arith.constant 1.000000e+00 : f32
    %59 = vector.broadcast %cst_17 : f32 to vector<8x128xf32>
    %60 = arith.addf %59, %58 : vector<8x128xf32>
    %61 = arith.divf %59, %60 : vector<8x128xf32>
    %62 = vector.extract_strided_slice %42 {offsets = [0, 256], sizes = [8, 128], strides = [1, 1]} : vector<8x384xf32> to vector<8x128xf32>
    %63 = vector.extract_strided_slice %45 {offsets = [0, 256], sizes = [8, 128], strides = [1, 1]} : vector<8x384xf32> to vector<8x128xf32>
    %64 = arith.mulf %53, %63 : vector<8x128xf32>
    %65 = arith.addf %62, %64 : vector<8x128xf32>
    %66 = math.tanh %65 : vector<8x128xf32>
    %cst_18 = arith.constant 1.000000e+00 : f32
    %67 = vector.broadcast %cst_18 : f32 to vector<8x128xf32>
    %68 = arith.subf %67, %61 : vector<8x128xf32>
    %69 = arith.mulf %68, %66 : vector<8x128xf32>
    %70 = arith.mulf %61, %41 : vector<8x128xf32>
    %71 = arith.addf %69, %70 : vector<8x128xf32>
    %72 = vector.extract_strided_slice %8 {offsets = [16, 0], sizes = [8, 384], strides = [1, 1]} : vector<64x384xf32> to vector<8x384xf32>
    %73 = arith.truncf %71 : vector<8x128xf32> to vector<8x128xbf16>
    %cst_19 = arith.constant dense<0.000000e+00> : vector<8x384xf32>
    %74 = tpu.matmul %73, %3, %cst_19 {dimension_numbers = #tpu.dot_dimension_numbers<[1], [0], [0], [1], [0, 0, 1, 1], [], []>} : vector<8x128xbf16>, vector<128x384xbf16>, vector<8x384xf32> -> vector<8x384xf32>
    %75 = arith.addf %74, %10 : vector<8x384xf32>
    %76 = vector.extract_strided_slice %72 {offsets = [0, 0], sizes = [8, 128], strides = [1, 1]} : vector<8x384xf32> to vector<8x128xf32>
    %77 = vector.extract_strided_slice %75 {offsets = [0, 0], sizes = [8, 128], strides = [1, 1]} : vector<8x384xf32> to vector<8x128xf32>
    %78 = arith.addf %76, %77 : vector<8x128xf32>
    %79 = arith.negf %78 : vector<8x128xf32>
    %80 = math.exp %79 : vector<8x128xf32>
    %cst_20 = arith.constant 1.000000e+00 : f32
    %81 = vector.broadcast %cst_20 : f32 to vector<8x128xf32>
    %82 = arith.addf %81, %80 : vector<8x128xf32>
    %83 = arith.divf %81, %82 : vector<8x128xf32>
    %84 = vector.extract_strided_slice %72 {offsets = [0, 128], sizes = [8, 128], strides = [1, 1]} : vector<8x384xf32> to vector<8x128xf32>
    %85 = vector.extract_strided_slice %75 {offsets = [0, 128], sizes = [8, 128], strides = [1, 1]} : vector<8x384xf32> to vector<8x128xf32>
    %86 = arith.addf %84, %85 : vector<8x128xf32>
    %87 = arith.negf %86 : vector<8x128xf32>
    %88 = math.exp %87 : vector<8x128xf32>
    %cst_21 = arith.constant 1.000000e+00 : f32
    %89 = vector.broadcast %cst_21 : f32 to vector<8x128xf32>
    %90 = arith.addf %89, %88 : vector<8x128xf32>
    %91 = arith.divf %89, %90 : vector<8x128xf32>
    %92 = vector.extract_strided_slice %72 {offsets = [0, 256], sizes = [8, 128], strides = [1, 1]} : vector<8x384xf32> to vector<8x128xf32>
    %93 = vector.extract_strided_slice %75 {offsets = [0, 256], sizes = [8, 128], strides = [1, 1]} : vector<8x384xf32> to vector<8x128xf32>
    %94 = arith.mulf %83, %93 : vector<8x128xf32>
    %95 = arith.addf %92, %94 : vector<8x128xf32>
    %96 = math.tanh %95 : vector<8x128xf32>
    %cst_22 = arith.constant 1.000000e+00 : f32
    %97 = vector.broadcast %cst_22 : f32 to vector<8x128xf32>
    %98 = arith.subf %97, %91 : vector<8x128xf32>
    %99 = arith.mulf %98, %96 : vector<8x128xf32>
    %100 = arith.mulf %91, %71 : vector<8x128xf32>
    %101 = arith.addf %99, %100 : vector<8x128xf32>
    %102 = vector.extract_strided_slice %8 {offsets = [24, 0], sizes = [8, 384], strides = [1, 1]} : vector<64x384xf32> to vector<8x384xf32>
    %103 = arith.truncf %101 : vector<8x128xf32> to vector<8x128xbf16>
    %cst_23 = arith.constant dense<0.000000e+00> : vector<8x384xf32>
    %104 = tpu.matmul %103, %3, %cst_23 {dimension_numbers = #tpu.dot_dimension_numbers<[1], [0], [0], [1], [0, 0, 1, 1], [], []>} : vector<8x128xbf16>, vector<128x384xbf16>, vector<8x384xf32> -> vector<8x384xf32>
    %105 = arith.addf %104, %10 : vector<8x384xf32>
    %106 = vector.extract_strided_slice %102 {offsets = [0, 0], sizes = [8, 128], strides = [1, 1]} : vector<8x384xf32> to vector<8x128xf32>
    %107 = vector.extract_strided_slice %105 {offsets = [0, 0], sizes = [8, 128], strides = [1, 1]} : vector<8x384xf32> to vector<8x128xf32>
    %108 = arith.addf %106, %107 : vector<8x128xf32>
    %109 = arith.negf %108 : vector<8x128xf32>
    %110 = math.exp %109 : vector<8x128xf32>
    %cst_24 = arith.constant 1.000000e+00 : f32
    %111 = vector.broadcast %cst_24 : f32 to vector<8x128xf32>
    %112 = arith.addf %111, %110 : vector<8x128xf32>
    %113 = arith.divf %111, %112 : vector<8x128xf32>
    %114 = vector.extract_strided_slice %102 {offsets = [0, 128], sizes = [8, 128], strides = [1, 1]} : vector<8x384xf32> to vector<8x128xf32>
    %115 = vector.extract_strided_slice %105 {offsets = [0, 128], sizes = [8, 128], strides = [1, 1]} : vector<8x384xf32> to vector<8x128xf32>
    %116 = arith.addf %114, %115 : vector<8x128xf32>
    %117 = arith.negf %116 : vector<8x128xf32>
    %118 = math.exp %117 : vector<8x128xf32>
    %cst_25 = arith.constant 1.000000e+00 : f32
    %119 = vector.broadcast %cst_25 : f32 to vector<8x128xf32>
    %120 = arith.addf %119, %118 : vector<8x128xf32>
    %121 = arith.divf %119, %120 : vector<8x128xf32>
    %122 = vector.extract_strided_slice %102 {offsets = [0, 256], sizes = [8, 128], strides = [1, 1]} : vector<8x384xf32> to vector<8x128xf32>
    %123 = vector.extract_strided_slice %105 {offsets = [0, 256], sizes = [8, 128], strides = [1, 1]} : vector<8x384xf32> to vector<8x128xf32>
    %124 = arith.mulf %113, %123 : vector<8x128xf32>
    %125 = arith.addf %122, %124 : vector<8x128xf32>
    %126 = math.tanh %125 : vector<8x128xf32>
    %cst_26 = arith.constant 1.000000e+00 : f32
    %127 = vector.broadcast %cst_26 : f32 to vector<8x128xf32>
    %128 = arith.subf %127, %121 : vector<8x128xf32>
    %129 = arith.mulf %128, %126 : vector<8x128xf32>
    %130 = arith.mulf %121, %101 : vector<8x128xf32>
    %131 = arith.addf %129, %130 : vector<8x128xf32>
    %132 = vector.extract_strided_slice %8 {offsets = [32, 0], sizes = [8, 384], strides = [1, 1]} : vector<64x384xf32> to vector<8x384xf32>
    %133 = arith.truncf %131 : vector<8x128xf32> to vector<8x128xbf16>
    %cst_27 = arith.constant dense<0.000000e+00> : vector<8x384xf32>
    %134 = tpu.matmul %133, %3, %cst_27 {dimension_numbers = #tpu.dot_dimension_numbers<[1], [0], [0], [1], [0, 0, 1, 1], [], []>} : vector<8x128xbf16>, vector<128x384xbf16>, vector<8x384xf32> -> vector<8x384xf32>
    %135 = arith.addf %134, %10 : vector<8x384xf32>
    %136 = vector.extract_strided_slice %132 {offsets = [0, 0], sizes = [8, 128], strides = [1, 1]} : vector<8x384xf32> to vector<8x128xf32>
    %137 = vector.extract_strided_slice %135 {offsets = [0, 0], sizes = [8, 128], strides = [1, 1]} : vector<8x384xf32> to vector<8x128xf32>
    %138 = arith.addf %136, %137 : vector<8x128xf32>
    %139 = arith.negf %138 : vector<8x128xf32>
    %140 = math.exp %139 : vector<8x128xf32>
    %cst_28 = arith.constant 1.000000e+00 : f32
    %141 = vector.broadcast %cst_28 : f32 to vector<8x128xf32>
    %142 = arith.addf %141, %140 : vector<8x128xf32>
    %143 = arith.divf %141, %142 : vector<8x128xf32>
    %144 = vector.extract_strided_slice %132 {offsets = [0, 128], sizes = [8, 128], strides = [1, 1]} : vector<8x384xf32> to vector<8x128xf32>
    %145 = vector.extract_strided_slice %135 {offsets = [0, 128], sizes = [8, 128], strides = [1, 1]} : vector<8x384xf32> to vector<8x128xf32>
    %146 = arith.addf %144, %145 : vector<8x128xf32>
    %147 = arith.negf %146 : vector<8x128xf32>
    %148 = math.exp %147 : vector<8x128xf32>
    %cst_29 = arith.constant 1.000000e+00 : f32
    %149 = vector.broadcast %cst_29 : f32 to vector<8x128xf32>
    %150 = arith.addf %149, %148 : vector<8x128xf32>
    %151 = arith.divf %149, %150 : vector<8x128xf32>
    %152 = vector.extract_strided_slice %132 {offsets = [0, 256], sizes = [8, 128], strides = [1, 1]} : vector<8x384xf32> to vector<8x128xf32>
    %153 = vector.extract_strided_slice %135 {offsets = [0, 256], sizes = [8, 128], strides = [1, 1]} : vector<8x384xf32> to vector<8x128xf32>
    %154 = arith.mulf %143, %153 : vector<8x128xf32>
    %155 = arith.addf %152, %154 : vector<8x128xf32>
    %156 = math.tanh %155 : vector<8x128xf32>
    %cst_30 = arith.constant 1.000000e+00 : f32
    %157 = vector.broadcast %cst_30 : f32 to vector<8x128xf32>
    %158 = arith.subf %157, %151 : vector<8x128xf32>
    %159 = arith.mulf %158, %156 : vector<8x128xf32>
    %160 = arith.mulf %151, %131 : vector<8x128xf32>
    %161 = arith.addf %159, %160 : vector<8x128xf32>
    %162 = vector.extract_strided_slice %8 {offsets = [40, 0], sizes = [8, 384], strides = [1, 1]} : vector<64x384xf32> to vector<8x384xf32>
    %163 = arith.truncf %161 : vector<8x128xf32> to vector<8x128xbf16>
    %cst_31 = arith.constant dense<0.000000e+00> : vector<8x384xf32>
    %164 = tpu.matmul %163, %3, %cst_31 {dimension_numbers = #tpu.dot_dimension_numbers<[1], [0], [0], [1], [0, 0, 1, 1], [], []>} : vector<8x128xbf16>, vector<128x384xbf16>, vector<8x384xf32> -> vector<8x384xf32>
    %165 = arith.addf %164, %10 : vector<8x384xf32>
    %166 = vector.extract_strided_slice %162 {offsets = [0, 0], sizes = [8, 128], strides = [1, 1]} : vector<8x384xf32> to vector<8x128xf32>
    %167 = vector.extract_strided_slice %165 {offsets = [0, 0], sizes = [8, 128], strides = [1, 1]} : vector<8x384xf32> to vector<8x128xf32>
    %168 = arith.addf %166, %167 : vector<8x128xf32>
    %169 = arith.negf %168 : vector<8x128xf32>
    %170 = math.exp %169 : vector<8x128xf32>
    %cst_32 = arith.constant 1.000000e+00 : f32
    %171 = vector.broadcast %cst_32 : f32 to vector<8x128xf32>
    %172 = arith.addf %171, %170 : vector<8x128xf32>
    %173 = arith.divf %171, %172 : vector<8x128xf32>
    %174 = vector.extract_strided_slice %162 {offsets = [0, 128], sizes = [8, 128], strides = [1, 1]} : vector<8x384xf32> to vector<8x128xf32>
    %175 = vector.extract_strided_slice %165 {offsets = [0, 128], sizes = [8, 128], strides = [1, 1]} : vector<8x384xf32> to vector<8x128xf32>
    %176 = arith.addf %174, %175 : vector<8x128xf32>
    %177 = arith.negf %176 : vector<8x128xf32>
    %178 = math.exp %177 : vector<8x128xf32>
    %cst_33 = arith.constant 1.000000e+00 : f32
    %179 = vector.broadcast %cst_33 : f32 to vector<8x128xf32>
    %180 = arith.addf %179, %178 : vector<8x128xf32>
    %181 = arith.divf %179, %180 : vector<8x128xf32>
    %182 = vector.extract_strided_slice %162 {offsets = [0, 256], sizes = [8, 128], strides = [1, 1]} : vector<8x384xf32> to vector<8x128xf32>
    %183 = vector.extract_strided_slice %165 {offsets = [0, 256], sizes = [8, 128], strides = [1, 1]} : vector<8x384xf32> to vector<8x128xf32>
    %184 = arith.mulf %173, %183 : vector<8x128xf32>
    %185 = arith.addf %182, %184 : vector<8x128xf32>
    %186 = math.tanh %185 : vector<8x128xf32>
    %cst_34 = arith.constant 1.000000e+00 : f32
    %187 = vector.broadcast %cst_34 : f32 to vector<8x128xf32>
    %188 = arith.subf %187, %181 : vector<8x128xf32>
    %189 = arith.mulf %188, %186 : vector<8x128xf32>
    %190 = arith.mulf %181, %161 : vector<8x128xf32>
    %191 = arith.addf %189, %190 : vector<8x128xf32>
    %192 = vector.extract_strided_slice %8 {offsets = [48, 0], sizes = [8, 384], strides = [1, 1]} : vector<64x384xf32> to vector<8x384xf32>
    %193 = arith.truncf %191 : vector<8x128xf32> to vector<8x128xbf16>
    %cst_35 = arith.constant dense<0.000000e+00> : vector<8x384xf32>
    %194 = tpu.matmul %193, %3, %cst_35 {dimension_numbers = #tpu.dot_dimension_numbers<[1], [0], [0], [1], [0, 0, 1, 1], [], []>} : vector<8x128xbf16>, vector<128x384xbf16>, vector<8x384xf32> -> vector<8x384xf32>
    %195 = arith.addf %194, %10 : vector<8x384xf32>
    %196 = vector.extract_strided_slice %192 {offsets = [0, 0], sizes = [8, 128], strides = [1, 1]} : vector<8x384xf32> to vector<8x128xf32>
    %197 = vector.extract_strided_slice %195 {offsets = [0, 0], sizes = [8, 128], strides = [1, 1]} : vector<8x384xf32> to vector<8x128xf32>
    %198 = arith.addf %196, %197 : vector<8x128xf32>
    %199 = arith.negf %198 : vector<8x128xf32>
    %200 = math.exp %199 : vector<8x128xf32>
    %cst_36 = arith.constant 1.000000e+00 : f32
    %201 = vector.broadcast %cst_36 : f32 to vector<8x128xf32>
    %202 = arith.addf %201, %200 : vector<8x128xf32>
    %203 = arith.divf %201, %202 : vector<8x128xf32>
    %204 = vector.extract_strided_slice %192 {offsets = [0, 128], sizes = [8, 128], strides = [1, 1]} : vector<8x384xf32> to vector<8x128xf32>
    %205 = vector.extract_strided_slice %195 {offsets = [0, 128], sizes = [8, 128], strides = [1, 1]} : vector<8x384xf32> to vector<8x128xf32>
    %206 = arith.addf %204, %205 : vector<8x128xf32>
    %207 = arith.negf %206 : vector<8x128xf32>
    %208 = math.exp %207 : vector<8x128xf32>
    %cst_37 = arith.constant 1.000000e+00 : f32
    %209 = vector.broadcast %cst_37 : f32 to vector<8x128xf32>
    %210 = arith.addf %209, %208 : vector<8x128xf32>
    %211 = arith.divf %209, %210 : vector<8x128xf32>
    %212 = vector.extract_strided_slice %192 {offsets = [0, 256], sizes = [8, 128], strides = [1, 1]} : vector<8x384xf32> to vector<8x128xf32>
    %213 = vector.extract_strided_slice %195 {offsets = [0, 256], sizes = [8, 128], strides = [1, 1]} : vector<8x384xf32> to vector<8x128xf32>
    %214 = arith.mulf %203, %213 : vector<8x128xf32>
    %215 = arith.addf %212, %214 : vector<8x128xf32>
    %216 = math.tanh %215 : vector<8x128xf32>
    %cst_38 = arith.constant 1.000000e+00 : f32
    %217 = vector.broadcast %cst_38 : f32 to vector<8x128xf32>
    %218 = arith.subf %217, %211 : vector<8x128xf32>
    %219 = arith.mulf %218, %216 : vector<8x128xf32>
    %220 = arith.mulf %211, %191 : vector<8x128xf32>
    %221 = arith.addf %219, %220 : vector<8x128xf32>
    %222 = vector.extract_strided_slice %8 {offsets = [56, 0], sizes = [8, 384], strides = [1, 1]} : vector<64x384xf32> to vector<8x384xf32>
    %223 = arith.truncf %221 : vector<8x128xf32> to vector<8x128xbf16>
    %cst_39 = arith.constant dense<0.000000e+00> : vector<8x384xf32>
    %224 = tpu.matmul %223, %3, %cst_39 {dimension_numbers = #tpu.dot_dimension_numbers<[1], [0], [0], [1], [0, 0, 1, 1], [], []>} : vector<8x128xbf16>, vector<128x384xbf16>, vector<8x384xf32> -> vector<8x384xf32>
    %225 = arith.addf %224, %10 : vector<8x384xf32>
    %226 = vector.extract_strided_slice %222 {offsets = [0, 0], sizes = [8, 128], strides = [1, 1]} : vector<8x384xf32> to vector<8x128xf32>
    %227 = vector.extract_strided_slice %225 {offsets = [0, 0], sizes = [8, 128], strides = [1, 1]} : vector<8x384xf32> to vector<8x128xf32>
    %228 = arith.addf %226, %227 : vector<8x128xf32>
    %229 = arith.negf %228 : vector<8x128xf32>
    %230 = math.exp %229 : vector<8x128xf32>
    %cst_40 = arith.constant 1.000000e+00 : f32
    %231 = vector.broadcast %cst_40 : f32 to vector<8x128xf32>
    %232 = arith.addf %231, %230 : vector<8x128xf32>
    %233 = arith.divf %231, %232 : vector<8x128xf32>
    %234 = vector.extract_strided_slice %222 {offsets = [0, 128], sizes = [8, 128], strides = [1, 1]} : vector<8x384xf32> to vector<8x128xf32>
    %235 = vector.extract_strided_slice %225 {offsets = [0, 128], sizes = [8, 128], strides = [1, 1]} : vector<8x384xf32> to vector<8x128xf32>
    %236 = arith.addf %234, %235 : vector<8x128xf32>
    %237 = arith.negf %236 : vector<8x128xf32>
    %238 = math.exp %237 : vector<8x128xf32>
    %cst_41 = arith.constant 1.000000e+00 : f32
    %239 = vector.broadcast %cst_41 : f32 to vector<8x128xf32>
    %240 = arith.addf %239, %238 : vector<8x128xf32>
    %241 = arith.divf %239, %240 : vector<8x128xf32>
    %242 = vector.extract_strided_slice %222 {offsets = [0, 256], sizes = [8, 128], strides = [1, 1]} : vector<8x384xf32> to vector<8x128xf32>
    %243 = vector.extract_strided_slice %225 {offsets = [0, 256], sizes = [8, 128], strides = [1, 1]} : vector<8x384xf32> to vector<8x128xf32>
    %244 = arith.mulf %233, %243 : vector<8x128xf32>
    %245 = arith.addf %242, %244 : vector<8x128xf32>
    %246 = math.tanh %245 : vector<8x128xf32>
    %cst_42 = arith.constant 1.000000e+00 : f32
    %247 = vector.broadcast %cst_42 : f32 to vector<8x128xf32>
    %248 = arith.subf %247, %241 : vector<8x128xf32>
    %249 = arith.mulf %248, %246 : vector<8x128xf32>
    %250 = arith.mulf %241, %221 : vector<8x128xf32>
    %251 = arith.addf %249, %250 : vector<8x128xf32>
    %252 = tpu.concatenate %41, %71, %101, %131, %161, %191, %221, %251 in 0 : vector<8x128xf32>, vector<8x128xf32>, vector<8x128xf32>, vector<8x128xf32>, vector<8x128xf32>, vector<8x128xf32>, vector<8x128xf32>, vector<8x128xf32> -> vector<64x128xf32>
    %253 = arith.truncf %252 : vector<64x128xf32> to vector<64x128xbf16>
    %c0_43 = arith.constant 0 : index
    %c0_44 = arith.constant 0 : index
    %254 = vector.load %arg5[%c0_43, %c0_44] : memref<128x384xbf16, #tpu.memory_space<vmem>>, vector<128x384xbf16>
    %c0_45 = arith.constant 0 : index
    %c0_46 = arith.constant 0 : index
    %255 = vector.load %arg6[%c0_45, %c0_46] : memref<128x384xbf16, #tpu.memory_space<vmem>>, vector<128x384xbf16>
    %c0_47 = arith.constant 0 : index
    %c0_48 = arith.constant 0 : index
    %256 = vector.load %arg7[%c0_47, %c0_48] : memref<1x384xf32, #tpu.memory_space<vmem>>, vector<1x384xf32>
    %c0_49 = arith.constant 0 : index
    %c0_50 = arith.constant 0 : index
    %257 = vector.load %arg8[%c0_49, %c0_50] : memref<1x384xf32, #tpu.memory_space<vmem>>, vector<1x384xf32>
    %cst_51 = arith.constant dense<0.000000e+00> : vector<64x384xf32>
    %258 = tpu.matmul %253, %254, %cst_51 {dimension_numbers = #tpu.dot_dimension_numbers<[1], [0], [0], [1], [0, 0, 1, 1], [], []>} : vector<64x128xbf16>, vector<128x384xbf16>, vector<64x384xf32> -> vector<64x384xf32>
    %259 = vector.broadcast %256 : vector<1x384xf32> to vector<64x384xf32>
    %260 = arith.addf %258, %259 : vector<64x384xf32>
    %261 = vector.shape_cast %257 : vector<1x384xf32> to vector<1x384xf32>
    %262 = vector.broadcast %261 : vector<1x384xf32> to vector<8x384xf32>
    %cst_52 = arith.constant 0.000000e+00 : f32
    %263 = vector.broadcast %cst_52 : f32 to vector<8x128xf32>
    %264 = vector.extract_strided_slice %260 {offsets = [0, 0], sizes = [8, 384], strides = [1, 1]} : vector<64x384xf32> to vector<8x384xf32>
    %265 = arith.truncf %263 : vector<8x128xf32> to vector<8x128xbf16>
    %cst_53 = arith.constant dense<0.000000e+00> : vector<8x384xf32>
    %266 = tpu.matmul %265, %255, %cst_53 {dimension_numbers = #tpu.dot_dimension_numbers<[1], [0], [0], [1], [0, 0, 1, 1], [], []>} : vector<8x128xbf16>, vector<128x384xbf16>, vector<8x384xf32> -> vector<8x384xf32>
    %267 = arith.addf %266, %262 : vector<8x384xf32>
    %268 = vector.extract_strided_slice %264 {offsets = [0, 0], sizes = [8, 128], strides = [1, 1]} : vector<8x384xf32> to vector<8x128xf32>
    %269 = vector.extract_strided_slice %267 {offsets = [0, 0], sizes = [8, 128], strides = [1, 1]} : vector<8x384xf32> to vector<8x128xf32>
    %270 = arith.addf %268, %269 : vector<8x128xf32>
    %271 = arith.negf %270 : vector<8x128xf32>
    %272 = math.exp %271 : vector<8x128xf32>
    %cst_54 = arith.constant 1.000000e+00 : f32
    %273 = vector.broadcast %cst_54 : f32 to vector<8x128xf32>
    %274 = arith.addf %273, %272 : vector<8x128xf32>
    %275 = arith.divf %273, %274 : vector<8x128xf32>
    %276 = vector.extract_strided_slice %264 {offsets = [0, 128], sizes = [8, 128], strides = [1, 1]} : vector<8x384xf32> to vector<8x128xf32>
    %277 = vector.extract_strided_slice %267 {offsets = [0, 128], sizes = [8, 128], strides = [1, 1]} : vector<8x384xf32> to vector<8x128xf32>
    %278 = arith.addf %276, %277 : vector<8x128xf32>
    %279 = arith.negf %278 : vector<8x128xf32>
    %280 = math.exp %279 : vector<8x128xf32>
    %cst_55 = arith.constant 1.000000e+00 : f32
    %281 = vector.broadcast %cst_55 : f32 to vector<8x128xf32>
    %282 = arith.addf %281, %280 : vector<8x128xf32>
    %283 = arith.divf %281, %282 : vector<8x128xf32>
    %284 = vector.extract_strided_slice %264 {offsets = [0, 256], sizes = [8, 128], strides = [1, 1]} : vector<8x384xf32> to vector<8x128xf32>
    %285 = vector.extract_strided_slice %267 {offsets = [0, 256], sizes = [8, 128], strides = [1, 1]} : vector<8x384xf32> to vector<8x128xf32>
    %286 = arith.mulf %275, %285 : vector<8x128xf32>
    %287 = arith.addf %284, %286 : vector<8x128xf32>
    %288 = math.tanh %287 : vector<8x128xf32>
    %cst_56 = arith.constant 1.000000e+00 : f32
    %289 = vector.broadcast %cst_56 : f32 to vector<8x128xf32>
    %290 = arith.subf %289, %283 : vector<8x128xf32>
    %291 = arith.mulf %290, %288 : vector<8x128xf32>
    %292 = arith.mulf %283, %263 : vector<8x128xf32>
    %293 = arith.addf %291, %292 : vector<8x128xf32>
    %294 = vector.extract_strided_slice %260 {offsets = [8, 0], sizes = [8, 384], strides = [1, 1]} : vector<64x384xf32> to vector<8x384xf32>
    %295 = arith.truncf %293 : vector<8x128xf32> to vector<8x128xbf16>
    %cst_57 = arith.constant dense<0.000000e+00> : vector<8x384xf32>
    %296 = tpu.matmul %295, %255, %cst_57 {dimension_numbers = #tpu.dot_dimension_numbers<[1], [0], [0], [1], [0, 0, 1, 1], [], []>} : vector<8x128xbf16>, vector<128x384xbf16>, vector<8x384xf32> -> vector<8x384xf32>
    %297 = arith.addf %296, %262 : vector<8x384xf32>
    %298 = vector.extract_strided_slice %294 {offsets = [0, 0], sizes = [8, 128], strides = [1, 1]} : vector<8x384xf32> to vector<8x128xf32>
    %299 = vector.extract_strided_slice %297 {offsets = [0, 0], sizes = [8, 128], strides = [1, 1]} : vector<8x384xf32> to vector<8x128xf32>
    %300 = arith.addf %298, %299 : vector<8x128xf32>
    %301 = arith.negf %300 : vector<8x128xf32>
    %302 = math.exp %301 : vector<8x128xf32>
    %cst_58 = arith.constant 1.000000e+00 : f32
    %303 = vector.broadcast %cst_58 : f32 to vector<8x128xf32>
    %304 = arith.addf %303, %302 : vector<8x128xf32>
    %305 = arith.divf %303, %304 : vector<8x128xf32>
    %306 = vector.extract_strided_slice %294 {offsets = [0, 128], sizes = [8, 128], strides = [1, 1]} : vector<8x384xf32> to vector<8x128xf32>
    %307 = vector.extract_strided_slice %297 {offsets = [0, 128], sizes = [8, 128], strides = [1, 1]} : vector<8x384xf32> to vector<8x128xf32>
    %308 = arith.addf %306, %307 : vector<8x128xf32>
    %309 = arith.negf %308 : vector<8x128xf32>
    %310 = math.exp %309 : vector<8x128xf32>
    %cst_59 = arith.constant 1.000000e+00 : f32
    %311 = vector.broadcast %cst_59 : f32 to vector<8x128xf32>
    %312 = arith.addf %311, %310 : vector<8x128xf32>
    %313 = arith.divf %311, %312 : vector<8x128xf32>
    %314 = vector.extract_strided_slice %294 {offsets = [0, 256], sizes = [8, 128], strides = [1, 1]} : vector<8x384xf32> to vector<8x128xf32>
    %315 = vector.extract_strided_slice %297 {offsets = [0, 256], sizes = [8, 128], strides = [1, 1]} : vector<8x384xf32> to vector<8x128xf32>
    %316 = arith.mulf %305, %315 : vector<8x128xf32>
    %317 = arith.addf %314, %316 : vector<8x128xf32>
    %318 = math.tanh %317 : vector<8x128xf32>
    %cst_60 = arith.constant 1.000000e+00 : f32
    %319 = vector.broadcast %cst_60 : f32 to vector<8x128xf32>
    %320 = arith.subf %319, %313 : vector<8x128xf32>
    %321 = arith.mulf %320, %318 : vector<8x128xf32>
    %322 = arith.mulf %313, %293 : vector<8x128xf32>
    %323 = arith.addf %321, %322 : vector<8x128xf32>
    %324 = vector.extract_strided_slice %260 {offsets = [16, 0], sizes = [8, 384], strides = [1, 1]} : vector<64x384xf32> to vector<8x384xf32>
    %325 = arith.truncf %323 : vector<8x128xf32> to vector<8x128xbf16>
    %cst_61 = arith.constant dense<0.000000e+00> : vector<8x384xf32>
    %326 = tpu.matmul %325, %255, %cst_61 {dimension_numbers = #tpu.dot_dimension_numbers<[1], [0], [0], [1], [0, 0, 1, 1], [], []>} : vector<8x128xbf16>, vector<128x384xbf16>, vector<8x384xf32> -> vector<8x384xf32>
    %327 = arith.addf %326, %262 : vector<8x384xf32>
    %328 = vector.extract_strided_slice %324 {offsets = [0, 0], sizes = [8, 128], strides = [1, 1]} : vector<8x384xf32> to vector<8x128xf32>
    %329 = vector.extract_strided_slice %327 {offsets = [0, 0], sizes = [8, 128], strides = [1, 1]} : vector<8x384xf32> to vector<8x128xf32>
    %330 = arith.addf %328, %329 : vector<8x128xf32>
    %331 = arith.negf %330 : vector<8x128xf32>
    %332 = math.exp %331 : vector<8x128xf32>
    %cst_62 = arith.constant 1.000000e+00 : f32
    %333 = vector.broadcast %cst_62 : f32 to vector<8x128xf32>
    %334 = arith.addf %333, %332 : vector<8x128xf32>
    %335 = arith.divf %333, %334 : vector<8x128xf32>
    %336 = vector.extract_strided_slice %324 {offsets = [0, 128], sizes = [8, 128], strides = [1, 1]} : vector<8x384xf32> to vector<8x128xf32>
    %337 = vector.extract_strided_slice %327 {offsets = [0, 128], sizes = [8, 128], strides = [1, 1]} : vector<8x384xf32> to vector<8x128xf32>
    %338 = arith.addf %336, %337 : vector<8x128xf32>
    %339 = arith.negf %338 : vector<8x128xf32>
    %340 = math.exp %339 : vector<8x128xf32>
    %cst_63 = arith.constant 1.000000e+00 : f32
    %341 = vector.broadcast %cst_63 : f32 to vector<8x128xf32>
    %342 = arith.addf %341, %340 : vector<8x128xf32>
    %343 = arith.divf %341, %342 : vector<8x128xf32>
    %344 = vector.extract_strided_slice %324 {offsets = [0, 256], sizes = [8, 128], strides = [1, 1]} : vector<8x384xf32> to vector<8x128xf32>
    %345 = vector.extract_strided_slice %327 {offsets = [0, 256], sizes = [8, 128], strides = [1, 1]} : vector<8x384xf32> to vector<8x128xf32>
    %346 = arith.mulf %335, %345 : vector<8x128xf32>
    %347 = arith.addf %344, %346 : vector<8x128xf32>
    %348 = math.tanh %347 : vector<8x128xf32>
    %cst_64 = arith.constant 1.000000e+00 : f32
    %349 = vector.broadcast %cst_64 : f32 to vector<8x128xf32>
    %350 = arith.subf %349, %343 : vector<8x128xf32>
    %351 = arith.mulf %350, %348 : vector<8x128xf32>
    %352 = arith.mulf %343, %323 : vector<8x128xf32>
    %353 = arith.addf %351, %352 : vector<8x128xf32>
    %354 = vector.extract_strided_slice %260 {offsets = [24, 0], sizes = [8, 384], strides = [1, 1]} : vector<64x384xf32> to vector<8x384xf32>
    %355 = arith.truncf %353 : vector<8x128xf32> to vector<8x128xbf16>
    %cst_65 = arith.constant dense<0.000000e+00> : vector<8x384xf32>
    %356 = tpu.matmul %355, %255, %cst_65 {dimension_numbers = #tpu.dot_dimension_numbers<[1], [0], [0], [1], [0, 0, 1, 1], [], []>} : vector<8x128xbf16>, vector<128x384xbf16>, vector<8x384xf32> -> vector<8x384xf32>
    %357 = arith.addf %356, %262 : vector<8x384xf32>
    %358 = vector.extract_strided_slice %354 {offsets = [0, 0], sizes = [8, 128], strides = [1, 1]} : vector<8x384xf32> to vector<8x128xf32>
    %359 = vector.extract_strided_slice %357 {offsets = [0, 0], sizes = [8, 128], strides = [1, 1]} : vector<8x384xf32> to vector<8x128xf32>
    %360 = arith.addf %358, %359 : vector<8x128xf32>
    %361 = arith.negf %360 : vector<8x128xf32>
    %362 = math.exp %361 : vector<8x128xf32>
    %cst_66 = arith.constant 1.000000e+00 : f32
    %363 = vector.broadcast %cst_66 : f32 to vector<8x128xf32>
    %364 = arith.addf %363, %362 : vector<8x128xf32>
    %365 = arith.divf %363, %364 : vector<8x128xf32>
    %366 = vector.extract_strided_slice %354 {offsets = [0, 128], sizes = [8, 128], strides = [1, 1]} : vector<8x384xf32> to vector<8x128xf32>
    %367 = vector.extract_strided_slice %357 {offsets = [0, 128], sizes = [8, 128], strides = [1, 1]} : vector<8x384xf32> to vector<8x128xf32>
    %368 = arith.addf %366, %367 : vector<8x128xf32>
    %369 = arith.negf %368 : vector<8x128xf32>
    %370 = math.exp %369 : vector<8x128xf32>
    %cst_67 = arith.constant 1.000000e+00 : f32
    %371 = vector.broadcast %cst_67 : f32 to vector<8x128xf32>
    %372 = arith.addf %371, %370 : vector<8x128xf32>
    %373 = arith.divf %371, %372 : vector<8x128xf32>
    %374 = vector.extract_strided_slice %354 {offsets = [0, 256], sizes = [8, 128], strides = [1, 1]} : vector<8x384xf32> to vector<8x128xf32>
    %375 = vector.extract_strided_slice %357 {offsets = [0, 256], sizes = [8, 128], strides = [1, 1]} : vector<8x384xf32> to vector<8x128xf32>
    %376 = arith.mulf %365, %375 : vector<8x128xf32>
    %377 = arith.addf %374, %376 : vector<8x128xf32>
    %378 = math.tanh %377 : vector<8x128xf32>
    %cst_68 = arith.constant 1.000000e+00 : f32
    %379 = vector.broadcast %cst_68 : f32 to vector<8x128xf32>
    %380 = arith.subf %379, %373 : vector<8x128xf32>
    %381 = arith.mulf %380, %378 : vector<8x128xf32>
    %382 = arith.mulf %373, %353 : vector<8x128xf32>
    %383 = arith.addf %381, %382 : vector<8x128xf32>
    %384 = vector.extract_strided_slice %260 {offsets = [32, 0], sizes = [8, 384], strides = [1, 1]} : vector<64x384xf32> to vector<8x384xf32>
    %385 = arith.truncf %383 : vector<8x128xf32> to vector<8x128xbf16>
    %cst_69 = arith.constant dense<0.000000e+00> : vector<8x384xf32>
    %386 = tpu.matmul %385, %255, %cst_69 {dimension_numbers = #tpu.dot_dimension_numbers<[1], [0], [0], [1], [0, 0, 1, 1], [], []>} : vector<8x128xbf16>, vector<128x384xbf16>, vector<8x384xf32> -> vector<8x384xf32>
    %387 = arith.addf %386, %262 : vector<8x384xf32>
    %388 = vector.extract_strided_slice %384 {offsets = [0, 0], sizes = [8, 128], strides = [1, 1]} : vector<8x384xf32> to vector<8x128xf32>
    %389 = vector.extract_strided_slice %387 {offsets = [0, 0], sizes = [8, 128], strides = [1, 1]} : vector<8x384xf32> to vector<8x128xf32>
    %390 = arith.addf %388, %389 : vector<8x128xf32>
    %391 = arith.negf %390 : vector<8x128xf32>
    %392 = math.exp %391 : vector<8x128xf32>
    %cst_70 = arith.constant 1.000000e+00 : f32
    %393 = vector.broadcast %cst_70 : f32 to vector<8x128xf32>
    %394 = arith.addf %393, %392 : vector<8x128xf32>
    %395 = arith.divf %393, %394 : vector<8x128xf32>
    %396 = vector.extract_strided_slice %384 {offsets = [0, 128], sizes = [8, 128], strides = [1, 1]} : vector<8x384xf32> to vector<8x128xf32>
    %397 = vector.extract_strided_slice %387 {offsets = [0, 128], sizes = [8, 128], strides = [1, 1]} : vector<8x384xf32> to vector<8x128xf32>
    %398 = arith.addf %396, %397 : vector<8x128xf32>
    %399 = arith.negf %398 : vector<8x128xf32>
    %400 = math.exp %399 : vector<8x128xf32>
    %cst_71 = arith.constant 1.000000e+00 : f32
    %401 = vector.broadcast %cst_71 : f32 to vector<8x128xf32>
    %402 = arith.addf %401, %400 : vector<8x128xf32>
    %403 = arith.divf %401, %402 : vector<8x128xf32>
    %404 = vector.extract_strided_slice %384 {offsets = [0, 256], sizes = [8, 128], strides = [1, 1]} : vector<8x384xf32> to vector<8x128xf32>
    %405 = vector.extract_strided_slice %387 {offsets = [0, 256], sizes = [8, 128], strides = [1, 1]} : vector<8x384xf32> to vector<8x128xf32>
    %406 = arith.mulf %395, %405 : vector<8x128xf32>
    %407 = arith.addf %404, %406 : vector<8x128xf32>
    %408 = math.tanh %407 : vector<8x128xf32>
    %cst_72 = arith.constant 1.000000e+00 : f32
    %409 = vector.broadcast %cst_72 : f32 to vector<8x128xf32>
    %410 = arith.subf %409, %403 : vector<8x128xf32>
    %411 = arith.mulf %410, %408 : vector<8x128xf32>
    %412 = arith.mulf %403, %383 : vector<8x128xf32>
    %413 = arith.addf %411, %412 : vector<8x128xf32>
    %414 = vector.extract_strided_slice %260 {offsets = [40, 0], sizes = [8, 384], strides = [1, 1]} : vector<64x384xf32> to vector<8x384xf32>
    %415 = arith.truncf %413 : vector<8x128xf32> to vector<8x128xbf16>
    %cst_73 = arith.constant dense<0.000000e+00> : vector<8x384xf32>
    %416 = tpu.matmul %415, %255, %cst_73 {dimension_numbers = #tpu.dot_dimension_numbers<[1], [0], [0], [1], [0, 0, 1, 1], [], []>} : vector<8x128xbf16>, vector<128x384xbf16>, vector<8x384xf32> -> vector<8x384xf32>
    %417 = arith.addf %416, %262 : vector<8x384xf32>
    %418 = vector.extract_strided_slice %414 {offsets = [0, 0], sizes = [8, 128], strides = [1, 1]} : vector<8x384xf32> to vector<8x128xf32>
    %419 = vector.extract_strided_slice %417 {offsets = [0, 0], sizes = [8, 128], strides = [1, 1]} : vector<8x384xf32> to vector<8x128xf32>
    %420 = arith.addf %418, %419 : vector<8x128xf32>
    %421 = arith.negf %420 : vector<8x128xf32>
    %422 = math.exp %421 : vector<8x128xf32>
    %cst_74 = arith.constant 1.000000e+00 : f32
    %423 = vector.broadcast %cst_74 : f32 to vector<8x128xf32>
    %424 = arith.addf %423, %422 : vector<8x128xf32>
    %425 = arith.divf %423, %424 : vector<8x128xf32>
    %426 = vector.extract_strided_slice %414 {offsets = [0, 128], sizes = [8, 128], strides = [1, 1]} : vector<8x384xf32> to vector<8x128xf32>
    %427 = vector.extract_strided_slice %417 {offsets = [0, 128], sizes = [8, 128], strides = [1, 1]} : vector<8x384xf32> to vector<8x128xf32>
    %428 = arith.addf %426, %427 : vector<8x128xf32>
    %429 = arith.negf %428 : vector<8x128xf32>
    %430 = math.exp %429 : vector<8x128xf32>
    %cst_75 = arith.constant 1.000000e+00 : f32
    %431 = vector.broadcast %cst_75 : f32 to vector<8x128xf32>
    %432 = arith.addf %431, %430 : vector<8x128xf32>
    %433 = arith.divf %431, %432 : vector<8x128xf32>
    %434 = vector.extract_strided_slice %414 {offsets = [0, 256], sizes = [8, 128], strides = [1, 1]} : vector<8x384xf32> to vector<8x128xf32>
    %435 = vector.extract_strided_slice %417 {offsets = [0, 256], sizes = [8, 128], strides = [1, 1]} : vector<8x384xf32> to vector<8x128xf32>
    %436 = arith.mulf %425, %435 : vector<8x128xf32>
    %437 = arith.addf %434, %436 : vector<8x128xf32>
    %438 = math.tanh %437 : vector<8x128xf32>
    %cst_76 = arith.constant 1.000000e+00 : f32
    %439 = vector.broadcast %cst_76 : f32 to vector<8x128xf32>
    %440 = arith.subf %439, %433 : vector<8x128xf32>
    %441 = arith.mulf %440, %438 : vector<8x128xf32>
    %442 = arith.mulf %433, %413 : vector<8x128xf32>
    %443 = arith.addf %441, %442 : vector<8x128xf32>
    %444 = vector.extract_strided_slice %260 {offsets = [48, 0], sizes = [8, 384], strides = [1, 1]} : vector<64x384xf32> to vector<8x384xf32>
    %445 = arith.truncf %443 : vector<8x128xf32> to vector<8x128xbf16>
    %cst_77 = arith.constant dense<0.000000e+00> : vector<8x384xf32>
    %446 = tpu.matmul %445, %255, %cst_77 {dimension_numbers = #tpu.dot_dimension_numbers<[1], [0], [0], [1], [0, 0, 1, 1], [], []>} : vector<8x128xbf16>, vector<128x384xbf16>, vector<8x384xf32> -> vector<8x384xf32>
    %447 = arith.addf %446, %262 : vector<8x384xf32>
    %448 = vector.extract_strided_slice %444 {offsets = [0, 0], sizes = [8, 128], strides = [1, 1]} : vector<8x384xf32> to vector<8x128xf32>
    %449 = vector.extract_strided_slice %447 {offsets = [0, 0], sizes = [8, 128], strides = [1, 1]} : vector<8x384xf32> to vector<8x128xf32>
    %450 = arith.addf %448, %449 : vector<8x128xf32>
    %451 = arith.negf %450 : vector<8x128xf32>
    %452 = math.exp %451 : vector<8x128xf32>
    %cst_78 = arith.constant 1.000000e+00 : f32
    %453 = vector.broadcast %cst_78 : f32 to vector<8x128xf32>
    %454 = arith.addf %453, %452 : vector<8x128xf32>
    %455 = arith.divf %453, %454 : vector<8x128xf32>
    %456 = vector.extract_strided_slice %444 {offsets = [0, 128], sizes = [8, 128], strides = [1, 1]} : vector<8x384xf32> to vector<8x128xf32>
    %457 = vector.extract_strided_slice %447 {offsets = [0, 128], sizes = [8, 128], strides = [1, 1]} : vector<8x384xf32> to vector<8x128xf32>
    %458 = arith.addf %456, %457 : vector<8x128xf32>
    %459 = arith.negf %458 : vector<8x128xf32>
    %460 = math.exp %459 : vector<8x128xf32>
    %cst_79 = arith.constant 1.000000e+00 : f32
    %461 = vector.broadcast %cst_79 : f32 to vector<8x128xf32>
    %462 = arith.addf %461, %460 : vector<8x128xf32>
    %463 = arith.divf %461, %462 : vector<8x128xf32>
    %464 = vector.extract_strided_slice %444 {offsets = [0, 256], sizes = [8, 128], strides = [1, 1]} : vector<8x384xf32> to vector<8x128xf32>
    %465 = vector.extract_strided_slice %447 {offsets = [0, 256], sizes = [8, 128], strides = [1, 1]} : vector<8x384xf32> to vector<8x128xf32>
    %466 = arith.mulf %455, %465 : vector<8x128xf32>
    %467 = arith.addf %464, %466 : vector<8x128xf32>
    %468 = math.tanh %467 : vector<8x128xf32>
    %cst_80 = arith.constant 1.000000e+00 : f32
    %469 = vector.broadcast %cst_80 : f32 to vector<8x128xf32>
    %470 = arith.subf %469, %463 : vector<8x128xf32>
    %471 = arith.mulf %470, %468 : vector<8x128xf32>
    %472 = arith.mulf %463, %443 : vector<8x128xf32>
    %473 = arith.addf %471, %472 : vector<8x128xf32>
    %474 = vector.extract_strided_slice %260 {offsets = [56, 0], sizes = [8, 384], strides = [1, 1]} : vector<64x384xf32> to vector<8x384xf32>
    %475 = arith.truncf %473 : vector<8x128xf32> to vector<8x128xbf16>
    %cst_81 = arith.constant dense<0.000000e+00> : vector<8x384xf32>
    %476 = tpu.matmul %475, %255, %cst_81 {dimension_numbers = #tpu.dot_dimension_numbers<[1], [0], [0], [1], [0, 0, 1, 1], [], []>} : vector<8x128xbf16>, vector<128x384xbf16>, vector<8x384xf32> -> vector<8x384xf32>
    %477 = arith.addf %476, %262 : vector<8x384xf32>
    %478 = vector.extract_strided_slice %474 {offsets = [0, 0], sizes = [8, 128], strides = [1, 1]} : vector<8x384xf32> to vector<8x128xf32>
    %479 = vector.extract_strided_slice %477 {offsets = [0, 0], sizes = [8, 128], strides = [1, 1]} : vector<8x384xf32> to vector<8x128xf32>
    %480 = arith.addf %478, %479 : vector<8x128xf32>
    %481 = arith.negf %480 : vector<8x128xf32>
    %482 = math.exp %481 : vector<8x128xf32>
    %cst_82 = arith.constant 1.000000e+00 : f32
    %483 = vector.broadcast %cst_82 : f32 to vector<8x128xf32>
    %484 = arith.addf %483, %482 : vector<8x128xf32>
    %485 = arith.divf %483, %484 : vector<8x128xf32>
    %486 = vector.extract_strided_slice %474 {offsets = [0, 128], sizes = [8, 128], strides = [1, 1]} : vector<8x384xf32> to vector<8x128xf32>
    %487 = vector.extract_strided_slice %477 {offsets = [0, 128], sizes = [8, 128], strides = [1, 1]} : vector<8x384xf32> to vector<8x128xf32>
    %488 = arith.addf %486, %487 : vector<8x128xf32>
    %489 = arith.negf %488 : vector<8x128xf32>
    %490 = math.exp %489 : vector<8x128xf32>
    %cst_83 = arith.constant 1.000000e+00 : f32
    %491 = vector.broadcast %cst_83 : f32 to vector<8x128xf32>
    %492 = arith.addf %491, %490 : vector<8x128xf32>
    %493 = arith.divf %491, %492 : vector<8x128xf32>
    %494 = vector.extract_strided_slice %474 {offsets = [0, 256], sizes = [8, 128], strides = [1, 1]} : vector<8x384xf32> to vector<8x128xf32>
    %495 = vector.extract_strided_slice %477 {offsets = [0, 256], sizes = [8, 128], strides = [1, 1]} : vector<8x384xf32> to vector<8x128xf32>
    %496 = arith.mulf %485, %495 : vector<8x128xf32>
    %497 = arith.addf %494, %496 : vector<8x128xf32>
    %498 = math.tanh %497 : vector<8x128xf32>
    %cst_84 = arith.constant 1.000000e+00 : f32
    %499 = vector.broadcast %cst_84 : f32 to vector<8x128xf32>
    %500 = arith.subf %499, %493 : vector<8x128xf32>
    %501 = arith.mulf %500, %498 : vector<8x128xf32>
    %502 = arith.mulf %493, %473 : vector<8x128xf32>
    %503 = arith.addf %501, %502 : vector<8x128xf32>
    %c0_85 = arith.constant 0 : index
    %c0_86 = arith.constant 0 : index
    %504 = vector.load %arg9[%c0_85, %c0_86] : memref<8x128xf32, #tpu.memory_space<vmem>>, vector<8x128xf32>
    tpu.vector_store %arg9[%c0_85, %c0_86], %503 {strides = array<i32>} : memref<8x128xf32, #tpu.memory_space<vmem>>, vector<8x128xf32>,
    return
  }
}

</mosaic_0001>

<bundles_post_ra>
// kernel: gru_model_forward.1
= control target key start
LH: loop header
LB: loop body
LE: loop exit
PB: predicated region body
PF: predicated region fallthrough
CT: control target
= control target key end

     0   :  { %v5188_v1 = vmov 0   ;;  %v5190_v38 = vmov 0.0   ;;  %vm3717_vm0 = vmmov 0   ;;  %v108_v54 = vlaneseq  ;;  %s5178_s1 = inlined_call_operand.vmem [shape: bf16[128,384], index: 1, kind: input, shape index: {}]   ;;  %s5179_s0 = inlined_call_operand.vmem [shape: bf16[8,8,128], index: 0, kind: input, shape index: {}]   ;;  %s5180_s2 = inlined_call_operand.vmem [shape: bf16[128,384], index: 2, kind: input, shape index: {}]   ;;  %s5181_s3 = inlined_call_operand.vmem [shape: f32[1,384], index: 3, kind: input, shape index: {}]   ;;  %s5182_s4 = inlined_call_operand.vmem [shape: f32[1,384], index: 4, kind: input, shape index: {}]   ;;  %s5183_s5 = inlined_call_operand.vmem [shape: bf16[128,384], index: 5, kind: input, shape index: {}]   ;;  %s5184_s6 = inlined_call_operand.vmem [shape: bf16[128,384], index: 6, kind: input, shape index: {}]   ;;  %s5185_s7 = inlined_call_operand.vmem [shape: f32[1,384], index: 7, kind: input, shape index: {}]   ;;  %s5186_s8 = inlined_call_operand.vmem [shape: f32[1,384], index: 8, kind: input, shape index: {}]   ;;  %s5187_s9 = inlined_call_operand.vmem [shape: f32[8,128], index: 9, kind: output, shape index: {}]  }
   0x1   :  { %v3375_v0 = vld [vmem:[%s5178_s1 + $0xac] ss:$12 sps:$4 sm:$0xff]   ;;  %307 = vmatprep.mubr.bf16.mxu0 %v5188_v1  ;;  %v3377_v2 = vld [vmem:[%s5178_s1 + $0xa8] ss:$12 sps:$4 sm:$0xff]   ;;  %v3380_v4 = vld [vmem:[%s5178_s1 + $0x90] ss:$12 sps:$4 sm:$0xff]  }
   0x2   :  { %275 = vmatprep.subr.bf16.mxu0 %v3375_v0  ;;  %v3378_v3 = vld [vmem:[%s5178_s1 + $0x94] ss:$12 sps:$4 sm:$0xff]   ;;  %v3381_v5 = vld [vmem:[%s5178_s1 + $0x7c] ss:$12 sps:$4 sm:$0xff]   ;;  %v3383_v6 = vld [vmem:[%s5178_s1 + $0x78] ss:$12 sps:$4 sm:$0xff]  }
   0x3   :  { %276 = vmatpush1.bf16.msra.mxu0 %v3377_v2  ;;  %v3384_v7 = vld [vmem:[%s5178_s1 + $0x64] ss:$12 sps:$4 sm:$0xff]   ;;  %v3386_v8 = vld [vmem:[%s5178_s1 + $0x60] ss:$12 sps:$4 sm:$0xff]   ;;  %v3389_v12 = vld [vmem:[%s5178_s1 + $0x48] ss:$12 sps:$4 sm:$0xff]  }
   0x4   :  { %277 = vmatprep.subr.bf16.mxu0 %v3378_v3  ;;  %v3387_v9 = vld [vmem:[%s5178_s1 + $0x4c] ss:$12 sps:$4 sm:$0xff]   ;;  %v3399_v10 = vld [vmem:[%s5178_s1 + $0xb0] ss:$12 sps:$4 sm:$0xff]   ;;  %v3400_v11 = vld [vmem:[%s5179_s0] sm:$0xff]   ;;  %v109_v55 = vshrl.u32 %v108_v54, 7 }
   0x5   :  { %3004 = vmatprep.subr.bf16.mxu1 %v3399_v10  ;;  %v3403_v13 = vld [vmem:[%s5178_s1 + $0x98] ss:$12 sps:$4 sm:$0xff]   ;;  %3020 = vmatprep.mubr.bf16.mxu1 %v3400_v11  ;;  %v3390_v14 = vld [vmem:[%s5178_s1 + $0x34] ss:$12 sps:$4 sm:$0xff]   ;;  %v3392_v16 = vld [vmem:[%s5178_s1 + $0x30] ss:$12 sps:$4 sm:$0xff]  }
   0x6   :  { %3005 = vmatpush3.bf16.msra.mxu1 %v3399_v10  ;;  %v3407_v15 = vld [vmem:[%s5178_s1 + $0x80] ss:$12 sps:$4 sm:$0xff]   ;;  %v3393_v17 = vld [vmem:[%s5178_s1 + $0x1c] ss:$12 sps:$4 sm:$0xff]   ;;  %v3395_v19 = vld [vmem:[%s5178_s1 + $0x18] ss:$12 sps:$4 sm:$0xff]  }
   0x7   :  { %278 = vmatpush1.bf16.msra.mxu0 %v3380_v4  ;;  %3006 = vmatprep.subr.bf16.mxu1 %v3403_v13  ;;  %v3412_v18 = vld [vmem:[%s5178_s1 + $0x68] ss:$12 sps:$4 sm:$0xff]   ;;  %v3416_v20 = vld [vmem:[%s5178_s1 + $0x50] ss:$12 sps:$4 sm:$0xff]   ;;  %v3398_v22 = vld [vmem:[%s5178_s1] ss:$12 sps:$4 sm:$0xff]  }
   0x8   :  { %279 = vmatprep.subr.bf16.mxu0 %v3381_v5  ;;  %v3396_v21 = vld [vmem:[%s5178_s1 + $0x4] ss:$12 sps:$4 sm:$0xff]   ;;  %v3841_v24 = vld [vmem:[%s5180_s2 + $0xac] ss:$12 sps:$4 sm:$0xff]   ;;  %v3846_v25 = vld [vmem:[%s5180_s2 + $0xa8] ss:$12 sps:$4 sm:$0xff]  }
   0x9   :  { %v3421_v23 = vld [vmem:[%s5178_s1 + $0x38] ss:$12 sps:$4 sm:$0xff]   ;;  %v3851_v26 = vld [vmem:[%s5180_s2 + $0x94] ss:$12 sps:$4 sm:$0xff]   ;;  %v3860_v28 = vld [vmem:[%s5180_s2 + $0x90] ss:$12 sps:$4 sm:$0xff]  }
   0xa   :  { %3007 = vmatpush3.bf16.msra.mxu1 %v3403_v13  ;;  %v3425_v27 = vld [vmem:[%s5178_s1 + $0x20] ss:$12 sps:$4 sm:$0xff]   ;;  %v3430_v29 = vld [vmem:[%s5178_s1 + $0x8] ss:$12 sps:$4 sm:$0xff]   ;;  %v3880_v32 = vld [vmem:[%s5180_s2 + $0x78] ss:$12 sps:$4 sm:$0xff]  }
   0xb   :  { %280 = vmatpush1.bf16.msra.mxu0 %v3383_v6  ;;  %3008 = vmatprep.subr.bf16.mxu1 %v3407_v15  ;;  %v3871_v30 = vld [vmem:[%s5180_s2 + $0x7c] ss:$12 sps:$4 sm:$0xff]   ;;  %v3886_v33 = vld [vmem:[%s5180_s2 + $0x64] ss:$12 sps:$4 sm:$0xff]   ;;  %v3897_v35 = vld [vmem:[%s5180_s2 + $0x60] ss:$12 sps:$4 sm:$0xff]  }
   0xc   :  { %281 = vmatprep.subr.bf16.mxu0 %v3384_v7  ;;  %v3409_v31 = vld [vmem:[%s5179_s0 + $0x8] sm:$0xff]   ;;  %v3891_v34 = vld [vmem:[%s5180_s2 + $0xb0] ss:$12 sps:$4 sm:$0xff]   ;;  %v3914_v39 = vld [vmem:[%s5180_s2 + $0x98] ss:$12 sps:$4 sm:$0xff]   ;;  %v4050_v56 = vsub.s32 0, %v109_v55 }
   0xd   :  { %v3418_v36 = vld [vmem:[%s5179_s0 + $0x10] sm:$0xff]   ;;  %v3907_v37 = vld [vmem:[%s5180_s2 + $0x4c] ss:$12 sps:$4 sm:$0xff]   ;;  %v3949_v45 = vld [vmem:[%s5180_s2 + $0x1c] ss:$12 sps:$4 sm:$0xff]   ;;  %v4055_v59 = vsub.s32 1, %v109_v55 }
   0xe   :  { %3009 = vmatpush3.bf16.msra.mxu1 %v3407_v15  ;;  %v3920_v40 = vld [vmem:[%s5180_s2 + $0x48] ss:$12 sps:$4 sm:$0xff]   ;;  %v3933_v42 = vld [vmem:[%s5180_s2 + $0x80] ss:$12 sps:$4 sm:$0xff]   ;;  %v3939_v43 = vld [vmem:[%s5180_s2 + $0x30] ss:$12 sps:$4 sm:$0xff]  }
   0xf   :  { %282 = vmatpush1.bf16.msra.mxu0 %v3386_v8  ;;  %3010 = vmatprep.subr.bf16.mxu1 %v3412_v18  ;;  %v3927_v41 = vld [vmem:[%s5180_s2 + $0x34] ss:$12 sps:$4 sm:$0xff]   ;;  %v3427_v44 = vld [vmem:[%s5179_s0 + $0x18] sm:$0xff]   ;;  %v3971_v48 = vld [vmem:[%s5180_s2 + $0x4] ss:$12 sps:$4 sm:$0xff]   ;;  %5196 = vst [vmem:[#allocation2_spill] sm:$0xff] %v4050_v56 }
  0x10   :  { %283 = vmatprep.subr.bf16.mxu0 %v3387_v9  ;;  %v3956_v46 = vld [vmem:[%s5180_s2 + $0x68] ss:$12 sps:$4 sm:$0xff]   ;;  %v3964_v47 = vld [vmem:[%s5180_s2 + $0x18] ss:$12 sps:$4 sm:$0xff]   ;;  %v3977_v49 = vld [vmem:[%s5180_s2 + $0x50] ss:$12 sps:$4 sm:$0xff]  }
  0x11   :  { %v3983_v50 = vld [vmem:[%s5180_s2] ss:$12 sps:$4 sm:$0xff]   ;;  %v3992_v51 = vld [vmem:[%s5180_s2 + $0x38] ss:$12 sps:$4 sm:$0xff]   ;;  %v4012_v53 = vld [vmem:[%s5180_s2 + $0x8] ss:$12 sps:$4 sm:$0xff]  }
  0x12   :  { %3011 = vmatpush3.bf16.msra.mxu1 %v3412_v18  ;;  %v4002_v52 = vld [vmem:[%s5180_s2 + $0x20] ss:$12 sps:$4 sm:$0xff]   ;;  %5197 = vst [vmem:[#allocation3_spill] sm:$0xff] %v4055_v59  ;;  %v4058_v63 = vsub.s32 2, %v109_v55 }
  0x13   :  { %284 = vmatpush1.bf16.msra.mxu0 %v3389_v12  ;;  %3012 = vmatprep.subr.bf16.mxu1 %v3416_v20  ;;  %v105_v57 = vld [vmem:[%s5181_s3] sm:$0x7] }
  0x14   :  { %285 = vmatprep.subr.bf16.mxu0 %v3390_v14  ;;  %v111_v61 = vrot.slane %v105_v57, %v4050_v56  ;;  %v115_v0 = vrot.slane %v105_v57, %v4055_v59  ;;  %v4066_v6 = vrot.slane %v105_v57, %v4058_v63 }
  0x16   :  { %3013 = vmatpush3.bf16.msra.mxu1 %v3416_v20 }
  0x17   :  { %286 = vmatpush1.bf16.msra.mxu0 %v3392_v16  ;;  %3014 = vmatprep.subr.bf16.mxu1 %v3421_v23 }
  0x18   :  { %287 = vmatprep.subr.bf16.mxu0 %v3393_v17 }
  0x1a   :  { %3015 = vmatpush3.bf16.msra.mxu1 %v3421_v23 }
  0x1b   :  { %288 = vmatpush1.bf16.msra.mxu0 %v3395_v19  ;;  %3016 = vmatprep.subr.bf16.mxu1 %v3425_v27 }
  0x1c   :  { %289 = vmatprep.subr.bf16.mxu0 %v3396_v21 }
  0x1e   :  { %3017 = vmatpush3.bf16.msra.mxu1 %v3425_v27 }
  0x1f   :  { %290 = vmatpush1.bf16.msra.mxu0 %v3398_v22  ;;  %3018 = vmatprep.subr.bf16.mxu1 %v3430_v29 }
  0x20   :  { %557 = vmatprep.subr.bf16.mxu0 %v3841_v24 }
  0x22   :  { %308 = vmatmul.mubr.bf16.vlgmr.msra.gmra.mxu0 %v3400_v11  ;;  %3019 = vmatpush3.bf16.msra.mxu1 %v3430_v29 }
  0x23   :  { %558 = vmatpush1.bf16.msra.mxu0 %v3846_v25  ;;  %317 = vmatprep.mubr.bf16.mxu0 %v5188_v1 }
  0x24   :  { %559 = vmatprep.subr.bf16.mxu0 %v3851_v26  ;;  %3028 = vmatprep.subr.bf16.mxu1 %v5190_v38 }
  0x25   :  { %3021 = vmatmul.mubr.bf16.vlgmr.msra.gmra.mxu1 %v3409_v31 }
  0x26   :  { %3029 = vmatpush3.bf16.msra.mxu1 %v3891_v34  ;;  %3024 = vmatprep.mubr.bf16.mxu1 %v3418_v36 }
  0x27   :  { %560 = vmatpush1.bf16.msra.mxu0 %v3860_v28  ;;  %3030 = vmatprep.subr.bf16.mxu1 %v5190_v38 }
  0x28   :  { %561 = vmatprep.subr.bf16.mxu0 %v3871_v30 }
  0x2a   :  { %318 = vmatmul.mubr.bf16.gmra.mxu0 %v3409_v31  ;;  %3031 = vmatpush3.bf16.msra.mxu1 %v3914_v39 }
  0x2b   :  { %562 = vmatpush1.bf16.msra.mxu0 %v3880_v32  ;;  %327 = vmatprep.mubr.bf16.mxu0 %v5188_v1 }
  0x2c   :  { %563 = vmatprep.subr.bf16.mxu0 %v3886_v33  ;;  %3032 = vmatprep.subr.bf16.mxu1 %v5190_v38 }
  0x2d   :  { %3025 = vmatmul.mubr.bf16.gmra.mxu1 %v3427_v44 }
  0x2e   :  { %3033 = vmatpush3.bf16.msra.mxu1 %v3933_v42  ;;  %3044 = vmatprep.mubr.msk.bf16.mxu1 %vm3717_vm0, %v5190_v38 }
  0x2f   :  { %564 = vmatpush1.bf16.msra.mxu0 %v3897_v35  ;;  %3034 = vmatprep.subr.bf16.mxu1 %v5190_v38 }
  0x30   :  { %565 = vmatprep.subr.bf16.mxu0 %v3907_v37 }
  0x32   :  { %328 = vmatmul.mubr.bf16.gmra.mxu0 %v3418_v36  ;;  %3035 = vmatpush3.bf16.msra.mxu1 %v3956_v46 }
  0x33   :  { %566 = vmatpush1.bf16.msra.mxu0 %v3920_v40  ;;  %337 = vmatprep.mubr.bf16.mxu0 %v5188_v1 }
  0x34   :  { %567 = vmatprep.subr.bf16.mxu0 %v3927_v41  ;;  %3036 = vmatprep.subr.bf16.mxu1 %v5190_v38 }
  0x36   :  { %3037 = vmatpush3.bf16.msra.mxu1 %v3977_v49 }
  0x37   :  { %568 = vmatpush1.bf16.msra.mxu0 %v3939_v43  ;;  %3038 = vmatprep.subr.bf16.mxu1 %v5190_v38 }
  0x38   :  { %569 = vmatprep.subr.bf16.mxu0 %v3949_v45 }
  0x3a   :  { %338 = vmatmul.mubr.bf16.gmra.mxu0 %v3427_v44  ;;  %3039 = vmatpush3.bf16.msra.mxu1 %v3992_v51 }
  0x3b   :  { %570 = vmatpush1.bf16.msra.mxu0 %v3964_v47  ;;  %589 = vmatprep.mubr.bf16.mxu0 %v5188_v1 }
  0x3c   :  { %571 = vmatprep.subr.bf16.mxu0 %v3971_v48  ;;  %3040 = vmatprep.subr.bf16.mxu1 %v5190_v38 }
  0x3e   :  { %3041 = vmatpush3.bf16.msra.mxu1 %v4002_v52 }
  0x3f   :  { %572 = vmatpush1.bf16.msra.mxu0 %v3983_v50  ;;  %3042 = vmatprep.subr.bf16.mxu1 %v5190_v38 }
  0x40   :  { %660 = vmatprep.subr.bf16.mxu0 %v3841_v24 }
  0x42   :  { %590 = vmatmul.mubr.bf16.vlgmr.msra.gmra.mxu0 %v5188_v1  ;;  %3043 = vmatpush3.bf16.msra.mxu1 %v4012_v53 }
  0x43   :  { %661 = vmatpush1.bf16.msra.mxu0 %v3846_v25  ;;  %692 = vmatprep.mubr.bf16.mxu0 %v5188_v1 }
  0x44   :  { %662 = vmatprep.subr.bf16.mxu0 %v3851_v26  ;;  %3048 = vmatprep.subr.bf16.mxu1 %v5190_v38 }
  0x45   :  { %3045 = vmatmul.mubr.bf16.vlgmr.msra.gmra.mxu1 %v5188_v1 }
  0x46   :  { %3049 = vmatpush3.bf16.msra.mxu1 %v3891_v34  ;;  %3064 = vmatprep.mubr.msk.bf16.mxu1 %vm3717_vm0, %v5190_v38 }
  0x47   :  { %663 = vmatpush1.bf16.msra.mxu0 %v3860_v28  ;;  %3050 = vmatprep.subr.bf16.mxu1 %v5190_v38 }
  0x48   :  { %664 = vmatprep.subr.bf16.mxu0 %v3871_v30 }
  0x4a   :  { %3051 = vmatpush3.bf16.msra.mxu1 %v3914_v39 }
  0x4b   :  { %665 = vmatpush1.bf16.msra.mxu0 %v3880_v32  ;;  %3052 = vmatprep.subr.bf16.mxu1 %v5190_v38 }
  0x4c   :  { %666 = vmatprep.subr.bf16.mxu0 %v3886_v33 }
  0x4e   :  { %3053 = vmatpush3.bf16.msra.mxu1 %v3933_v42 }
  0x4f   :  { %667 = vmatpush1.bf16.msra.mxu0 %v3897_v35  ;;  %3054 = vmatprep.subr.bf16.mxu1 %v5190_v38 }
  0x50   :  { %668 = vmatprep.subr.bf16.mxu0 %v3907_v37 }
  0x52   :  { %3055 = vmatpush3.bf16.msra.mxu1 %v3956_v46 }
  0x53   :  { %669 = vmatpush1.bf16.msra.mxu0 %v3920_v40  ;;  %3056 = vmatprep.subr.bf16.mxu1 %v5190_v38 }
  0x54   :  { %670 = vmatprep.subr.bf16.mxu0 %v3927_v41 }
  0x56   :  { %3057 = vmatpush3.bf16.msra.mxu1 %v3977_v49 }
  0x57   :  { %671 = vmatpush1.bf16.msra.mxu0 %v3939_v43  ;;  %3058 = vmatprep.subr.bf16.mxu1 %v5190_v38 }
  0x58   :  { %672 = vmatprep.subr.bf16.mxu0 %v3949_v45 }
  0x5a   :  { %3059 = vmatpush3.bf16.msra.mxu1 %v3992_v51 }
  0x5b   :  { %673 = vmatpush1.bf16.msra.mxu0 %v3964_v47  ;;  %3060 = vmatprep.subr.bf16.mxu1 %v5190_v38 }
  0x5c   :  { %674 = vmatprep.subr.bf16.mxu0 %v3971_v48 }
  0x5e   :  { %3061 = vmatpush3.bf16.msra.mxu1 %v4002_v52 }
  0x5f   :  { %675 = vmatpush1.bf16.msra.mxu0 %v3983_v50  ;;  %3062 = vmatprep.subr.bf16.mxu1 %v5190_v38 }
  0x60   :  { %763 = vmatprep.subr.bf16.mxu0 %v3841_v24 }
  0x62   :  { %3063 = vmatpush3.bf16.msra.mxu1 %v4012_v53 }
  0x63   :  { %3068 = vmatprep.subr.bf16.mxu1 %v5190_v38 }
  0xe2   :  { %v309_v58 = vpop.f32.mrf.mxu0 }
  0xe4   :  { %v311_v60 = vpop.f32.mrf.mxu0 }
  0xe5   :  { %v3022_v10 = vpop.f32.mrf.mxu1 }
  0xe6   :  { %v313_v62 = vpop.f32.mrf.mxu0  ;;  %v4073_v12 = vadd.f32 %v3022_v10, %v4066_v6 }
  0xe7   :  { %v4061_v2 = vadd.f32 %v313_v62, %v111_v61  ;;  %v382_v14 = vpop.f32.mrf.mxu1 }
  0xe8   :  { %v315_v3 = vpop.f32.mrf.mxu0 }
  0xe9   :  { %v4063_v4 = vadd.f32 %v315_v3, %v115_v0  ;;  %v3023_v17 = vpop.f32.mrf.mxu1 }
  0xea   :  { %v319_v5 = vpop.f32.mrf.mxu0  ;;  %v4080_v19 = vadd.f32 %v3023_v17, %v4066_v6  ;;  %v106_v17 = vld [vmem:[%s5182_s4] sm:$0x7] }
  0xeb   :  { %v4068_v7 = vadd.f32 %v319_v5, %v111_v61  ;;  %v385_v21 = vpop.f32.mrf.mxu1  ;;  %v4121_v38 = vrot.slane %v106_v17, %v4055_v59  ;;  %v4125_v59 = vrot.slane %v106_v17, %v4058_v63 }
  0xec   :  { %v321_v8 = vpop.f32.mrf.mxu0  ;;  %v4085_v23 = vadd.f32 %v385_v21, %v4066_v6 }
  0xed   :  { %v4070_v9 = vadd.f32 %v321_v8, %v115_v0  ;;  %v3026_v29 = vpop.f32.mrf.mxu1 }
  0xee   :  { %v323_v11 = vpop.f32.mrf.mxu0  ;;  %v4090_v36 = vadd.f32 %v3026_v29, %v4066_v6 }
  0xef   :  { %v4075_v13 = vadd.f32 %v323_v11, %v111_v61  ;;  %v398_v54 = vpop.f32.mrf.mxu1 }
  0xf0   :  { %v325_v15 = vpop.f32.mrf.mxu0  ;;  %5198 = vst [vmem:[#allocation4_spill] sm:$0xff] %v4090_v36  ;;  %v4095_v57 = vadd.f32 %v398_v54, %v4066_v6 }
  0xf1   :  { %v4077_v16 = vadd.f32 %v325_v15, %v115_v0  ;;  %v3027_v3 = vpop.f32.mrf.mxu1 }
  0xf2   :  { %v329_v18 = vpop.f32.mrf.mxu0  ;;  %v4100_v8 = vadd.f32 %v3027_v3, %v4066_v6 }
  0xf3   :  { %v4082_v20 = vadd.f32 %v329_v18, %v111_v61  ;;  %v401_v11 = vpop.f32.mrf.mxu1 }
  0xf4   :  { %v331_v22 = vpop.f32.mrf.mxu0  ;;  %5199 = vst [vmem:[#allocation5_spill] sm:$0xff] %v4100_v8  ;;  %v4108_v18 = vadd.f32 %v401_v11, %v4066_v6 }
  0xf5   :  { %v4087_v27 = vadd.f32 %v331_v22, %v115_v0 }
  0xf6   :  { %v333_v31 = vpop.f32.mrf.mxu0  ;;  %5201 = vst [vmem:[#allocation7_spill] sm:$0xff] %v4108_v18 }
  0xf7   :  { %v4092_v44 = vadd.f32 %v333_v31, %v111_v61  ;;  %v4115_v31 = vrot.slane %v106_v17, %v4050_v56 }
  0xf8   :  { %v335_v55 = vpop.f32.mrf.mxu0 }
  0xf9   :  { %v4097_v62 = vadd.f32 %v335_v55, %v115_v0 }
  0xfa   :  { %v339_v5 = vpop.f32.mrf.mxu0 }
  0xfb   :  { %v4102_v10 = vadd.f32 %v339_v5, %v111_v61  ;;  %v310_v5 = vadd.f32 %v309_v58, %v111_v61 }
  0xfc   :  { %v341_v15 = vpop.f32.mrf.mxu0 }
  0xfd   :  { %5200 = vst [vmem:[#allocation6_spill] sm:$0xff] %v4102_v10  ;;  %v4110_v21 = vadd.f32 %v341_v15, %v115_v0 }
  0xfe   :  { %v343_v22 = vpop.f32.mrf.mxu0 }
  0xff   :  { %5202 = vst [vmem:[#allocation8_spill] sm:$0xff] %v4110_v21  ;;  %v4112_v29 = vadd.f32 %v343_v22, %v111_v61  ;;  %v312_v21 = vadd.f32 %v311_v60, %v115_v0  ;;  %v383_v60 = vadd.f32 %v382_v14, %v4066_v6  ;;  %v5205_v6 = vmov 0.0  }
 0x100   :  { %v345_v54 = vpop.f32.mrf.mxu0  ;;  %v5206_v14 = vmov 0  }
 0x101   :  { %5203 = vst [vmem:[#allocation9_spill] sm:$0xff] %v4112_v29  ;;  %v4117_v55 = vadd.f32 %v345_v54, %v115_v0 }
 0x102   :  { %v591_v3 = vpop.f32.mrf.mxu0 }
 0x103   :  { %5204 = vst [vmem:[#allocation10_spill] sm:$0xff] %v4117_v55  ;;  %v592_v1 = vadd.f32 %v591_v3, %v4115_v31 }
 0x104   :  { %v593_v11 = vpop.f32.mrf.mxu0 }
 0x105   :  { %v638_v8 = vadd.f32 %v592_v1, %v310_v5  ;;  %v594_v22 = vadd.f32 %v593_v11, %v4121_v38  ;;  %v632_v10 = vpop.f32.mrf.mxu1 }
 0x106   :  { %v595_v15 = vpop.f32.mrf.mxu0  ;;  %v633_v5 = vadd.f32 %v632_v10, %v4125_v59 }
 0x107   :  { %v2756_v36 = vmul.f32 -1.442695, %v638_v8  ;;  %v645_v56 = vadd.f32 %v594_v22, %v312_v21  ;;  %v3046_v55 = vpop.f32.mrf.mxu1 }
 0x108   :  { %v596_v29 = vpop.f32.mrf.mxu0 }
 0x109   :  { %3507 = vpow2.f32 %v2756_v36  ;;  %v2757_v54 = vmul.f32 -1.442695, %v645_v56  ;;  %v635_v18 = vpop.f32.mrf.mxu1 }
 0x10b   :  { %3509 = vpow2.f32 %v2757_v54  ;;  %v3047_v58 = vpop.f32.mrf.mxu1 }
 0x116   :  { %v3508_v61 = vpop.eup %3507 }
 0x117   :  { %v642_v3 = vadd.f32 1.0, %v3508_v61 }
 0x118   :  { %v3510_v1 = vpop.eup %3509 }
 0x119   :  { %3511 = vrcp.f32 %v642_v3  ;;  %v649_v8 = vadd.f32 1.0, %v3510_v1 }
 0x11b   :  { %3513 = vrcp.f32 %v649_v8 }
 0x126   :  { %v3512_v29 = vpop.eup %3511 }
 0x127   :  { %v652_v0 = vmul.f32 %v3512_v29, %v633_v5 }
 0x128   :  { %v3514_v36 = vpop.eup %3513 }
 0x129   :  { %v653_v56 = vadd.f32 %v652_v0, %v383_v60  ;;  %v655_v18 = vsub.f32 1.0, %v3514_v36  ;;  %v657_v11 = vmul.f32 0.0, %v3514_v36 }
 0x12b   :  { %3515 = vtanh.f32 %v653_v56 }
 0x138   :  { %v3516_v21 = vpop.eup %3515 }
 0x139   :  { %v656_v55 = vmul.f32 %v3516_v21, %v655_v18 }
 0x13b   :  { %v4129_v15 = vadd.f32 %v657_v11, %v656_v55 }
 0x13d   :  { %v659_v17 = vpack.c.bf16 %v4129_v15, %v4129_v15 }
 0x13f   :  { %693 = vmatmul.mubr.bf16.vlgmr.msra.gmra.mxu0 %v659_v17  ;;  %3065 = vmatmul.mubr.bf16.vlgmr.msra.gmra.mxu1 %v659_v17 }
 0x140   :  { %764 = vmatpush1.bf16.msra.mxu0 %v3846_v25  ;;  %3069 = vmatpush3.bf16.msra.mxu1 %v3891_v34 }
 0x141   :  { %765 = vmatprep.subr.bf16.mxu0 %v3851_v26  ;;  %3070 = vmatprep.subr.bf16.mxu1 %v5205_v6 }
 0x142   :  { %795 = vmatprep.mubr.bf16.mxu0 %v5206_v14  ;;  %3084 = vmatprep.mubr.msk.bf16.mxu1 %vm3717_vm0, %v5205_v6 }
 0x144   :  { %766 = vmatpush1.bf16.msra.mxu0 %v3860_v28  ;;  %3071 = vmatpush3.bf16.msra.mxu1 %v3914_v39 }
 0x145   :  { %767 = vmatprep.subr.bf16.mxu0 %v3871_v30  ;;  %3072 = vmatprep.subr.bf16.mxu1 %v5205_v6 }
 0x148   :  { %768 = vmatpush1.bf16.msra.mxu0 %v3880_v32  ;;  %3073 = vmatpush3.bf16.msra.mxu1 %v3933_v42 }
 0x149   :  { %769 = vmatprep.subr.bf16.mxu0 %v3886_v33  ;;  %3074 = vmatprep.subr.bf16.mxu1 %v5205_v6 }
 0x14c   :  { %770 = vmatpush1.bf16.msra.mxu0 %v3897_v35  ;;  %3075 = vmatpush3.bf16.msra.mxu1 %v3956_v46 }
 0x14d   :  { %771 = vmatprep.subr.bf16.mxu0 %v3907_v37  ;;  %3076 = vmatprep.subr.bf16.mxu1 %v5205_v6 }
 0x150   :  { %772 = vmatpush1.bf16.msra.mxu0 %v3920_v40  ;;  %3077 = vmatpush3.bf16.msra.mxu1 %v3977_v49 }
 0x151   :  { %773 = vmatprep.subr.bf16.mxu0 %v3927_v41  ;;  %3078 = vmatprep.subr.bf16.mxu1 %v5205_v6 }
 0x154   :  { %774 = vmatpush1.bf16.msra.mxu0 %v3939_v43  ;;  %3079 = vmatpush3.bf16.msra.mxu1 %v3992_v51 }
 0x155   :  { %775 = vmatprep.subr.bf16.mxu0 %v3949_v45  ;;  %3080 = vmatprep.subr.bf16.mxu1 %v5205_v6 }
 0x158   :  { %776 = vmatpush1.bf16.msra.mxu0 %v3964_v47  ;;  %3081 = vmatpush3.bf16.msra.mxu1 %v4002_v52 }
 0x159   :  { %777 = vmatprep.subr.bf16.mxu0 %v3971_v48  ;;  %3082 = vmatprep.subr.bf16.mxu1 %v5205_v6 }
 0x15c   :  { %778 = vmatpush1.bf16.msra.mxu0 %v3983_v50  ;;  %3083 = vmatpush3.bf16.msra.mxu1 %v4012_v53 }
 0x15d   :  { %866 = vmatprep.subr.bf16.mxu0 %v3841_v24  ;;  %3088 = vmatprep.subr.bf16.mxu1 %v5205_v6 }
 0x1ff   :  { %v694_v10 = vpop.f32.mrf.mxu0  ;;  %v735_v22 = vpop.f32.mrf.mxu1 }
 0x200   :  { %v695_v54 = vadd.f32 %v694_v10, %v4115_v31  ;;  %v736_v17 = vadd.f32 %v735_v22, %v4125_v59 }
 0x201   :  { %v696_v58 = vpop.f32.mrf.mxu0  ;;  %v3066_v61 = vpop.f32.mrf.mxu1 }
 0x202   :  { %v741_v3 = vadd.f32 %v695_v54, %v4061_v2  ;;  %v697_v29 = vadd.f32 %v696_v58, %v4121_v38 }
 0x203   :  { %v698_v1 = vpop.f32.mrf.mxu0  ;;  %v738_v8 = vpop.f32.mrf.mxu1 }
 0x204   :  { %v2758_v5 = vmul.f32 -1.442695, %v741_v3  ;;  %v748_v56 = vadd.f32 %v697_v29, %v4063_v4 }
 0x205   :  { %v699_v60 = vpop.f32.mrf.mxu0  ;;  %v3067_v0 = vpop.f32.mrf.mxu1 }
 0x206   :  { %3517 = vpow2.f32 %v2758_v5  ;;  %v2759_v36 = vmul.f32 -1.442695, %v748_v56 }
 0x208   :  { %3519 = vpow2.f32 %v2759_v36 }
 0x213   :  { %v3518_v18 = vpop.eup %3517 }
 0x214   :  { %v745_v21 = vadd.f32 1.0, %v3518_v18 }
 0x215   :  { %v3520_v55 = vpop.eup %3519 }
 0x216   :  { %3521 = vrcp.f32 %v745_v21  ;;  %v752_v11 = vadd.f32 1.0, %v3520_v55 }
 0x218   :  { %3523 = vrcp.f32 %v752_v11 }
 0x223   :  { %v3522_v2 = vpop.eup %3521 }
 0x224   :  { %v755_v10 = vmul.f32 %v3522_v2, %v736_v17 }
 0x225   :  { %v3524_v58 = vpop.eup %3523 }
 0x226   :  { %v756_v54 = vadd.f32 %v755_v10, %v4085_v23  ;;  %v758_v61 = vsub.f32 1.0, %v3524_v58  ;;  %v760_v4 = vmul.f32 %v3524_v58, %v4129_v15 }
 0x228   :  { %3525 = vtanh.f32 %v756_v54 }
 0x235   :  { %v3526_v3 = vpop.eup %3525 }
 0x236   :  { %v759_v1 = vmul.f32 %v3526_v3, %v758_v61 }
 0x238   :  { %v4175_v8 = vadd.f32 %v760_v4, %v759_v1 }
 0x23a   :  { %v762_v5 = vpack.c.bf16 %v4175_v8, %v4175_v8 }
 0x23c   :  { %796 = vmatmul.mubr.bf16.vlgmr.msra.gmra.mxu0 %v762_v5  ;;  %3085 = vmatmul.mubr.bf16.vlgmr.msra.gmra.mxu1 %v762_v5 }
 0x23d   :  { %867 = vmatpush1.bf16.msra.mxu0 %v3846_v25  ;;  %3089 = vmatpush3.bf16.msra.mxu1 %v3891_v34 }
 0x23e   :  { %868 = vmatprep.subr.bf16.mxu0 %v3851_v26  ;;  %3090 = vmatprep.subr.bf16.mxu1 %v5205_v6 }
 0x23f   :  { %898 = vmatprep.mubr.bf16.mxu0 %v5206_v14  ;;  %3104 = vmatprep.mubr.msk.bf16.mxu1 %vm3717_vm0, %v5205_v6 }
 0x241   :  { %869 = vmatpush1.bf16.msra.mxu0 %v3860_v28  ;;  %3091 = vmatpush3.bf16.msra.mxu1 %v3914_v39 }
 0x242   :  { %870 = vmatprep.subr.bf16.mxu0 %v3871_v30  ;;  %3092 = vmatprep.subr.bf16.mxu1 %v5205_v6 }
 0x245   :  { %871 = vmatpush1.bf16.msra.mxu0 %v3880_v32  ;;  %3093 = vmatpush3.bf16.msra.mxu1 %v3933_v42 }
 0x246   :  { %872 = vmatprep.subr.bf16.mxu0 %v3886_v33  ;;  %3094 = vmatprep.subr.bf16.mxu1 %v5205_v6 }
 0x249   :  { %873 = vmatpush1.bf16.msra.mxu0 %v3897_v35  ;;  %3095 = vmatpush3.bf16.msra.mxu1 %v3956_v46 }
 0x24a   :  { %874 = vmatprep.subr.bf16.mxu0 %v3907_v37  ;;  %3096 = vmatprep.subr.bf16.mxu1 %v5205_v6 }
 0x24d   :  { %875 = vmatpush1.bf16.msra.mxu0 %v3920_v40  ;;  %3097 = vmatpush3.bf16.msra.mxu1 %v3977_v49 }
 0x24e   :  { %876 = vmatprep.subr.bf16.mxu0 %v3927_v41  ;;  %3098 = vmatprep.subr.bf16.mxu1 %v5205_v6 }
 0x251   :  { %877 = vmatpush1.bf16.msra.mxu0 %v3939_v43  ;;  %3099 = vmatpush3.bf16.msra.mxu1 %v3992_v51 }
 0x252   :  { %878 = vmatprep.subr.bf16.mxu0 %v3949_v45  ;;  %3100 = vmatprep.subr.bf16.mxu1 %v5205_v6 }
 0x255   :  { %879 = vmatpush1.bf16.msra.mxu0 %v3964_v47  ;;  %3101 = vmatpush3.bf16.msra.mxu1 %v4002_v52 }
 0x256   :  { %880 = vmatprep.subr.bf16.mxu0 %v3971_v48  ;;  %3102 = vmatprep.subr.bf16.mxu1 %v5205_v6 }
 0x259   :  { %881 = vmatpush1.bf16.msra.mxu0 %v3983_v50  ;;  %3103 = vmatpush3.bf16.msra.mxu1 %v4012_v53 }
 0x25a   :  { %969 = vmatprep.subr.bf16.mxu0 %v3841_v24  ;;  %3108 = vmatprep.subr.bf16.mxu1 %v5205_v6 }
 0x2fc   :  { %v797_v23 = vpop.f32.mrf.mxu0  ;;  %v838_v22 = vpop.f32.mrf.mxu1 }
 0x2fd   :  { %v798_v29 = vadd.f32 %v797_v23, %v4115_v31  ;;  %v839_v1 = vadd.f32 %v838_v22, %v4125_v59 }
 0x2fe   :  { %v799_v60 = vpop.f32.mrf.mxu0  ;;  %v3086_v0 = vpop.f32.mrf.mxu1 }
 0x2ff   :  { %v844_v56 = vadd.f32 %v798_v29, %v4068_v7  ;;  %v800_v55 = vadd.f32 %v799_v60, %v4121_v38 }
 0x300   :  { %v801_v36 = vpop.f32.mrf.mxu0  ;;  %v841_v18 = vpop.f32.mrf.mxu1 }
 0x301   :  { %v2760_v21 = vmul.f32 -1.442695, %v844_v56  ;;  %v851_v2 = vadd.f32 %v800_v55, %v4070_v9 }
 0x302   :  { %v802_v11 = vpop.f32.mrf.mxu0  ;;  %v3087_v17 = vpop.f32.mrf.mxu1 }
 0x303   :  { %3527 = vpow2.f32 %v2760_v21  ;;  %v2761_v10 = vmul.f32 -1.442695, %v851_v2 }
 0x305   :  { %3529 = vpow2.f32 %v2761_v10 }
 0x310   :  { %v3528_v54 = vpop.eup %3527 }
 0x311   :  { %v848_v58 = vadd.f32 1.0, %v3528_v54 }
 0x312   :  { %v3530_v61 = vpop.eup %3529 }
 0x313   :  { %3531 = vrcp.f32 %v848_v58  ;;  %v855_v3 = vadd.f32 1.0, %v3530_v61 }
 0x315   :  { %3533 = vrcp.f32 %v855_v3 }
 0x320   :  { %v3532_v7 = vpop.eup %3531 }
 0x321   :  { %v858_v4 = vmul.f32 %v3532_v7, %v839_v1 }
 0x322   :  { %v3534_v23 = vpop.eup %3533 }
 0x323   :  { %v859_v5 = vadd.f32 %v858_v4, %v4073_v12  ;;  %v861_v29 = vsub.f32 1.0, %v3534_v23  ;;  %v863_v9 = vmul.f32 %v3534_v23, %v4175_v8 }
 0x325   :  { %3535 = vtanh.f32 %v859_v5 }
 0x332   :  { %v3536_v60 = vpop.eup %3535 }
 0x333   :  { %v862_v0 = vmul.f32 %v3536_v60, %v861_v29 }
 0x335   :  { %v4221_v56 = vadd.f32 %v863_v9, %v862_v0 }
 0x337   :  { %v865_v36 = vpack.c.bf16 %v4221_v56, %v4221_v56 }
 0x339   :  { %899 = vmatmul.mubr.bf16.vlgmr.msra.gmra.mxu0 %v865_v36  ;;  %3105 = vmatmul.mubr.bf16.vlgmr.msra.gmra.mxu1 %v865_v36 }
 0x33a   :  { %970 = vmatpush1.bf16.msra.mxu0 %v3846_v25  ;;  %3109 = vmatpush3.bf16.msra.mxu1 %v3891_v34 }
 0x33b   :  { %971 = vmatprep.subr.bf16.mxu0 %v3851_v26  ;;  %3110 = vmatprep.subr.bf16.mxu1 %v5205_v6 }
 0x33c   :  { %1001 = vmatprep.mubr.bf16.mxu0 %v5206_v14  ;;  %3124 = vmatprep.mubr.msk.bf16.mxu1 %vm3717_vm0, %v5205_v6 }
 0x33e   :  { %972 = vmatpush1.bf16.msra.mxu0 %v3860_v28  ;;  %3111 = vmatpush3.bf16.msra.mxu1 %v3914_v39 }
 0x33f   :  { %973 = vmatprep.subr.bf16.mxu0 %v3871_v30  ;;  %3112 = vmatprep.subr.bf16.mxu1 %v5205_v6 }
 0x342   :  { %974 = vmatpush1.bf16.msra.mxu0 %v3880_v32  ;;  %3113 = vmatpush3.bf16.msra.mxu1 %v3933_v42 }
 0x343   :  { %975 = vmatprep.subr.bf16.mxu0 %v3886_v33  ;;  %3114 = vmatprep.subr.bf16.mxu1 %v5205_v6 }
 0x346   :  { %976 = vmatpush1.bf16.msra.mxu0 %v3897_v35  ;;  %3115 = vmatpush3.bf16.msra.mxu1 %v3956_v46 }
 0x347   :  { %977 = vmatprep.subr.bf16.mxu0 %v3907_v37  ;;  %3116 = vmatprep.subr.bf16.mxu1 %v5205_v6 }
 0x34a   :  { %978 = vmatpush1.bf16.msra.mxu0 %v3920_v40  ;;  %3117 = vmatpush3.bf16.msra.mxu1 %v3977_v49 }
 0x34b   :  { %979 = vmatprep.subr.bf16.mxu0 %v3927_v41  ;;  %3118 = vmatprep.subr.bf16.mxu1 %v5205_v6 }
 0x34e   :  { %980 = vmatpush1.bf16.msra.mxu0 %v3939_v43  ;;  %3119 = vmatpush3.bf16.msra.mxu1 %v3992_v51 }
 0x34f   :  { %981 = vmatprep.subr.bf16.mxu0 %v3949_v45  ;;  %3120 = vmatprep.subr.bf16.mxu1 %v5205_v6 }
 0x352   :  { %982 = vmatpush1.bf16.msra.mxu0 %v3964_v47  ;;  %3121 = vmatpush3.bf16.msra.mxu1 %v4002_v52 }
 0x353   :  { %983 = vmatprep.subr.bf16.mxu0 %v3971_v48  ;;  %3122 = vmatprep.subr.bf16.mxu1 %v5205_v6 }
 0x356   :  { %984 = vmatpush1.bf16.msra.mxu0 %v3983_v50  ;;  %3123 = vmatpush3.bf16.msra.mxu1 %v4012_v53 }
 0x357   :  { %1072 = vmatprep.subr.bf16.mxu0 %v3841_v24  ;;  %3128 = vmatprep.subr.bf16.mxu1 %v5205_v6 }
 0x3f9   :  { %v900_v12 = vpop.f32.mrf.mxu0  ;;  %v941_v22 = vpop.f32.mrf.mxu1 }
 0x3fa   :  { %v901_v18 = vadd.f32 %v900_v12, %v4115_v31  ;;  %v942_v29 = vadd.f32 %v941_v22, %v4125_v59 }
 0x3fb   :  { %v902_v21 = vpop.f32.mrf.mxu0  ;;  %v3106_v55 = vpop.f32.mrf.mxu1 }
 0x3fc   :  { %v947_v11 = vadd.f32 %v901_v18, %v4075_v13  ;;  %v903_v54 = vadd.f32 %v902_v21, %v4121_v38 }
 0x3fd   :  { %v904_v17 = vpop.f32.mrf.mxu0  ;;  %v944_v2 = vpop.f32.mrf.mxu1 }
 0x3fe   :  { %v2762_v10 = vmul.f32 -1.442695, %v947_v11  ;;  %v954_v3 = vadd.f32 %v903_v54, %v4077_v16 }
 0x3ff   :  { %v905_v58 = vpop.f32.mrf.mxu0  ;;  %v3107_v61 = vpop.f32.mrf.mxu1 }
 0x400   :  { %3537 = vpow2.f32 %v2762_v10  ;;  %v2763_v1 = vmul.f32 -1.442695, %v954_v3 }
 0x402   :  { %3539 = vpow2.f32 %v2763_v1 }
 0x40d   :  { %v3538_v7 = vpop.eup %3537 }
 0x40e   :  { %v951_v4 = vadd.f32 1.0, %v3538_v7 }
 0x40f   :  { %v3540_v5 = vpop.eup %3539 }
 0x410   :  { %3541 = vrcp.f32 %v951_v4  ;;  %v958_v23 = vadd.f32 1.0, %v3540_v5 }
 0x412   :  { %3543 = vrcp.f32 %v958_v23 }
 0x41d   :  { %v3542_v13 = vpop.eup %3541 }
 0x41e   :  { %v961_v60 = vmul.f32 %v3542_v13, %v942_v29 }
 0x41f   :  { %v3544_v9 = vpop.eup %3543 }
 0x420   :  { %v962_v0 = vadd.f32 %v961_v60, %v4080_v19  ;;  %v964_v36 = vsub.f32 1.0, %v3544_v9  ;;  %v966_v16 = vmul.f32 %v3544_v9, %v4221_v56 }
 0x422   :  { %3545 = vtanh.f32 %v962_v0 }
 0x42f   :  { %v3546_v12 = vpop.eup %3545 }
 0x430   :  { %v965_v18 = vmul.f32 %v3546_v12, %v964_v36 }
 0x432   :  { %v4267_v21 = vadd.f32 %v966_v16, %v965_v18 }
 0x434   :  { %v968_v55 = vpack.c.bf16 %v4267_v21, %v4267_v21 }
 0x436   :  { %1002 = vmatmul.mubr.bf16.vlgmr.msra.gmra.mxu0 %v968_v55  ;;  %3125 = vmatmul.mubr.bf16.vlgmr.msra.gmra.mxu1 %v968_v55  ;;  %v4320_v55 = vld [vmem:[%s5180_s2 + $0xa8] ss:$12 sps:$4 sm:$0xff]  }
 0x437   :  { %1073 = vmatpush1.bf16.msra.mxu0 %v3846_v25  ;;  %3129 = vmatpush3.bf16.msra.mxu1 %v3891_v34 }
 0x438   :  { %1074 = vmatprep.subr.bf16.mxu0 %v3851_v26  ;;  %3130 = vmatprep.subr.bf16.mxu1 %v5205_v6 }
 0x439   :  { %1104 = vmatprep.mubr.bf16.mxu0 %v5206_v14  ;;  %3144 = vmatprep.mubr.msk.bf16.mxu1 %vm3717_vm0, %v5205_v6 }
 0x43b   :  { %1075 = vmatpush1.bf16.msra.mxu0 %v3860_v28  ;;  %3131 = vmatpush3.bf16.msra.mxu1 %v3914_v39 }
 0x43c   :  { %1076 = vmatprep.subr.bf16.mxu0 %v3871_v30  ;;  %3132 = vmatprep.subr.bf16.mxu1 %v5205_v6 }
 0x43f   :  { %1077 = vmatpush1.bf16.msra.mxu0 %v3880_v32  ;;  %3133 = vmatpush3.bf16.msra.mxu1 %v3933_v42 }
 0x440   :  { %1078 = vmatprep.subr.bf16.mxu0 %v3886_v33  ;;  %3134 = vmatprep.subr.bf16.mxu1 %v5205_v6 }
 0x443   :  { %1079 = vmatpush1.bf16.msra.mxu0 %v3897_v35  ;;  %3135 = vmatpush3.bf16.msra.mxu1 %v3956_v46 }
 0x444   :  { %1080 = vmatprep.subr.bf16.mxu0 %v3907_v37  ;;  %3136 = vmatprep.subr.bf16.mxu1 %v5205_v6 }
 0x447   :  { %1081 = vmatpush1.bf16.msra.mxu0 %v3920_v40  ;;  %3137 = vmatpush3.bf16.msra.mxu1 %v3977_v49 }
 0x448   :  { %1082 = vmatprep.subr.bf16.mxu0 %v3927_v41  ;;  %3138 = vmatprep.subr.bf16.mxu1 %v5205_v6 }
 0x44b   :  { %1083 = vmatpush1.bf16.msra.mxu0 %v3939_v43  ;;  %3139 = vmatpush3.bf16.msra.mxu1 %v3992_v51 }
 0x44c   :  { %1084 = vmatprep.subr.bf16.mxu0 %v3949_v45  ;;  %3140 = vmatprep.subr.bf16.mxu1 %v5205_v6 }
 0x44f   :  { %1085 = vmatpush1.bf16.msra.mxu0 %v3964_v47  ;;  %3141 = vmatpush3.bf16.msra.mxu1 %v4002_v52 }
 0x450   :  { %1086 = vmatprep.subr.bf16.mxu0 %v3971_v48  ;;  %3142 = vmatprep.subr.bf16.mxu1 %v5205_v6 }
 0x453   :  { %1087 = vmatpush1.bf16.msra.mxu0 %v3983_v50  ;;  %3143 = vmatpush3.bf16.msra.mxu1 %v4012_v53 }
 0x454   :  { %1175 = vmatprep.subr.bf16.mxu0 %v3841_v24  ;;  %3148 = vmatprep.subr.bf16.mxu1 %v5205_v6 }
 0x4f6   :  { %v1003_v25 = vpop.f32.mrf.mxu0  ;;  %v1044_v26 = vpop.f32.mrf.mxu1 }
 0x4f7   :  { %v1004_v19 = vadd.f32 %v1003_v25, %v4115_v31  ;;  %v1045_v29 = vadd.f32 %v1044_v26, %v4125_v59  ;;  %v5207_v25 = vld [vmem:[#allocation7_spill] sm:$0xff] }
 0x4f8   :  { %v1005_v22 = vpop.f32.mrf.mxu0  ;;  %v3126_v11 = vpop.f32.mrf.mxu1 }
 0x4f9   :  { %v1050_v17 = vadd.f32 %v1004_v19, %v4082_v20  ;;  %v1006_v58 = vadd.f32 %v1005_v22, %v4121_v38 }
 0x4fa   :  { %v1007_v2 = vpop.f32.mrf.mxu0  ;;  %v1047_v10 = vpop.f32.mrf.mxu1 }
 0x4fb   :  { %v2764_v54 = vmul.f32 -1.442695, %v1050_v17  ;;  %v1057_v24 = vadd.f32 %v1006_v58, %v4087_v27  ;;  %v3671_v58 = vld [vmem:[%s5180_s2 + $0x90] ss:$12 sps:$4 sm:$0xff]  }
 0x4fc   :  { %v1008_v61 = vpop.f32.mrf.mxu0  ;;  %v3127_v3 = vpop.f32.mrf.mxu1 }
 0x4fd   :  { %3547 = vpow2.f32 %v2764_v54  ;;  %v2765_v1 = vmul.f32 -1.442695, %v1057_v24  ;;  %v3670_v54 = vld [vmem:[%s5180_s2 + $0xb0] ss:$12 sps:$4 sm:$0xff]   ;;  %v3672_v61 = vld [vmem:[%s5180_s2 + $0x98] ss:$12 sps:$4 sm:$0xff]  }
 0x4fe   :  { %v3673_v3 = vld [vmem:[%s5180_s2 + $0x7c] ss:$12 sps:$4 sm:$0xff]   ;;  %v3674_v24 = vld [vmem:[%s5180_s2 + $0x78] ss:$12 sps:$4 sm:$0xff]  }
 0x4ff   :  { %3549 = vpow2.f32 %v2765_v1  ;;  %v3675_v1 = vld [vmem:[%s5180_s2 + $0x80] ss:$12 sps:$4 sm:$0xff]  }
 0x50a   :  { %v3548_v7 = vpop.eup %3547 }
 0x50b   :  { %v1054_v4 = vadd.f32 1.0, %v3548_v7  ;;  %v3676_v7 = vld [vmem:[%s5180_s2 + $0x64] ss:$12 sps:$4 sm:$0xff]  }
 0x50c   :  { %v3550_v5 = vpop.eup %3549 }
 0x50d   :  { %3551 = vrcp.f32 %v1054_v4  ;;  %v1061_v23 = vadd.f32 1.0, %v3550_v5  ;;  %v3677_v4 = vld [vmem:[%s5180_s2 + $0x60] ss:$12 sps:$4 sm:$0xff]   ;;  %v3678_v5 = vld [vmem:[%s5180_s2 + $0x68] ss:$12 sps:$4 sm:$0xff]  }
 0x50f   :  { %3553 = vrcp.f32 %v1061_v23  ;;  %v3679_v23 = vld [vmem:[%s5180_s2 + $0x4c] ss:$12 sps:$4 sm:$0xff]  }
 0x51a   :  { %v3552_v20 = vpop.eup %3551 }
 0x51b   :  { %v1064_v13 = vmul.f32 %v3552_v20, %v1045_v29  ;;  %v3680_v29 = vld [vmem:[%s5180_s2 + $0x48] ss:$12 sps:$4 sm:$0xff]   ;;  %v3681_v20 = vld [vmem:[%s5180_s2 + $0x50] ss:$12 sps:$4 sm:$0xff]  }
 0x51c   :  { %v3554_v0 = vpop.eup %3553 }
 0x51d   :  { %v1065_v60 = vadd.f32 %v1064_v13, %v4095_v57  ;;  %v1067_v9 = vsub.f32 1.0, %v3554_v0  ;;  %v1069_v27 = vmul.f32 %v3554_v0, %v4267_v21  ;;  %v4327_v57 = vld [vmem:[%s5180_s2 + $0x94] ss:$12 sps:$4 sm:$0xff]   ;;  %v3684_v0 = vld [vmem:[%s5180_s2 + $0x38] ss:$12 sps:$4 sm:$0xff]  }
 0x51e   :  { %v3682_v13 = vld [vmem:[%s5180_s2 + $0x34] ss:$12 sps:$4 sm:$0xff]  }
 0x51f   :  { %3555 = vtanh.f32 %v1065_v60  ;;  %v3683_v60 = vld [vmem:[%s5180_s2 + $0x30] ss:$12 sps:$4 sm:$0xff]  }
 0x52c   :  { %v3556_v36 = vpop.eup %3555 }
 0x52d   :  { %v1068_v12 = vmul.f32 %v3556_v36, %v1067_v9  ;;  %v3685_v9 = vld [vmem:[%s5180_s2 + $0x1c] ss:$12 sps:$4 sm:$0xff]   ;;  %v3686_v36 = vld [vmem:[%s5180_s2 + $0x18] ss:$12 sps:$4 sm:$0xff]  }
 0x52f   :  { %v4313_v18 = vadd.f32 %v1069_v27, %v1068_v12  ;;  %v3687_v12 = vld [vmem:[%s5180_s2 + $0x20] ss:$12 sps:$4 sm:$0xff]   ;;  %v3688_v27 = vld [vmem:[%s5180_s2 + $0x4] ss:$12 sps:$4 sm:$0xff]  }
 0x531   :  { %v1071_v16 = vpack.c.bf16 %v4313_v18, %v4313_v18 }
 0x533   :  { %1105 = vmatmul.mubr.bf16.vlgmr.msra.gmra.mxu0 %v1071_v16  ;;  %3145 = vmatmul.mubr.bf16.vlgmr.msra.gmra.mxu1 %v1071_v16  ;;  %v3689_v16 = vld [vmem:[%s5180_s2] ss:$12 sps:$4 sm:$0xff]  }
 0x534   :  { %1176 = vmatpush1.bf16.msra.mxu0 %v4320_v55  ;;  %3149 = vmatpush3.bf16.msra.mxu1 %v3891_v34 }
 0x535   :  { %1177 = vmatprep.subr.bf16.mxu0 %v4327_v57  ;;  %3150 = vmatprep.subr.bf16.mxu1 %v5205_v6 }
 0x536   :  { %1207 = vmatprep.mubr.bf16.mxu0 %v5206_v14  ;;  %3164 = vmatprep.mubr.msk.bf16.mxu1 %vm3717_vm0, %v5205_v6 }
 0x538   :  { %1178 = vmatpush1.bf16.msra.mxu0 %v3860_v28  ;;  %3151 = vmatpush3.bf16.msra.mxu1 %v3914_v39  ;;  %v3669_v28 = vld [vmem:[%s5180_s2 + $0xac] ss:$12 sps:$4 sm:$0xff]  }
 0x539   :  { %1179 = vmatprep.subr.bf16.mxu0 %v3871_v30  ;;  %3152 = vmatprep.subr.bf16.mxu1 %v5205_v6 }
 0x53c   :  { %1180 = vmatpush1.bf16.msra.mxu0 %v3880_v32  ;;  %3153 = vmatpush3.bf16.msra.mxu1 %v3933_v42 }
 0x53d   :  { %1181 = vmatprep.subr.bf16.mxu0 %v3886_v33  ;;  %3154 = vmatprep.subr.bf16.mxu1 %v5205_v6 }
 0x540   :  { %1182 = vmatpush1.bf16.msra.mxu0 %v3897_v35  ;;  %3155 = vmatpush3.bf16.msra.mxu1 %v3956_v46 }
 0x541   :  { %1183 = vmatprep.subr.bf16.mxu0 %v3907_v37  ;;  %3156 = vmatprep.subr.bf16.mxu1 %v5205_v6 }
 0x544   :  { %1184 = vmatpush1.bf16.msra.mxu0 %v3920_v40  ;;  %3157 = vmatpush3.bf16.msra.mxu1 %v3977_v49 }
 0x545   :  { %1185 = vmatprep.subr.bf16.mxu0 %v3927_v41  ;;  %3158 = vmatprep.subr.bf16.mxu1 %v5205_v6 }
 0x548   :  { %1186 = vmatpush1.bf16.msra.mxu0 %v3939_v43  ;;  %3159 = vmatpush3.bf16.msra.mxu1 %v3992_v51 }
 0x549   :  { %1187 = vmatprep.subr.bf16.mxu0 %v3949_v45  ;;  %3160 = vmatprep.subr.bf16.mxu1 %v5205_v6 }
 0x54c   :  { %1188 = vmatpush1.bf16.msra.mxu0 %v3964_v47  ;;  %3161 = vmatpush3.bf16.msra.mxu1 %v4002_v52 }
 0x54d   :  { %1189 = vmatprep.subr.bf16.mxu0 %v3971_v48  ;;  %3162 = vmatprep.subr.bf16.mxu1 %v5205_v6 }
 0x550   :  { %1190 = vmatpush1.bf16.msra.mxu0 %v3983_v50  ;;  %3163 = vmatpush3.bf16.msra.mxu1 %v4012_v53 }
 0x551   :  { %1278 = vmatprep.subr.bf16.mxu0 %v3669_v28  ;;  %3168 = vmatprep.subr.bf16.mxu1 %v5205_v6  ;;  %v3446_v28 = vld [vmem:[%s5183_s5 + $0xb0] ss:$12 sps:$4 sm:$0xff]  }
 0x5f3   :  { %v1106_v30 = vpop.f32.mrf.mxu0  ;;  %v1147_v32 = vpop.f32.mrf.mxu1 }
 0x5f4   :  { %v1107_v33 = vadd.f32 %v1106_v30, %v4115_v31  ;;  %v1148_v52 = vadd.f32 %v1147_v32, %v4125_v59 }
 0x5f5   :  { %v1108_v34 = vpop.f32.mrf.mxu0  ;;  %v3146_v35 = vpop.f32.mrf.mxu1 }
 0x5f6   :  { %v1153_v37 = vadd.f32 %v1107_v33, %v4092_v44  ;;  %v1109_v42 = vadd.f32 %v1108_v34, %v4121_v38 }
 0x5f7   :  { %v1110_v39 = vpop.f32.mrf.mxu0  ;;  %v1150_v40 = vpop.f32.mrf.mxu1 }
 0x5f8   :  { %v2766_v41 = vmul.f32 -1.442695, %v1153_v37  ;;  %v1160_v46 = vadd.f32 %v1109_v42, %v4097_v62  ;;  %v5208_v37 = vld [vmem:[#allocation6_spill] sm:$0xff] }
 0x5f9   :  { %v1111_v43 = vpop.f32.mrf.mxu0  ;;  %v3147_v45 = vpop.f32.mrf.mxu1 }
 0x5fa   :  { %3557 = vpow2.f32 %v2766_v41  ;;  %v2767_v47 = vmul.f32 -1.442695, %v1160_v46 }
 0x5fc   :  { %3559 = vpow2.f32 %v2767_v47  ;;  %v5209_v47 = vld [vmem:[#allocation8_spill] sm:$0xff] }
 0x607   :  { %v3558_v48 = vpop.eup %3557 }
 0x608   :  { %v1157_v49 = vadd.f32 1.0, %v3558_v48 }
 0x609   :  { %v3560_v50 = vpop.eup %3559 }
 0x60a   :  { %3561 = vrcp.f32 %v1157_v49  ;;  %v1164_v51 = vadd.f32 1.0, %v3560_v50 }
 0x60c   :  { %3563 = vrcp.f32 %v1164_v51 }
 0x617   :  { %v3562_v53 = vpop.eup %3561 }
 0x618   :  { %v1167_v44 = vmul.f32 %v3562_v53, %v1148_v52 }
 0x619   :  { %v3564_v19 = vpop.eup %3563 }
 0x61a   :  { %v1168_v26 = vadd.f32 %v1167_v44, %v5207_v25  ;;  %v1170_v22 = vsub.f32 1.0, %v3564_v19  ;;  %v1172_v62 = vmul.f32 %v3564_v19, %v4313_v18  ;;  %v5210_v19 = vld [vmem:[#allocation4_spill] sm:$0xff] }
 0x61c   :  { %3565 = vtanh.f32 %v1168_v26 }
 0x629   :  { %v3566_v11 = vpop.eup %3565 }
 0x62a   :  { %v1171_v17 = vmul.f32 %v3566_v11, %v1170_v22 }
 0x62c   :  { %v4371_v2 = vadd.f32 %v1172_v62, %v1171_v17 }
 0x62e   :  { %v1174_v10 = vpack.c.bf16 %v4371_v2, %v4371_v2 }
 0x630   :  { %1208 = vmatmul.mubr.bf16.vlgmr.msra.gmra.mxu0 %v1174_v10  ;;  %3165 = vmatmul.mubr.bf16.vlgmr.msra.gmra.mxu1 %v1174_v10 }
 0x631   :  { %1279 = vmatpush1.bf16.msra.mxu0 %v4320_v55  ;;  %3169 = vmatpush3.bf16.msra.mxu1 %v3670_v54  ;;  %v3690_v55 = vld [vmem:[%s5180_s2 + $0x8] ss:$12 sps:$4 sm:$0xff]  }
 0x632   :  { %1280 = vmatprep.subr.bf16.mxu0 %v4327_v57  ;;  %3170 = vmatprep.subr.bf16.mxu1 %v5205_v6  ;;  %v3445_v57 = vld [vmem:[%s5183_s5 + $0xac] ss:$12 sps:$4 sm:$0xff]  }
 0x633   :  { %1310 = vmatprep.mubr.bf16.mxu0 %v5206_v14  ;;  %3184 = vmatprep.mubr.msk.bf16.mxu1 %vm3717_vm0, %v5205_v6 }
 0x635   :  { %1281 = vmatpush1.bf16.msra.mxu0 %v3671_v58  ;;  %3171 = vmatpush3.bf16.msra.mxu1 %v3672_v61  ;;  %v3443_v61 = vld [vmem:[%s5183_s5 + $0xa8] ss:$12 sps:$4 sm:$0xff]  }
 0x636   :  { %1282 = vmatprep.subr.bf16.mxu0 %v3673_v3  ;;  %3172 = vmatprep.subr.bf16.mxu1 %v5205_v6 }
 0x639   :  { %1283 = vmatpush1.bf16.msra.mxu0 %v3674_v24  ;;  %3173 = vmatpush3.bf16.msra.mxu1 %v3675_v1  ;;  %v3449_v24 = vld [vmem:[%s5183_s5 + $0x94] ss:$12 sps:$4 sm:$0xff]   ;;  %v3450_v1 = vld [vmem:[%s5183_s5 + $0x98] ss:$12 sps:$4 sm:$0xff]  }
 0x63a   :  { %1284 = vmatprep.subr.bf16.mxu0 %v3676_v7  ;;  %3174 = vmatprep.subr.bf16.mxu1 %v5205_v6  ;;  %v1380_v7 = vpack.c.bf16 %v4175_v8, %v4129_v15  ;;  %v3451_v15 = vld [vmem:[%s5183_s5 + $0x78] ss:$12 sps:$4 sm:$0xff]  }
 0x63b   :  { %v3457_v8 = vld [vmem:[%s5183_s5 + $0x64] ss:$12 sps:$4 sm:$0xff]  }
 0x63d   :  { %1285 = vmatpush1.bf16.msra.mxu0 %v3677_v4  ;;  %3175 = vmatpush3.bf16.msra.mxu1 %v3678_v5  ;;  %v3447_v4 = vld [vmem:[%s5183_s5 + $0x90] ss:$12 sps:$4 sm:$0xff]  }
 0x63e   :  { %1286 = vmatprep.subr.bf16.mxu0 %v3679_v23  ;;  %3176 = vmatprep.subr.bf16.mxu1 %v5205_v6  ;;  %v3453_v5 = vld [vmem:[%s5183_s5 + $0x7c] ss:$12 sps:$4 sm:$0xff]   ;;  %v3454_v23 = vld [vmem:[%s5183_s5 + $0x80] ss:$12 sps:$4 sm:$0xff]  }
 0x641   :  { %1287 = vmatpush1.bf16.msra.mxu0 %v3680_v29  ;;  %3177 = vmatpush3.bf16.msra.mxu1 %v3681_v20  ;;  %v3458_v29 = vld [vmem:[%s5183_s5 + $0x68] ss:$12 sps:$4 sm:$0xff]   ;;  %v3455_v20 = vld [vmem:[%s5183_s5 + $0x60] ss:$12 sps:$4 sm:$0xff]  }
 0x642   :  { %1288 = vmatprep.subr.bf16.mxu0 %v3682_v13  ;;  %3178 = vmatprep.subr.bf16.mxu1 %v5205_v6  ;;  %v3461_v13 = vld [vmem:[%s5183_s5 + $0x4c] ss:$12 sps:$4 sm:$0xff]  }
 0x645   :  { %1289 = vmatpush1.bf16.msra.mxu0 %v3683_v60  ;;  %3179 = vmatpush3.bf16.msra.mxu1 %v3684_v0  ;;  %v3462_v60 = vld [vmem:[%s5183_s5 + $0x50] ss:$12 sps:$4 sm:$0xff]   ;;  %v3459_v0 = vld [vmem:[%s5183_s5 + $0x48] ss:$12 sps:$4 sm:$0xff]  }
 0x646   :  { %1290 = vmatprep.subr.bf16.mxu0 %v3685_v9  ;;  %3180 = vmatprep.subr.bf16.mxu1 %v5205_v6  ;;  %v3465_v9 = vld [vmem:[%s5183_s5 + $0x34] ss:$12 sps:$4 sm:$0xff]  }
 0x649   :  { %1291 = vmatpush1.bf16.msra.mxu0 %v3686_v36  ;;  %3181 = vmatpush3.bf16.msra.mxu1 %v3687_v12  ;;  %v3466_v36 = vld [vmem:[%s5183_s5 + $0x38] ss:$12 sps:$4 sm:$0xff]   ;;  %v3463_v12 = vld [vmem:[%s5183_s5 + $0x30] ss:$12 sps:$4 sm:$0xff]  }
 0x64a   :  { %1292 = vmatprep.subr.bf16.mxu0 %v3688_v27  ;;  %3182 = vmatprep.subr.bf16.mxu1 %v5205_v6  ;;  %v3469_v27 = vld [vmem:[%s5183_s5 + $0x1c] ss:$12 sps:$4 sm:$0xff]  }
 0x64d   :  { %1293 = vmatpush1.bf16.msra.mxu0 %v3689_v16  ;;  %3183 = vmatpush3.bf16.msra.mxu1 %v3690_v55  ;;  %v3470_v16 = vld [vmem:[%s5183_s5 + $0x20] ss:$12 sps:$4 sm:$0xff]   ;;  %v3467_v55 = vld [vmem:[%s5183_s5 + $0x18] ss:$12 sps:$4 sm:$0xff]  }
 0x64e   :  { %1594 = vmatprep.subr.bf16.mxu0 %v3445_v57  ;;  %3188 = vmatprep.subr.bf16.mxu1 %v3446_v28  ;;  %v3473_v57 = vld [vmem:[%s5183_s5 + $0x4] ss:$12 sps:$4 sm:$0xff]  }
 0x6f0   :  { %v1209_v30 = vpop.f32.mrf.mxu0  ;;  %v1250_v32 = vpop.f32.mrf.mxu1 }
 0x6f1   :  { %v1210_v33 = vadd.f32 %v1209_v30, %v4115_v31  ;;  %v1251_v44 = vadd.f32 %v1250_v32, %v4125_v59  ;;  %v3471_v30 = vld [vmem:[%s5183_s5] ss:$12 sps:$4 sm:$0xff]   ;;  %v1381_v32 = vpack.c.bf16 %v4267_v21, %v4221_v56  ;;  %v4552_v21 = vld [vmem:[%s5184_s6 + $0xa8] ss:$12 sps:$4 sm:$0xff]  }
 0x6f2   :  { %v1211_v34 = vpop.f32.mrf.mxu0  ;;  %v3166_v35 = vpop.f32.mrf.mxu1  ;;  %v4547_v56 = vld [vmem:[%s5184_s6 + $0xac] ss:$12 sps:$4 sm:$0xff]  }
 0x6f3   :  { %v1256_v39 = vadd.f32 %v1210_v33, %v5208_v37  ;;  %v1212_v43 = vadd.f32 %v1211_v34, %v4121_v38  ;;  %v1382_v33 = vpack.c.bf16 %v4371_v2, %v4313_v18  ;;  %v4559_v18 = vld [vmem:[%s5184_s6 + $0x94] ss:$12 sps:$4 sm:$0xff]   ;;  %v4571_v34 = vld [vmem:[%s5184_s6 + $0x7c] ss:$12 sps:$4 sm:$0xff]   ;;  %v4576_v35 = vld [vmem:[%s5184_s6 + $0x78] ss:$12 sps:$4 sm:$0xff]  }
 0x6f4   :  { %v1213_v40 = vpop.f32.mrf.mxu0  ;;  %v1253_v41 = vpop.f32.mrf.mxu1  ;;  %v4583_v37 = vld [vmem:[%s5184_s6 + $0x64] ss:$12 sps:$4 sm:$0xff]  }
 0x6f5   :  { %v2768_v42 = vmul.f32 -1.442695, %v1256_v39  ;;  %v1263_v48 = vadd.f32 %v1212_v43, %v5209_v47  ;;  %v4588_v39 = vld [vmem:[%s5184_s6 + $0x60] ss:$12 sps:$4 sm:$0xff]   ;;  %v4600_v41 = vld [vmem:[%s5184_s6 + $0x48] ss:$12 sps:$4 sm:$0xff]  }
 0x6f6   :  { %v1214_v45 = vpop.f32.mrf.mxu0  ;;  %v3167_v46 = vpop.f32.mrf.mxu1  ;;  %v4595_v40 = vld [vmem:[%s5184_s6 + $0x4c] ss:$12 sps:$4 sm:$0xff]   ;;  %v4612_v43 = vld [vmem:[%s5184_s6 + $0x30] ss:$12 sps:$4 sm:$0xff]  }
 0x6f7   :  { %3567 = vpow2.f32 %v2768_v42  ;;  %v2769_v49 = vmul.f32 -1.442695, %v1263_v48  ;;  %v4607_v42 = vld [vmem:[%s5184_s6 + $0x34] ss:$12 sps:$4 sm:$0xff]   ;;  %v4619_v45 = vld [vmem:[%s5184_s6 + $0x1c] ss:$12 sps:$4 sm:$0xff]  }
 0x6f8   :  { %v4624_v46 = vld [vmem:[%s5184_s6 + $0x18] ss:$12 sps:$4 sm:$0xff]   ;;  %v4635_v48 = vld [vmem:[%s5184_s6 + $0xb0] ss:$12 sps:$4 sm:$0xff]  }
 0x6f9   :  { %3569 = vpow2.f32 %v2769_v49  ;;  %v4629_v47 = vld [vmem:[%s5184_s6 + $0x4] ss:$12 sps:$4 sm:$0xff]   ;;  %v4641_v49 = vld [vmem:[%s5184_s6] ss:$12 sps:$4 sm:$0xff]  }
 0x704   :  { %v3568_v50 = vpop.eup %3567 }
 0x705   :  { %v1260_v51 = vadd.f32 1.0, %v3568_v50  ;;  %v4651_v50 = vld [vmem:[%s5184_s6 + $0x98] ss:$12 sps:$4 sm:$0xff]  }
 0x706   :  { %v3570_v52 = vpop.eup %3569 }
 0x707   :  { %3571 = vrcp.f32 %v1260_v51  ;;  %v1267_v53 = vadd.f32 1.0, %v3570_v52  ;;  %v4657_v51 = vld [vmem:[%s5184_s6 + $0x80] ss:$12 sps:$4 sm:$0xff]   ;;  %v4664_v52 = vld [vmem:[%s5184_s6 + $0x68] ss:$12 sps:$4 sm:$0xff]  }
 0x709   :  { %3573 = vrcp.f32 %v1267_v53  ;;  %v4671_v53 = vld [vmem:[%s5184_s6 + $0x50] ss:$12 sps:$4 sm:$0xff]  }
 0x714   :  { %v3572_v25 = vpop.eup %3571 }
 0x715   :  { %v1270_v26 = vmul.f32 %v3572_v25, %v1251_v44  ;;  %v4678_v44 = vld [vmem:[%s5184_s6 + $0x38] ss:$12 sps:$4 sm:$0xff]   ;;  %v4685_v25 = vld [vmem:[%s5184_s6 + $0x20] ss:$12 sps:$4 sm:$0xff]  }
 0x716   :  { %v3574_v11 = vpop.eup %3573 }
 0x717   :  { %v1271_v22 = vadd.f32 %v1270_v26, %v5210_v19  ;;  %v1273_v17 = vsub.f32 1.0, %v3574_v11  ;;  %v1275_v54 = vmul.f32 %v3574_v11, %v4371_v2  ;;  %v4564_v2 = vld [vmem:[%s5184_s6 + $0x90] ss:$12 sps:$4 sm:$0xff]   ;;  %v4692_v26 = vld [vmem:[%s5184_s6 + $0x8] ss:$12 sps:$4 sm:$0xff]  }
 0x719   :  { %3575 = vtanh.f32 %v1271_v22 }
 0x726   :  { %v3576_v62 = vpop.eup %3575 }
 0x727   :  { %v1274_v10 = vmul.f32 %v3576_v62, %v1273_v17 }
 0x729   :  { %v4463_v58 = vadd.f32 %v1275_v54, %v1274_v10  ;;  %v5211_v10 = vld [vmem:[#allocation9_spill] sm:$0xff] }
 0x72b   :  { %v1277_v3 = vpack.c.bf16 %v4463_v58, %v4463_v58 }
 0x72d   :  { %1311 = vmatmul.mubr.bf16.vlgmr.msra.gmra.mxu0 %v1277_v3  ;;  %3185 = vmatmul.mubr.bf16.vlgmr.msra.gmra.mxu1 %v1277_v3 }
 0x72e   :  { %1595 = vmatpush1.bf16.msra.mxu0 %v3443_v61  ;;  %3189 = vmatpush3.bf16.msra.mxu1 %v3446_v28  ;;  %v3474_v28 = vld [vmem:[%s5183_s5 + $0x8] ss:$12 sps:$4 sm:$0xff]  }
 0x72f   :  { %3204 = vmatprep.mubr.bf16.mxu1 %v1380_v7  ;;  %1596 = vmatprep.subr.bf16.mxu0 %v3449_v24 }
 0x730   :  { %3190 = vmatprep.subr.bf16.mxu1 %v3450_v1  ;;  %1626 = vmatprep.mubr.bf16.mxu0 %v5206_v14 }
 0x732   :  { %1597 = vmatpush1.bf16.msra.mxu0 %v3447_v4  ;;  %3191 = vmatpush3.bf16.msra.mxu1 %v3450_v1 }
 0x733   :  { %1598 = vmatprep.subr.bf16.mxu0 %v3453_v5  ;;  %3192 = vmatprep.subr.bf16.mxu1 %v3454_v23  ;;  %v5212_v5 = vld [vmem:[#allocation10_spill] sm:$0xff] }
 0x736   :  { %1599 = vmatpush1.bf16.msra.mxu0 %v3451_v15  ;;  %3193 = vmatpush3.bf16.msra.mxu1 %v3454_v23 }
 0x737   :  { %1600 = vmatprep.subr.bf16.mxu0 %v3457_v8  ;;  %3194 = vmatprep.subr.bf16.mxu1 %v3458_v29 }
 0x73a   :  { %1601 = vmatpush1.bf16.msra.mxu0 %v3455_v20  ;;  %3195 = vmatpush3.bf16.msra.mxu1 %v3458_v29 }
 0x73b   :  { %1602 = vmatprep.subr.bf16.mxu0 %v3461_v13  ;;  %3196 = vmatprep.subr.bf16.mxu1 %v3462_v60 }
 0x73e   :  { %1603 = vmatpush1.bf16.msra.mxu0 %v3459_v0  ;;  %3197 = vmatpush3.bf16.msra.mxu1 %v3462_v60 }
 0x73f   :  { %1604 = vmatprep.subr.bf16.mxu0 %v3465_v9  ;;  %3198 = vmatprep.subr.bf16.mxu1 %v3466_v36  ;;  %v5213_v9 = vld [vmem:[#allocation5_spill] sm:$0xff] }
 0x742   :  { %1605 = vmatpush1.bf16.msra.mxu0 %v3463_v12  ;;  %3199 = vmatpush3.bf16.msra.mxu1 %v3466_v36 }
 0x743   :  { %1606 = vmatprep.subr.bf16.mxu0 %v3469_v27  ;;  %3200 = vmatprep.subr.bf16.mxu1 %v3470_v16 }
 0x746   :  { %1607 = vmatpush1.bf16.msra.mxu0 %v3467_v55  ;;  %3201 = vmatpush3.bf16.msra.mxu1 %v3470_v16 }
 0x747   :  { %1608 = vmatprep.subr.bf16.mxu0 %v3473_v57  ;;  %3202 = vmatprep.subr.bf16.mxu1 %v3474_v28 }
 0x74a   :  { %1609 = vmatpush1.bf16.msra.mxu0 %v3471_v30  ;;  %3203 = vmatpush3.bf16.msra.mxu1 %v3474_v28 }
 0x74b   :  { %3212 = vmatprep.subr.bf16.mxu1 %v5205_v6  ;;  %1876 = vmatprep.subr.bf16.mxu0 %v4547_v56 }
 0x74d   :  { %1627 = vmatmul.mubr.bf16.vlgmr.msra.gmra.mxu0 %v1380_v7  ;;  %3205 = vmatmul.mubr.bf16.vlgmr.msra.gmra.mxu1 %v1381_v32 }
 0x74e   :  { %3208 = vmatprep.mubr.bf16.mxu1 %v1382_v33  ;;  %1636 = vmatprep.mubr.bf16.mxu0 %v5206_v14 }
 0x74f   :  { %1877 = vmatpush1.bf16.msra.mxu0 %v4552_v21  ;;  %3213 = vmatpush3.bf16.msra.mxu1 %v4635_v48 }
 0x750   :  { %1878 = vmatprep.subr.bf16.mxu0 %v4559_v18  ;;  %3214 = vmatprep.subr.bf16.mxu1 %v5205_v6 }
 0x753   :  { %1879 = vmatpush1.bf16.msra.mxu0 %v4564_v2  ;;  %3215 = vmatpush3.bf16.msra.mxu1 %v4651_v50 }
 0x754   :  { %1880 = vmatprep.subr.bf16.mxu0 %v4571_v34  ;;  %3216 = vmatprep.subr.bf16.mxu1 %v5205_v6 }
 0x755   :  { %1637 = vmatmul.mubr.bf16.gmra.mxu0 %v1381_v32 }
 0x756   :  { %1646 = vmatprep.mubr.bf16.mxu0 %v5206_v14 }
 0x757   :  { %1881 = vmatpush1.bf16.msra.mxu0 %v4576_v35  ;;  %3217 = vmatpush3.bf16.msra.mxu1 %v4657_v51 }
 0x758   :  { %1882 = vmatprep.subr.bf16.mxu0 %v4583_v37  ;;  %3218 = vmatprep.subr.bf16.mxu1 %v5205_v6 }
 0x75b   :  { %1883 = vmatpush1.bf16.msra.mxu0 %v4588_v39  ;;  %3219 = vmatpush3.bf16.msra.mxu1 %v4664_v52 }
 0x75c   :  { %1884 = vmatprep.subr.bf16.mxu0 %v4595_v40  ;;  %3220 = vmatprep.subr.bf16.mxu1 %v5205_v6 }
 0x75d   :  { %1647 = vmatmul.mubr.bf16.gmra.mxu0 %v1382_v33 }
 0x75e   :  { %1656 = vmatprep.mubr.bf16.mxu0 %v5206_v14 }
 0x75f   :  { %1885 = vmatpush1.bf16.msra.mxu0 %v4600_v41  ;;  %3221 = vmatpush3.bf16.msra.mxu1 %v4671_v53 }
 0x760   :  { %1886 = vmatprep.subr.bf16.mxu0 %v4607_v42  ;;  %3222 = vmatprep.subr.bf16.mxu1 %v5205_v6 }
 0x763   :  { %1887 = vmatpush1.bf16.msra.mxu0 %v4612_v43  ;;  %3223 = vmatpush3.bf16.msra.mxu1 %v4678_v44 }
 0x764   :  { %1888 = vmatprep.subr.bf16.mxu0 %v4619_v45  ;;  %3224 = vmatprep.subr.bf16.mxu1 %v5205_v6 }
 0x767   :  { %1889 = vmatpush1.bf16.msra.mxu0 %v4624_v46  ;;  %3225 = vmatpush3.bf16.msra.mxu1 %v4685_v25 }
 0x768   :  { %1890 = vmatprep.subr.bf16.mxu0 %v4629_v47  ;;  %3226 = vmatprep.subr.bf16.mxu1 %v5205_v6 }
 0x76b   :  { %1891 = vmatpush1.bf16.msra.mxu0 %v4641_v49  ;;  %3227 = vmatpush3.bf16.msra.mxu1 %v4692_v26 }
 0x76c   :  { %1979 = vmatprep.subr.bf16.mxu0 %v4547_v56  ;;  %3232 = vmatprep.subr.bf16.mxu1 %v5205_v6 }
 0x7ed   :  { %v1312_v19 = vpop.f32.mrf.mxu0  ;;  %v1353_v22 = vpop.f32.mrf.mxu1 }
 0x7ee   :  { %v1313_v11 = vadd.f32 %v1312_v19, %v4115_v31  ;;  %v1354_v13 = vadd.f32 %v1353_v22, %v4125_v59 }
 0x7ef   :  { %v1314_v17 = vpop.f32.mrf.mxu0  ;;  %v3186_v62 = vpop.f32.mrf.mxu1 }
 0x7f0   :  { %v1359_v54 = vadd.f32 %v1313_v11, %v5211_v10  ;;  %v1315_v1 = vadd.f32 %v1314_v17, %v4121_v38 }
 0x7f1   :  { %v1316_v61 = vpop.f32.mrf.mxu0  ;;  %v1356_v3 = vpop.f32.mrf.mxu1 }
 0x7f2   :  { %v2770_v24 = vmul.f32 -1.442695, %v1359_v54  ;;  %v1366_v23 = vadd.f32 %v1315_v1, %v5212_v5  ;;  %v1448_v5 = vld [vmem:[%s5185_s7] sm:$0x7] }
 0x7f3   :  { %v1317_v7 = vpop.f32.mrf.mxu0  ;;  %v3187_v4 = vpop.f32.mrf.mxu1 }
 0x7f4   :  { %3577 = vpow2.f32 %v2770_v24  ;;  %v2771_v15 = vmul.f32 -1.442695, %v1366_v23 }
 0x7f6   :  { %3579 = vpow2.f32 %v2771_v15 }
 0x801   :  { %v3578_v8 = vpop.eup %3577 }
 0x802   :  { %v1363_v29 = vadd.f32 1.0, %v3578_v8  ;;  %v1449_v8 = vld [vmem:[%s5186_s8] sm:$0x7] }
 0x803   :  { %v3580_v31 = vpop.eup %3579 }
 0x804   :  { %3581 = vrcp.f32 %v1363_v29  ;;  %v1370_v20 = vadd.f32 1.0, %v3580_v31 }
 0x806   :  { %3583 = vrcp.f32 %v1370_v20  ;;  %v5222_v20 = vld [vmem:[#allocation2_spill] sm:$0xff] }
 0x80d   :  { %v1628_v59 = vpop.f32.mrf.mxu0  ;;  %v4757_v17 = vpop.f32.mrf.mxu1 }
 0x80f   :  { %v1701_v10 = vpop.f32.mrf.mxu1 }
 0x811   :  { %v3582_v60 = vpop.eup %3581  ;;  %v4763_v61 = vpop.f32.mrf.mxu1 }
 0x812   :  { %v1373_v0 = vmul.f32 %v3582_v60, %v1354_v13  ;;  %v4790_v13 = vrot.slane %v1448_v5, %v5222_v20  ;;  %v4793_v60 = vrot.slane %v1449_v8, %v5222_v20 }
 0x813   :  { %v3584_v38 = vpop.eup %3583  ;;  %v4767_v24 = vpop.f32.mrf.mxu1 }
 0x814   :  { %v1374_v36 = vadd.f32 %v1373_v0, %v5213_v9  ;;  %v1376_v12 = vsub.f32 1.0, %v3584_v38  ;;  %v1378_v55 = vmul.f32 %v3584_v38, %v4463_v58 }
 0x816   :  { %3585 = vtanh.f32 %v1374_v36 }
 0x823   :  { %v3586_v27 = vpop.eup %3585 }
 0x824   :  { %v1377_v16 = vmul.f32 %v3586_v27, %v1376_v12  ;;  %v1629_v12 = vadd.f32 %v1628_v59, %v4790_v13 }
 0x826   :  { %v1379_v57 = vadd.f32 %v1378_v55, %v1377_v16  ;;  %v5225_v16 = vld [vmem:[#allocation3_spill] sm:$0xff] }
 0x827   :  { %v4802_v55 = vrot.slane %v1449_v8, %v5225_v16 }
 0x828   :  { %v1383_v28 = vpack.c.bf16 %v1379_v57, %v4463_v58  ;;  %v1630_v58 = vpop.f32.mrf.mxu0 }
 0x82a   :  { %1657 = vmatmul.mubr.bf16.gmra.mxu0 %v1383_v28  ;;  %3209 = vmatmul.mubr.bf16.gmra.mxu1 %v1383_v28  ;;  %v4745_v30 = vpop.f32.mrf.mxu0 }
 0x82b   :  { %1908 = vmatprep.mubr.bf16.mxu0 %v5206_v14  ;;  %3228 = vmatprep.mubr.msk.bf16.mxu1 %vm3717_vm0, %v5205_v6 }
 0x82c   :  { %v4747_v32 = vpop.f32.mrf.mxu0 }
 0x82e   :  { %v4749_v33 = vpop.f32.mrf.mxu0 }
 0x830   :  { %v4751_v19 = vpop.f32.mrf.mxu0 }
 0x832   :  { %1909 = vmatmul.mubr.bf16.vlgmr.msra.gmra.mxu0 %v5206_v14  ;;  %3229 = vmatmul.mubr.bf16.vlgmr.msra.gmra.mxu1 %v5206_v14  ;;  %v4753_v22 = vpop.f32.mrf.mxu0 }
 0x833   :  { %1980 = vmatpush1.bf16.msra.mxu0 %v4552_v21  ;;  %3233 = vmatpush3.bf16.msra.mxu1 %v4635_v48 }
 0x834   :  { %1981 = vmatprep.subr.bf16.mxu0 %v4559_v18  ;;  %3234 = vmatprep.subr.bf16.mxu1 %v5205_v6  ;;  %v4755_v11 = vpop.f32.mrf.mxu0 }
 0x835   :  { %2011 = vmatprep.mubr.bf16.mxu0 %v5206_v14  ;;  %3248 = vmatprep.mubr.msk.bf16.mxu1 %vm3717_vm0, %v5205_v6 }
 0x836   :  { %v4759_v62 = vpop.f32.mrf.mxu0 }
 0x837   :  { %1982 = vmatpush1.bf16.msra.mxu0 %v4564_v2  ;;  %3235 = vmatpush3.bf16.msra.mxu1 %v4651_v50 }
 0x838   :  { %1983 = vmatprep.subr.bf16.mxu0 %v4571_v34  ;;  %3236 = vmatprep.subr.bf16.mxu1 %v5205_v6  ;;  %v4761_v54 = vpop.f32.mrf.mxu0 }
 0x83a   :  { %v4765_v3 = vpop.f32.mrf.mxu0 }
 0x83b   :  { %1984 = vmatpush1.bf16.msra.mxu0 %v4576_v35  ;;  %3237 = vmatpush3.bf16.msra.mxu1 %v4657_v51  ;;  %5214 = vst [vmem:[#allocation7_spill] sm:$0xff] %v4765_v3 }
 0x83c   :  { %1985 = vmatprep.subr.bf16.mxu0 %v4583_v37  ;;  %3238 = vmatprep.subr.bf16.mxu1 %v5205_v6  ;;  %v4769_v1 = vpop.f32.mrf.mxu0 }
 0x83d   :  { %5215 = vst [vmem:[#allocation6_spill] sm:$0xff] %v4769_v1 }
 0x83f   :  { %1986 = vmatpush1.bf16.msra.mxu0 %v4588_v39  ;;  %3239 = vmatpush3.bf16.msra.mxu1 %v4664_v52 }
 0x840   :  { %1987 = vmatprep.subr.bf16.mxu0 %v4595_v40  ;;  %3240 = vmatprep.subr.bf16.mxu1 %v5205_v6 }
 0x843   :  { %1988 = vmatpush1.bf16.msra.mxu0 %v4600_v41  ;;  %3241 = vmatpush3.bf16.msra.mxu1 %v4671_v53 }
 0x844   :  { %1989 = vmatprep.subr.bf16.mxu0 %v4607_v42  ;;  %3242 = vmatprep.subr.bf16.mxu1 %v5205_v6 }
 0x847   :  { %1990 = vmatpush1.bf16.msra.mxu0 %v4612_v43  ;;  %3243 = vmatpush3.bf16.msra.mxu1 %v4678_v44 }
 0x848   :  { %1991 = vmatprep.subr.bf16.mxu0 %v4619_v45  ;;  %3244 = vmatprep.subr.bf16.mxu1 %v5205_v6 }
 0x84b   :  { %1992 = vmatpush1.bf16.msra.mxu0 %v4624_v46  ;;  %3245 = vmatpush3.bf16.msra.mxu1 %v4685_v25 }
 0x84c   :  { %1993 = vmatprep.subr.bf16.mxu0 %v4629_v47  ;;  %3246 = vmatprep.subr.bf16.mxu1 %v5205_v6 }
 0x84f   :  { %1994 = vmatpush1.bf16.msra.mxu0 %v4641_v49  ;;  %3247 = vmatpush3.bf16.msra.mxu1 %v4692_v26 }
 0x850   :  { %2082 = vmatprep.subr.bf16.mxu0 %v4547_v56  ;;  %3252 = vmatprep.subr.bf16.mxu1 %v5205_v6 }
 0x8ea   :  { %v4771_v7 = vpop.f32.mrf.mxu0  ;;  %v4773_v4 = vpop.f32.mrf.mxu1 }
 0x8eb   :  { %5216 = vst [vmem:[#allocation8_spill] sm:$0xff] %v4771_v7  ;;  %5217 = vst [vmem:[#allocation4_spill] sm:$0xff] %v4773_v4 }
 0x8ec   :  { %v4778_v23 = vpop.f32.mrf.mxu0  ;;  %v4780_v15 = vpop.f32.mrf.mxu1 }
 0x8ed   :  { %5218 = vst [vmem:[#allocation9_spill] sm:$0xff] %v4778_v23  ;;  %5219 = vst [vmem:[#allocation10_spill] sm:$0xff] %v4780_v15 }
 0x8ee   :  { %v4785_v29 = vpop.f32.mrf.mxu0  ;;  %v4787_v31 = vpop.f32.mrf.mxu1 }
 0x8ef   :  { %5220 = vst [vmem:[#allocation5_spill] sm:$0xff] %v4785_v29  ;;  %5221 = vst [vmem:[#allocation11_spill] sm:$0xff] %v4787_v31  ;;  %v4805_v31 = vrot.slane %v1448_v5, %v5225_v16  ;;  %v4810_v16 = vrot.slane %v1449_v8, %v4058_v63 }
 0x8f0   :  { %v4795_v0 = vpop.f32.mrf.mxu0  ;;  %v4797_v9 = vpop.f32.mrf.mxu1 }
 0x8f1   :  { %5223 = vst [vmem:[#allocation2_spill] sm:$0xff] %v4795_v0  ;;  %5224 = vst [vmem:[#allocation12_spill] sm:$0xff] %v4797_v9  ;;  %v1631_v59 = vadd.f32 %v1630_v58, %v4805_v31 }
 0x8f2   :  { %v1910_v36 = vpop.f32.mrf.mxu0  ;;  %v1951_v38 = vpop.f32.mrf.mxu1 }
 0x8f3   :  { %v1911_v27 = vadd.f32 %v1910_v36, %v4793_v60 }
 0x8f4   :  { %v1912_v57 = vpop.f32.mrf.mxu0  ;;  %v3230_v28 = vpop.f32.mrf.mxu1 }
 0x8f5   :  { %v1957_v20 = vadd.f32 %v1911_v27, %v1629_v12  ;;  %v1913_v23 = vadd.f32 %v1912_v57, %v4802_v55  ;;  %v4814_v27 = vrot.slane %v1448_v5, %v4058_v63  ;;  %v1633_v5 = vadd.f32 %v4745_v30, %v4790_v13 }
 0x8f6   :  { %v1914_v29 = vpop.f32.mrf.mxu0  ;;  %v1954_v4 = vpop.f32.mrf.mxu1 }
 0x8f7   :  { %v2820_v0 = vmul.f32 -1.442695, %v1957_v20  ;;  %v1964_v36 = vadd.f32 %v1913_v23, %v1631_v59  ;;  %v1952_v4 = vadd.f32 %v1951_v38, %v4810_v16  ;;  %v1702_v58 = vadd.f32 %v1701_v10, %v4814_v27 }
 0x8f8   :  { %v1915_v7 = vpop.f32.mrf.mxu0  ;;  %v3231_v9 = vpop.f32.mrf.mxu1 }
 0x8f9   :  { %3587 = vpow2.f32 %v2820_v0  ;;  %v2821_v1 = vmul.f32 -1.442695, %v1964_v36 }
 0x8fb   :  { %3589 = vpow2.f32 %v2821_v1 }
 0x906   :  { %v3588_v3 = vpop.eup %3587 }
 0x907   :  { %v1961_v15 = vadd.f32 1.0, %v3588_v3 }
 0x908   :  { %v3590_v12 = vpop.eup %3589 }
 0x909   :  { %3591 = vrcp.f32 %v1961_v15  ;;  %v1968_v29 = vadd.f32 1.0, %v3590_v12 }
 0x90b   :  { %3593 = vrcp.f32 %v1968_v29 }
 0x916   :  { %v3592_v7 = vpop.eup %3591 }
 0x917   :  { %v1971_v23 = vmul.f32 %v3592_v7, %v1952_v4 }
 0x918   :  { %v3594_v1 = vpop.eup %3593 }
 0x919   :  { %v1972_v0 = vadd.f32 %v1971_v23, %v1702_v58  ;;  %v1974_v3 = vsub.f32 1.0, %v3594_v1  ;;  %v1976_v8 = vmul.f32 0.0, %v3594_v1 }
 0x91b   :  { %3595 = vtanh.f32 %v1972_v0  ;;  %v1635_v0 = vadd.f32 %v4747_v32, %v4805_v31 }
 0x928   :  { %v3596_v15 = vpop.eup %3595 }
 0x929   :  { %v1975_v9 = vmul.f32 %v3596_v15, %v1974_v3 }
 0x92b   :  { %v4817_v57 = vadd.f32 %v1976_v8, %v1975_v9 }
 0x92d   :  { %v1978_v38 = vpack.c.bf16 %v4817_v57, %v4817_v57 }
 0x92f   :  { %2012 = vmatmul.mubr.bf16.vlgmr.msra.gmra.mxu0 %v1978_v38  ;;  %3249 = vmatmul.mubr.bf16.vlgmr.msra.gmra.mxu1 %v1978_v38 }
 0x930   :  { %2083 = vmatpush1.bf16.msra.mxu0 %v4552_v21  ;;  %3253 = vmatpush3.bf16.msra.mxu1 %v4635_v48 }
 0x931   :  { %2084 = vmatprep.subr.bf16.mxu0 %v4559_v18  ;;  %3254 = vmatprep.subr.bf16.mxu1 %v5205_v6 }
 0x932   :  { %2114 = vmatprep.mubr.bf16.mxu0 %v5206_v14  ;;  %3268 = vmatprep.mubr.msk.bf16.mxu1 %vm3717_vm0, %v5205_v6 }
 0x934   :  { %2085 = vmatpush1.bf16.msra.mxu0 %v4564_v2  ;;  %3255 = vmatpush3.bf16.msra.mxu1 %v4651_v50 }
 0x935   :  { %2086 = vmatprep.subr.bf16.mxu0 %v4571_v34  ;;  %3256 = vmatprep.subr.bf16.mxu1 %v5205_v6 }
 0x938   :  { %2087 = vmatpush1.bf16.msra.mxu0 %v4576_v35  ;;  %3257 = vmatpush3.bf16.msra.mxu1 %v4657_v51 }
 0x939   :  { %2088 = vmatprep.subr.bf16.mxu0 %v4583_v37  ;;  %3258 = vmatprep.subr.bf16.mxu1 %v5205_v6 }
 0x93c   :  { %2089 = vmatpush1.bf16.msra.mxu0 %v4588_v39  ;;  %3259 = vmatpush3.bf16.msra.mxu1 %v4664_v52 }
 0x93d   :  { %2090 = vmatprep.subr.bf16.mxu0 %v4595_v40  ;;  %3260 = vmatprep.subr.bf16.mxu1 %v5205_v6 }
 0x940   :  { %2091 = vmatpush1.bf16.msra.mxu0 %v4600_v41  ;;  %3261 = vmatpush3.bf16.msra.mxu1 %v4671_v53 }
 0x941   :  { %2092 = vmatprep.subr.bf16.mxu0 %v4607_v42  ;;  %3262 = vmatprep.subr.bf16.mxu1 %v5205_v6 }
 0x944   :  { %2093 = vmatpush1.bf16.msra.mxu0 %v4612_v43  ;;  %3263 = vmatpush3.bf16.msra.mxu1 %v4678_v44 }
 0x945   :  { %2094 = vmatprep.subr.bf16.mxu0 %v4619_v45  ;;  %3264 = vmatprep.subr.bf16.mxu1 %v5205_v6 }
 0x948   :  { %2095 = vmatpush1.bf16.msra.mxu0 %v4624_v46  ;;  %3265 = vmatpush3.bf16.msra.mxu1 %v4685_v25 }
 0x949   :  { %2096 = vmatprep.subr.bf16.mxu0 %v4629_v47  ;;  %3266 = vmatprep.subr.bf16.mxu1 %v5205_v6 }
 0x94c   :  { %2097 = vmatpush1.bf16.msra.mxu0 %v4641_v49  ;;  %3267 = vmatpush3.bf16.msra.mxu1 %v4692_v26 }
 0x94d   :  { %2185 = vmatprep.subr.bf16.mxu0 %v4547_v56  ;;  %3272 = vmatprep.subr.bf16.mxu1 %v5205_v6 }
 0x9ef   :  { %v2013_v63 = vpop.f32.mrf.mxu0  ;;  %v2054_v10 = vpop.f32.mrf.mxu1 }
 0x9f0   :  { %v2014_v28 = vadd.f32 %v2013_v63, %v4793_v60  ;;  %v2055_v38 = vadd.f32 %v2054_v10, %v4810_v16  ;;  %v1639_v10 = vadd.f32 %v4749_v33, %v4790_v13 }
 0x9f1   :  { %v2015_v20 = vpop.f32.mrf.mxu0  ;;  %v3250_v59 = vpop.f32.mrf.mxu1 }
 0x9f2   :  { %v2060_v36 = vadd.f32 %v2014_v28, %v1633_v5  ;;  %v2016_v7 = vadd.f32 %v2015_v20, %v4802_v55  ;;  %v1705_v5 = vadd.f32 %v4767_v24, %v4814_v27 }
 0x9f3   :  { %v2017_v12 = vpop.f32.mrf.mxu0  ;;  %v2057_v29 = vpop.f32.mrf.mxu1 }
 0x9f4   :  { %v2822_v4 = vmul.f32 -1.442695, %v2060_v36  ;;  %v2067_v1 = vadd.f32 %v2016_v7, %v1635_v0 }
 0x9f5   :  { %v2018_v58 = vpop.f32.mrf.mxu0  ;;  %v3251_v23 = vpop.f32.mrf.mxu1 }
 0x9f6   :  { %3597 = vpow2.f32 %v2822_v4  ;;  %v2823_v3 = vmul.f32 -1.442695, %v2067_v1 }
 0x9f8   :  { %3599 = vpow2.f32 %v2823_v3 }
 0xa03   :  { %v3598_v30 = vpop.eup %3597 }
 0xa04   :  { %v2064_v15 = vadd.f32 1.0, %v3598_v30 }
 0xa05   :  { %v3600_v9 = vpop.eup %3599 }
 0xa06   :  { %3601 = vrcp.f32 %v2064_v15  ;;  %v2071_v8 = vadd.f32 1.0, %v3600_v9 }
 0xa08   :  { %3603 = vrcp.f32 %v2071_v8 }
 0xa13   :  { %v3602_v63 = vpop.eup %3601 }
 0xa14   :  { %v2074_v28 = vmul.f32 %v3602_v63, %v2055_v38  ;;  %v1641_v63 = vadd.f32 %v4751_v19, %v4805_v31 }
 0xa15   :  { %v3604_v32 = vpop.eup %3603 }
 0xa16   :  { %v2075_v20 = vadd.f32 %v2074_v28, %v1705_v5  ;;  %v2077_v59 = vsub.f32 1.0, %v3604_v32  ;;  %v2079_v29 = vmul.f32 %v3604_v32, %v4817_v57 }
 0xa18   :  { %3605 = vtanh.f32 %v2075_v20 }
 0xa25   :  { %v3606_v36 = vpop.eup %3605 }
 0xa26   :  { %v2078_v12 = vmul.f32 %v3606_v36, %v2077_v59 }
 0xa28   :  { %v4866_v4 = vadd.f32 %v2079_v29, %v2078_v12  ;;  %v1710_v29 = vadd.f32 %v4757_v17, %v4814_v27 }
 0xa2a   :  { %v2081_v7 = vpack.c.bf16 %v4866_v4, %v4866_v4 }
 0xa2c   :  { %2115 = vmatmul.mubr.bf16.vlgmr.msra.gmra.mxu0 %v2081_v7  ;;  %3269 = vmatmul.mubr.bf16.vlgmr.msra.gmra.mxu1 %v2081_v7 }
 0xa2d   :  { %2186 = vmatpush1.bf16.msra.mxu0 %v4552_v21  ;;  %3273 = vmatpush3.bf16.msra.mxu1 %v4635_v48 }
 0xa2e   :  { %2187 = vmatprep.subr.bf16.mxu0 %v4559_v18  ;;  %3274 = vmatprep.subr.bf16.mxu1 %v5205_v6 }
 0xa2f   :  { %2217 = vmatprep.mubr.bf16.mxu0 %v5206_v14  ;;  %3288 = vmatprep.mubr.msk.bf16.mxu1 %vm3717_vm0, %v5205_v6 }
 0xa31   :  { %2188 = vmatpush1.bf16.msra.mxu0 %v4564_v2  ;;  %3275 = vmatpush3.bf16.msra.mxu1 %v4651_v50 }
 0xa32   :  { %2189 = vmatprep.subr.bf16.mxu0 %v4571_v34  ;;  %3276 = vmatprep.subr.bf16.mxu1 %v5205_v6 }
 0xa35   :  { %2190 = vmatpush1.bf16.msra.mxu0 %v4576_v35  ;;  %3277 = vmatpush3.bf16.msra.mxu1 %v4657_v51 }
 0xa36   :  { %2191 = vmatprep.subr.bf16.mxu0 %v4583_v37  ;;  %3278 = vmatprep.subr.bf16.mxu1 %v5205_v6 }
 0xa39   :  { %2192 = vmatpush1.bf16.msra.mxu0 %v4588_v39  ;;  %3279 = vmatpush3.bf16.msra.mxu1 %v4664_v52 }
 0xa3a   :  { %2193 = vmatprep.subr.bf16.mxu0 %v4595_v40  ;;  %3280 = vmatprep.subr.bf16.mxu1 %v5205_v6 }
 0xa3d   :  { %2194 = vmatpush1.bf16.msra.mxu0 %v4600_v41  ;;  %3281 = vmatpush3.bf16.msra.mxu1 %v4671_v53 }
 0xa3e   :  { %2195 = vmatprep.subr.bf16.mxu0 %v4607_v42  ;;  %3282 = vmatprep.subr.bf16.mxu1 %v5205_v6 }
 0xa41   :  { %2196 = vmatpush1.bf16.msra.mxu0 %v4612_v43  ;;  %3283 = vmatpush3.bf16.msra.mxu1 %v4678_v44 }
 0xa42   :  { %2197 = vmatprep.subr.bf16.mxu0 %v4619_v45  ;;  %3284 = vmatprep.subr.bf16.mxu1 %v5205_v6 }
 0xa45   :  { %2198 = vmatpush1.bf16.msra.mxu0 %v4624_v46  ;;  %3285 = vmatpush3.bf16.msra.mxu1 %v4685_v25 }
 0xa46   :  { %2199 = vmatprep.subr.bf16.mxu0 %v4629_v47  ;;  %3286 = vmatprep.subr.bf16.mxu1 %v5205_v6 }
 0xa49   :  { %2200 = vmatpush1.bf16.msra.mxu0 %v4641_v49  ;;  %3287 = vmatpush3.bf16.msra.mxu1 %v4692_v26 }
 0xa4a   :  { %2288 = vmatprep.subr.bf16.mxu0 %v4547_v56  ;;  %3292 = vmatprep.subr.bf16.mxu1 %v5205_v6 }
 0xaec   :  { %v2116_v24 = vpop.f32.mrf.mxu0  ;;  %v2157_v57 = vpop.f32.mrf.mxu1 }
 0xaed   :  { %v2117_v58 = vadd.f32 %v2116_v24, %v4793_v60  ;;  %v2158_v36 = vadd.f32 %v2157_v57, %v4810_v16  ;;  %v1643_v57 = vadd.f32 %v4753_v22, %v4790_v13 }
 0xaee   :  { %v2118_v23 = vpop.f32.mrf.mxu0  ;;  %v3270_v0 = vpop.f32.mrf.mxu1 }
 0xaef   :  { %v2163_v1 = vadd.f32 %v2117_v58, %v1639_v10  ;;  %v2119_v9 = vadd.f32 %v2118_v23, %v4802_v55 }
 0xaf0   :  { %v2120_v3 = vpop.f32.mrf.mxu0  ;;  %v2160_v30 = vpop.f32.mrf.mxu1 }
 0xaf1   :  { %v2824_v15 = vmul.f32 -1.442695, %v2163_v1  ;;  %v2170_v5 = vadd.f32 %v2119_v9, %v1641_v63 }
 0xaf2   :  { %v2121_v8 = vpop.f32.mrf.mxu0  ;;  %v3271_v38 = vpop.f32.mrf.mxu1 }
 0xaf3   :  { %3607 = vpow2.f32 %v2824_v15  ;;  %v2825_v28 = vmul.f32 -1.442695, %v2170_v5 }
 0xaf5   :  { %3609 = vpow2.f32 %v2825_v28 }
 0xb00   :  { %v3608_v33 = vpop.eup %3607 }
 0xb01   :  { %v2167_v20 = vadd.f32 1.0, %v3608_v33 }
 0xb02   :  { %v3610_v32 = vpop.eup %3609 }
 0xb03   :  { %3611 = vrcp.f32 %v2167_v20  ;;  %v2174_v59 = vadd.f32 1.0, %v3610_v32  ;;  %v1645_v32 = vadd.f32 %v4755_v11, %v4805_v31 }
 0xb05   :  { %3613 = vrcp.f32 %v2174_v59 }
 0xb10   :  { %v3612_v12 = vpop.eup %3611 }
 0xb11   :  { %v2177_v7 = vmul.f32 %v3612_v12, %v2158_v36 }
 0xb12   :  { %v3614_v19 = vpop.eup %3613 }
 0xb13   :  { %v2178_v24 = vadd.f32 %v2177_v7, %v1710_v29  ;;  %v2180_v10 = vsub.f32 1.0, %v3614_v19  ;;  %v2182_v0 = vmul.f32 %v3614_v19, %v4866_v4 }
 0xb15   :  { %3615 = vtanh.f32 %v2178_v24 }
 0xb22   :  { %v3616_v58 = vpop.eup %3615 }
 0xb23   :  { %v2181_v23 = vmul.f32 %v3616_v58, %v2180_v10  ;;  %v1713_v10 = vadd.f32 %v4763_v61, %v4814_v27 }
 0xb25   :  { %v4915_v1 = vadd.f32 %v2182_v0, %v2181_v23 }
 0xb27   :  { %v2184_v3 = vpack.c.bf16 %v4915_v1, %v4915_v1 }
 0xb29   :  { %2218 = vmatmul.mubr.bf16.vlgmr.msra.gmra.mxu0 %v2184_v3  ;;  %3289 = vmatmul.mubr.bf16.vlgmr.msra.gmra.mxu1 %v2184_v3 }
 0xb2a   :  { %2289 = vmatpush1.bf16.msra.mxu0 %v4552_v21  ;;  %3293 = vmatpush3.bf16.msra.mxu1 %v4635_v48 }
 0xb2b   :  { %2290 = vmatprep.subr.bf16.mxu0 %v4559_v18  ;;  %3294 = vmatprep.subr.bf16.mxu1 %v5205_v6 }
 0xb2c   :  { %2320 = vmatprep.mubr.bf16.mxu0 %v5206_v14  ;;  %3308 = vmatprep.mubr.msk.bf16.mxu1 %vm3717_vm0, %v5205_v6 }
 0xb2e   :  { %2291 = vmatpush1.bf16.msra.mxu0 %v4564_v2  ;;  %3295 = vmatpush3.bf16.msra.mxu1 %v4651_v50 }
 0xb2f   :  { %2292 = vmatprep.subr.bf16.mxu0 %v4571_v34  ;;  %3296 = vmatprep.subr.bf16.mxu1 %v5205_v6 }
 0xb32   :  { %2293 = vmatpush1.bf16.msra.mxu0 %v4576_v35  ;;  %3297 = vmatpush3.bf16.msra.mxu1 %v4657_v51 }
 0xb33   :  { %2294 = vmatprep.subr.bf16.mxu0 %v4583_v37  ;;  %3298 = vmatprep.subr.bf16.mxu1 %v5205_v6 }
 0xb36   :  { %2295 = vmatpush1.bf16.msra.mxu0 %v4588_v39  ;;  %3299 = vmatpush3.bf16.msra.mxu1 %v4664_v52 }
 0xb37   :  { %2296 = vmatprep.subr.bf16.mxu0 %v4595_v40  ;;  %3300 = vmatprep.subr.bf16.mxu1 %v5205_v6 }
 0xb3a   :  { %2297 = vmatpush1.bf16.msra.mxu0 %v4600_v41  ;;  %3301 = vmatpush3.bf16.msra.mxu1 %v4671_v53 }
 0xb3b   :  { %2298 = vmatprep.subr.bf16.mxu0 %v4607_v42  ;;  %3302 = vmatprep.subr.bf16.mxu1 %v5205_v6 }
 0xb3e   :  { %2299 = vmatpush1.bf16.msra.mxu0 %v4612_v43  ;;  %3303 = vmatpush3.bf16.msra.mxu1 %v4678_v44 }
 0xb3f   :  { %2300 = vmatprep.subr.bf16.mxu0 %v4619_v45  ;;  %3304 = vmatprep.subr.bf16.mxu1 %v5205_v6 }
 0xb42   :  { %2301 = vmatpush1.bf16.msra.mxu0 %v4624_v46  ;;  %3305 = vmatpush3.bf16.msra.mxu1 %v4685_v25 }
 0xb43   :  { %2302 = vmatprep.subr.bf16.mxu0 %v4629_v47  ;;  %3306 = vmatprep.subr.bf16.mxu1 %v5205_v6 }
 0xb46   :  { %2303 = vmatpush1.bf16.msra.mxu0 %v4641_v49  ;;  %3307 = vmatpush3.bf16.msra.mxu1 %v4692_v26 }
 0xb47   :  { %2391 = vmatprep.subr.bf16.mxu0 %v4547_v56  ;;  %3312 = vmatprep.subr.bf16.mxu1 %v5205_v6 }
 0xbe9   :  { %v2219_v17 = vpop.f32.mrf.mxu0  ;;  %v2260_v4 = vpop.f32.mrf.mxu1 }
 0xbea   :  { %v2220_v30 = vadd.f32 %v2219_v17, %v4793_v60  ;;  %v2261_v24 = vadd.f32 %v2260_v4, %v4810_v16 }
 0xbeb   :  { %v2221_v15 = vpop.f32.mrf.mxu0  ;;  %v3290_v9 = vpop.f32.mrf.mxu1 }
 0xbec   :  { %v2266_v8 = vadd.f32 %v2220_v30, %v1643_v57  ;;  %v2222_v28 = vadd.f32 %v2221_v15, %v4802_v55 }
 0xbed   :  { %v2223_v38 = vpop.f32.mrf.mxu0  ;;  %v2263_v63 = vpop.f32.mrf.mxu1 }
 0xbee   :  { %v2826_v5 = vmul.f32 -1.442695, %v2266_v8  ;;  %v2273_v59 = vadd.f32 %v2222_v28, %v1645_v32 }
 0xbef   :  { %v2224_v33 = vpop.f32.mrf.mxu0  ;;  %v3291_v20 = vpop.f32.mrf.mxu1 }
 0xbf0   :  { %3617 = vpow2.f32 %v2826_v5  ;;  %v2827_v36 = vmul.f32 -1.442695, %v2273_v59 }
 0xbf2   :  { %3619 = vpow2.f32 %v2827_v36 }
 0xbfd   :  { %v3618_v22 = vpop.eup %3617 }
 0xbfe   :  { %v2270_v12 = vadd.f32 1.0, %v3618_v22 }
 0xbff   :  { %v3620_v29 = vpop.eup %3619 }
 0xc00   :  { %3621 = vrcp.f32 %v2270_v12  ;;  %v2277_v7 = vadd.f32 1.0, %v3620_v29 }
 0xc02   :  { %3623 = vrcp.f32 %v2277_v7  ;;  %v5226_v7 = vld [vmem:[#allocation10_spill] sm:$0xff] }
 0xc0d   :  { %v3622_v19 = vpop.eup %3621 }
 0xc0e   :  { %v2280_v58 = vmul.f32 %v3622_v19, %v2261_v24  ;;  %v1718_v24 = vadd.f32 %v5226_v7, %v4814_v27  ;;  %v3702_v7 = vld [vmem:[%s5184_s6 + $0x68] ss:$12 sps:$4 sm:$0xff]  }
 0xc0f   :  { %v3624_v11 = vpop.eup %3623 }
 0xc10   :  { %v2281_v23 = vadd.f32 %v2280_v58, %v1713_v10  ;;  %v2283_v0 = vsub.f32 1.0, %v3624_v11  ;;  %v2285_v57 = vmul.f32 %v3624_v11, %v4915_v1 }
 0xc12   :  { %3625 = vtanh.f32 %v2281_v23 }
 0xc1f   :  { %v3626_v3 = vpop.eup %3625 }
 0xc20   :  { %v2284_v17 = vmul.f32 %v3626_v3, %v2283_v0 }
 0xc22   :  { %v4964_v30 = vadd.f32 %v2285_v57, %v2284_v17  ;;  %v5020_v57 = vld [vmem:[%s5184_s6 + $0xa8] ss:$12 sps:$4 sm:$0xff]  }
 0xc24   :  { %v2287_v15 = vpack.c.bf16 %v4964_v30, %v4964_v30 }
 0xc26   :  { %2321 = vmatmul.mubr.bf16.vlgmr.msra.gmra.mxu0 %v2287_v15  ;;  %3309 = vmatmul.mubr.bf16.vlgmr.msra.gmra.mxu1 %v2287_v15  ;;  %v5037_v15 = vld [vmem:[%s5184_s6 + $0x90] ss:$12 sps:$4 sm:$0xff]  }
 0xc27   :  { %2392 = vmatpush1.bf16.msra.mxu0 %v4552_v21  ;;  %3313 = vmatpush3.bf16.msra.mxu1 %v4635_v48 }
 0xc28   :  { %2393 = vmatprep.subr.bf16.mxu0 %v4559_v18  ;;  %3314 = vmatprep.subr.bf16.mxu1 %v5205_v6 }
 0xc29   :  { %2423 = vmatprep.mubr.bf16.mxu0 %v5206_v14  ;;  %3328 = vmatprep.mubr.msk.bf16.mxu1 %vm3717_vm0, %v5205_v6 }
 0xc2b   :  { %2394 = vmatpush1.bf16.msra.mxu0 %v4564_v2  ;;  %3315 = vmatpush3.bf16.msra.mxu1 %v4651_v50  ;;  %v1649_v2 = vadd.f32 %v4759_v62, %v4790_v13 }
 0xc2c   :  { %2395 = vmatprep.subr.bf16.mxu0 %v4571_v34  ;;  %3316 = vmatprep.subr.bf16.mxu1 %v5205_v6 }
 0xc2f   :  { %2396 = vmatpush1.bf16.msra.mxu0 %v4576_v35  ;;  %3317 = vmatpush3.bf16.msra.mxu1 %v4657_v51 }
 0xc30   :  { %2397 = vmatprep.subr.bf16.mxu0 %v4583_v37  ;;  %3318 = vmatprep.subr.bf16.mxu1 %v5205_v6 }
 0xc33   :  { %2398 = vmatpush1.bf16.msra.mxu0 %v4588_v39  ;;  %3319 = vmatpush3.bf16.msra.mxu1 %v4664_v52 }
 0xc34   :  { %2399 = vmatprep.subr.bf16.mxu0 %v4595_v40  ;;  %3320 = vmatprep.subr.bf16.mxu1 %v5205_v6 }
 0xc37   :  { %2400 = vmatpush1.bf16.msra.mxu0 %v4600_v41  ;;  %3321 = vmatpush3.bf16.msra.mxu1 %v4671_v53 }
 0xc38   :  { %2401 = vmatprep.subr.bf16.mxu0 %v4607_v42  ;;  %3322 = vmatprep.subr.bf16.mxu1 %v5205_v6 }
 0xc3b   :  { %2402 = vmatpush1.bf16.msra.mxu0 %v4612_v43  ;;  %3323 = vmatpush3.bf16.msra.mxu1 %v4678_v44 }
 0xc3c   :  { %2403 = vmatprep.subr.bf16.mxu0 %v4619_v45  ;;  %3324 = vmatprep.subr.bf16.mxu1 %v5205_v6 }
 0xc3f   :  { %2404 = vmatpush1.bf16.msra.mxu0 %v4624_v46  ;;  %3325 = vmatpush3.bf16.msra.mxu1 %v4685_v25 }
 0xc40   :  { %2405 = vmatprep.subr.bf16.mxu0 %v4629_v47  ;;  %3326 = vmatprep.subr.bf16.mxu1 %v5205_v6 }
 0xc43   :  { %2406 = vmatpush1.bf16.msra.mxu0 %v4641_v49  ;;  %3327 = vmatpush3.bf16.msra.mxu1 %v4692_v26 }
 0xc44   :  { %2494 = vmatprep.subr.bf16.mxu0 %v4547_v56  ;;  %3332 = vmatprep.subr.bf16.mxu1 %v5205_v6  ;;  %v1651_v56 = vadd.f32 %v4761_v54, %v4805_v31 }
 0xce6   :  { %v2322_v21 = vpop.f32.mrf.mxu0  ;;  %v2363_v18 = vpop.f32.mrf.mxu1 }
 0xce7   :  { %v2323_v61 = vadd.f32 %v2322_v21, %v4793_v60  ;;  %v2364_v12 = vadd.f32 %v2363_v18, %v4810_v16 }
 0xce8   :  { %v2324_v1 = vpop.f32.mrf.mxu0  ;;  %v3310_v4 = vpop.f32.mrf.mxu1 }
 0xce9   :  { %v2369_v9 = vadd.f32 %v2323_v61, %v1649_v2  ;;  %v2325_v5 = vadd.f32 %v2324_v1, %v4802_v55  ;;  %v5229_v4 = vld [vmem:[#allocation12_spill] sm:$0xff] }
 0xcea   :  { %v2326_v8 = vpop.f32.mrf.mxu0  ;;  %v2366_v38 = vpop.f32.mrf.mxu1 }
 0xceb   :  { %v2828_v63 = vmul.f32 -1.442695, %v2369_v9  ;;  %v2376_v20 = vadd.f32 %v2325_v5, %v1651_v56  ;;  %v1721_v9 = vadd.f32 %v5229_v4, %v4814_v27 }
 0xcec   :  { %v2327_v28 = vpop.f32.mrf.mxu0  ;;  %v3311_v33 = vpop.f32.mrf.mxu1 }
 0xced   :  { %3627 = vpow2.f32 %v2828_v63  ;;  %v2829_v32 = vmul.f32 -1.442695, %v2376_v20 }
 0xcef   :  { %3629 = vpow2.f32 %v2829_v32 }
 0xcfa   :  { %v3628_v62 = vpop.eup %3627 }
 0xcfb   :  { %v2373_v59 = vadd.f32 1.0, %v3628_v62  ;;  %v3695_v62 = vld [vmem:[%s5184_s6 + $0xb0] ss:$12 sps:$4 sm:$0xff]  }
 0xcfc   :  { %v3630_v36 = vpop.eup %3629 }
 0xcfd   :  { %3631 = vrcp.f32 %v2373_v59  ;;  %v2380_v22 = vadd.f32 1.0, %v3630_v36  ;;  %v3696_v59 = vld [vmem:[%s5184_s6 + $0x98] ss:$12 sps:$4 sm:$0xff]   ;;  %v3697_v36 = vld [vmem:[%s5184_s6 + $0x7c] ss:$12 sps:$4 sm:$0xff]  }
 0xcff   :  { %3633 = vrcp.f32 %v2380_v22  ;;  %v3699_v22 = vld [vmem:[%s5184_s6 + $0x80] ss:$12 sps:$4 sm:$0xff]  }
 0xd0a   :  { %v3632_v29 = vpop.eup %3631 }
 0xd0b   :  { %v2383_v19 = vmul.f32 %v3632_v29, %v2364_v12  ;;  %v3700_v12 = vld [vmem:[%s5184_s6 + $0x64] ss:$12 sps:$4 sm:$0xff]   ;;  %v3701_v29 = vld [vmem:[%s5184_s6 + $0x60] ss:$12 sps:$4 sm:$0xff]  }
 0xd0c   :  { %v3634_v54 = vpop.eup %3633 }
 0xd0d   :  { %v2384_v10 = vadd.f32 %v2383_v19, %v1718_v24  ;;  %v2386_v58 = vsub.f32 1.0, %v3634_v54  ;;  %v2388_v0 = vmul.f32 %v3634_v54, %v4964_v30  ;;  %v5027_v30 = vld [vmem:[%s5184_s6 + $0x94] ss:$12 sps:$4 sm:$0xff]   ;;  %v3703_v24 = vld [vmem:[%s5184_s6 + $0x4c] ss:$12 sps:$4 sm:$0xff]  }
 0xd0e   :  { %v3704_v19 = vld [vmem:[%s5184_s6 + $0x48] ss:$12 sps:$4 sm:$0xff]  }
 0xd0f   :  { %3635 = vtanh.f32 %v2384_v10  ;;  %v3705_v10 = vld [vmem:[%s5184_s6 + $0x50] ss:$12 sps:$4 sm:$0xff]   ;;  %v3706_v54 = vld [vmem:[%s5184_s6 + $0x34] ss:$12 sps:$4 sm:$0xff]  }
 0xd1c   :  { %v3636_v23 = vpop.eup %3635 }
 0xd1d   :  { %v2387_v11 = vmul.f32 %v3636_v23, %v2386_v58  ;;  %v3707_v58 = vld [vmem:[%s5184_s6 + $0x30] ss:$12 sps:$4 sm:$0xff]   ;;  %v3708_v23 = vld [vmem:[%s5184_s6 + $0x38] ss:$12 sps:$4 sm:$0xff]  }
 0xd1f   :  { %v5013_v3 = vadd.f32 %v2388_v0, %v2387_v11  ;;  %v3709_v11 = vld [vmem:[%s5184_s6 + $0x1c] ss:$12 sps:$4 sm:$0xff]   ;;  %v3710_v0 = vld [vmem:[%s5184_s6 + $0x18] ss:$12 sps:$4 sm:$0xff]  }
 0xd21   :  { %v2390_v17 = vpack.c.bf16 %v5013_v3, %v5013_v3 }
 0xd23   :  { %2424 = vmatmul.mubr.bf16.vlgmr.msra.gmra.mxu0 %v2390_v17  ;;  %3329 = vmatmul.mubr.bf16.vlgmr.msra.gmra.mxu1 %v2390_v17  ;;  %v3712_v17 = vld [vmem:[%s5184_s6 + $0x4] ss:$12 sps:$4 sm:$0xff]  }
 0xd24   :  { %2495 = vmatpush1.bf16.msra.mxu0 %v5020_v57  ;;  %3333 = vmatpush3.bf16.msra.mxu1 %v4635_v48 }
 0xd25   :  { %2496 = vmatprep.subr.bf16.mxu0 %v5027_v30  ;;  %3334 = vmatprep.subr.bf16.mxu1 %v5205_v6 }
 0xd26   :  { %2526 = vmatprep.mubr.bf16.mxu0 %v5206_v14  ;;  %3348 = vmatprep.mubr.msk.bf16.mxu1 %vm3717_vm0, %v5205_v6 }
 0xd28   :  { %2497 = vmatpush1.bf16.msra.mxu0 %v5037_v15  ;;  %3335 = vmatpush3.bf16.msra.mxu1 %v4651_v50 }
 0xd29   :  { %2498 = vmatprep.subr.bf16.mxu0 %v4571_v34  ;;  %3336 = vmatprep.subr.bf16.mxu1 %v5205_v6  ;;  %v3694_v34 = vld [vmem:[%s5184_s6 + $0xac] ss:$12 sps:$4 sm:$0xff]  }
 0xd2c   :  { %2499 = vmatpush1.bf16.msra.mxu0 %v4576_v35  ;;  %3337 = vmatpush3.bf16.msra.mxu1 %v4657_v51 }
 0xd2d   :  { %2500 = vmatprep.subr.bf16.mxu0 %v4583_v37  ;;  %3338 = vmatprep.subr.bf16.mxu1 %v5205_v6 }
 0xd30   :  { %2501 = vmatpush1.bf16.msra.mxu0 %v4588_v39  ;;  %3339 = vmatpush3.bf16.msra.mxu1 %v4664_v52  ;;  %v5227_v39 = vld [vmem:[#allocation7_spill] sm:$0xff]  ;;  %v5228_v52 = vld [vmem:[#allocation6_spill] sm:$0xff] }
 0xd31   :  { %2502 = vmatprep.subr.bf16.mxu0 %v4595_v40  ;;  %3340 = vmatprep.subr.bf16.mxu1 %v5205_v6  ;;  %v1653_v40 = vadd.f32 %v5227_v39, %v4790_v13 }
 0xd34   :  { %2503 = vmatpush1.bf16.msra.mxu0 %v4600_v41  ;;  %3341 = vmatpush3.bf16.msra.mxu1 %v4671_v53  ;;  %v1655_v53 = vadd.f32 %v5228_v52, %v4805_v31 }
 0xd35   :  { %2504 = vmatprep.subr.bf16.mxu0 %v4607_v42  ;;  %3342 = vmatprep.subr.bf16.mxu1 %v5205_v6 }
 0xd38   :  { %2505 = vmatpush1.bf16.msra.mxu0 %v4612_v43  ;;  %3343 = vmatpush3.bf16.msra.mxu1 %v4678_v44 }
 0xd39   :  { %2506 = vmatprep.subr.bf16.mxu0 %v4619_v45  ;;  %3344 = vmatprep.subr.bf16.mxu1 %v5205_v6 }
 0xd3c   :  { %2507 = vmatpush1.bf16.msra.mxu0 %v4624_v46  ;;  %3345 = vmatpush3.bf16.msra.mxu1 %v4685_v25 }
 0xd3d   :  { %2508 = vmatprep.subr.bf16.mxu0 %v4629_v47  ;;  %3346 = vmatprep.subr.bf16.mxu1 %v5205_v6 }
 0xd40   :  { %2509 = vmatpush1.bf16.msra.mxu0 %v4641_v49  ;;  %3347 = vmatpush3.bf16.msra.mxu1 %v4692_v26 }
 0xd41   :  { %2597 = vmatprep.subr.bf16.mxu0 %v3694_v34  ;;  %3352 = vmatprep.subr.bf16.mxu1 %v5205_v6 }
 0xde3   :  { %v2425_v35 = vpop.f32.mrf.mxu0  ;;  %v2466_v37 = vpop.f32.mrf.mxu1 }
 0xde4   :  { %v2426_v41 = vadd.f32 %v2425_v35, %v4793_v60  ;;  %v2467_v61 = vadd.f32 %v2466_v37, %v4810_v16  ;;  %v5230_v35 = vld [vmem:[#allocation8_spill] sm:$0xff] }
 0xde5   :  { %v2427_v42 = vpop.f32.mrf.mxu0  ;;  %v3330_v43 = vpop.f32.mrf.mxu1  ;;  %v1659_v37 = vadd.f32 %v5230_v35, %v4790_v13 }
 0xde6   :  { %v2472_v45 = vadd.f32 %v2426_v41, %v1653_v40  ;;  %v2428_v49 = vadd.f32 %v2427_v42, %v4802_v55 }
 0xde7   :  { %v2429_v46 = vpop.f32.mrf.mxu0  ;;  %v2469_v47 = vpop.f32.mrf.mxu1 }
 0xde8   :  { %v2830_v48 = vmul.f32 -1.442695, %v2472_v45  ;;  %v2479_v44 = vadd.f32 %v2428_v49, %v1655_v53  ;;  %v5231_v49 = vld [vmem:[#allocation9_spill] sm:$0xff] }
 0xde9   :  { %v2430_v50 = vpop.f32.mrf.mxu0  ;;  %v3331_v51 = vpop.f32.mrf.mxu1 }
 0xdea   :  { %3637 = vpow2.f32 %v2830_v48  ;;  %v2831_v25 = vmul.f32 -1.442695, %v2479_v44  ;;  %v1661_v50 = vadd.f32 %v5231_v49, %v4805_v31 }
 0xdec   :  { %3639 = vpow2.f32 %v2831_v25 }
 0xdf7   :  { %v3638_v26 = vpop.eup %3637 }
 0xdf8   :  { %v2476_v21 = vadd.f32 1.0, %v3638_v26 }
 0xdf9   :  { %v3640_v18 = vpop.eup %3639 }
 0xdfa   :  { %3641 = vrcp.f32 %v2476_v21  ;;  %v2483_v2 = vadd.f32 1.0, %v3640_v18 }
 0xdfc   :  { %3643 = vrcp.f32 %v2483_v2  ;;  %v5232_v2 = vld [vmem:[#allocation4_spill] sm:$0xff] }
 0xe07   :  { %v3642_v1 = vpop.eup %3641 }
 0xe08   :  { %v2486_v8 = vmul.f32 %v3642_v1, %v2467_v61  ;;  %v1726_v61 = vadd.f32 %v5232_v2, %v4814_v27 }
 0xe09   :  { %v3644_v63 = vpop.eup %3643 }
 0xe0a   :  { %v2487_v38 = vadd.f32 %v2486_v8, %v1721_v9  ;;  %v2489_v5 = vsub.f32 1.0, %v3644_v63  ;;  %v2491_v56 = vmul.f32 %v3644_v63, %v5013_v3  ;;  %v3711_v3 = vld [vmem:[%s5184_s6 + $0x20] ss:$12 sps:$4 sm:$0xff]  }
 0xe0c   :  { %3645 = vtanh.f32 %v2487_v38 }
 0xe19   :  { %v3646_v28 = vpop.eup %3645 }
 0xe1a   :  { %v2490_v33 = vmul.f32 %v3646_v28, %v2489_v5 }
 0xe1c   :  { %v5079_v20 = vadd.f32 %v2491_v56, %v2490_v33 }
 0xe1e   :  { %v2493_v32 = vpack.c.bf16 %v5079_v20, %v5079_v20 }
 0xe20   :  { %2527 = vmatmul.mubr.bf16.vlgmr.msra.gmra.mxu0 %v2493_v32  ;;  %3349 = vmatmul.mubr.bf16.vlgmr.msra.gmra.mxu1 %v2493_v32 }
 0xe21   :  { %2598 = vmatpush1.bf16.msra.mxu0 %v5020_v57  ;;  %3353 = vmatpush3.bf16.msra.mxu1 %v3695_v62  ;;  %v3713_v57 = vld [vmem:[%s5184_s6] ss:$12 sps:$4 sm:$0xff]   ;;  %v5233_v62 = vld [vmem:[#allocation5_spill] sm:$0xff] }
 0xe22   :  { %2599 = vmatprep.subr.bf16.mxu0 %v5027_v30  ;;  %3354 = vmatprep.subr.bf16.mxu1 %v5205_v6  ;;  %v3714_v30 = vld [vmem:[%s5184_s6 + $0x8] ss:$12 sps:$4 sm:$0xff]  }
 0xe23   :  { %2629 = vmatprep.mubr.bf16.mxu0 %v5206_v14  ;;  %3368 = vmatprep.mubr.msk.bf16.mxu1 %vm3717_vm0, %v5205_v6  ;;  %v3698_v14 = vld [vmem:[%s5184_s6 + $0x78] ss:$12 sps:$4 sm:$0xff]  }
 0xe25   :  { %2600 = vmatpush1.bf16.msra.mxu0 %v5037_v15  ;;  %3355 = vmatpush3.bf16.msra.mxu1 %v3696_v59  ;;  %v1663_v59 = vadd.f32 %v5233_v62, %v4790_v13 }
 0xe26   :  { %2601 = vmatprep.subr.bf16.mxu0 %v3697_v36  ;;  %3356 = vmatprep.subr.bf16.mxu1 %v5205_v6 }
 0xe29   :  { %2602 = vmatpush1.bf16.msra.mxu0 %v3698_v14  ;;  %3357 = vmatpush3.bf16.msra.mxu1 %v3699_v22 }
 0xe2a   :  { %2603 = vmatprep.subr.bf16.mxu0 %v3700_v12  ;;  %3358 = vmatprep.subr.bf16.mxu1 %v5205_v6 }
 0xe2d   :  { %2604 = vmatpush1.bf16.msra.mxu0 %v3701_v29  ;;  %3359 = vmatpush3.bf16.msra.mxu1 %v3702_v7 }
 0xe2e   :  { %2605 = vmatprep.subr.bf16.mxu0 %v3703_v24  ;;  %3360 = vmatprep.subr.bf16.mxu1 %v5205_v6 }
 0xe31   :  { %2606 = vmatpush1.bf16.msra.mxu0 %v3704_v19  ;;  %3361 = vmatpush3.bf16.msra.mxu1 %v3705_v10 }
 0xe32   :  { %2607 = vmatprep.subr.bf16.mxu0 %v3706_v54  ;;  %3362 = vmatprep.subr.bf16.mxu1 %v5205_v6  ;;  %v5234_v54 = vld [vmem:[#allocation2_spill] sm:$0xff] }
 0xe35   :  { %2608 = vmatpush1.bf16.msra.mxu0 %v3707_v58  ;;  %3363 = vmatpush3.bf16.msra.mxu1 %v3708_v23  ;;  %v1665_v58 = vadd.f32 %v5234_v54, %v4805_v31 }
 0xe36   :  { %2609 = vmatprep.subr.bf16.mxu0 %v3709_v11  ;;  %3364 = vmatprep.subr.bf16.mxu1 %v5205_v6 }
 0xe39   :  { %2610 = vmatpush1.bf16.msra.mxu0 %v3710_v0  ;;  %3365 = vmatpush3.bf16.msra.mxu1 %v3711_v3 }
 0xe3a   :  { %2611 = vmatprep.subr.bf16.mxu0 %v3712_v17  ;;  %3366 = vmatprep.subr.bf16.mxu1 %v5205_v6 }
 0xe3d   :  { %2612 = vmatpush1.bf16.msra.mxu0 %v3713_v57  ;;  %3367 = vmatpush3.bf16.msra.mxu1 %v3714_v30  ;;  %v5235_v30 = vld [vmem:[#allocation11_spill] sm:$0xff] }
 0xee0   :  { %v2528_v15 = vpop.f32.mrf.mxu0  ;;  %v2569_v34 = vpop.f32.mrf.mxu1 }
 0xee1   :  { %v2529_v39 = vadd.f32 %v2528_v15, %v4793_v60  ;;  %v2570_v21 = vadd.f32 %v2569_v34, %v4810_v16 }
 0xee2   :  { %v2530_v40 = vpop.f32.mrf.mxu0  ;;  %v3350_v41 = vpop.f32.mrf.mxu1 }
 0xee3   :  { %v2575_v6 = vadd.f32 %v2529_v39, %v1659_v37  ;;  %v2531_v46 = vadd.f32 %v2530_v40, %v4802_v55 }
 0xee4   :  { %v2532_v42 = vpop.f32.mrf.mxu0  ;;  %v2572_v43 = vpop.f32.mrf.mxu1 }
 0xee5   :  { %v2832_v45 = vmul.f32 -1.442695, %v2575_v6  ;;  %v2582_v51 = vadd.f32 %v2531_v46, %v1661_v50 }
 0xee6   :  { %v2533_v47 = vpop.f32.mrf.mxu0  ;;  %v3351_v48 = vpop.f32.mrf.mxu1 }
 0xee7   :  { %3647 = vpow2.f32 %v2832_v45  ;;  %v2833_v52 = vmul.f32 -1.442695, %v2582_v51 }
 0xee9   :  { %3649 = vpow2.f32 %v2833_v52 }
 0xef4   :  { %v3648_v53 = vpop.eup %3647 }
 0xef5   :  { %v2579_v44 = vadd.f32 1.0, %v3648_v53 }
 0xef6   :  { %v3650_v25 = vpop.eup %3649 }
 0xef7   :  { %3651 = vrcp.f32 %v2579_v44  ;;  %v2586_v26 = vadd.f32 1.0, %v3650_v25 }
 0xef9   :  { %3653 = vrcp.f32 %v2586_v26 }
 0xf04   :  { %v3652_v18 = vpop.eup %3651 }
 0xf05   :  { %v2589_v1 = vmul.f32 %v3652_v18, %v2570_v21 }
 0xf06   :  { %v3654_v9 = vpop.eup %3653 }
 0xf07   :  { %v2590_v4 = vadd.f32 %v2589_v1, %v1726_v61  ;;  %v2592_v8 = vsub.f32 1.0, %v3654_v9  ;;  %v2594_v5 = vmul.f32 %v3654_v9, %v5079_v20 }
 0xf09   :  { %3655 = vtanh.f32 %v2590_v4 }
 0xf16   :  { %v3656_v38 = vpop.eup %3655 }
 0xf17   :  { %v2593_v63 = vmul.f32 %v3656_v38, %v2592_v8 }
 0xf19   :  { %v2595_v28 = vadd.f32 %v2594_v5, %v2593_v63 }
 0xf1b   :  { %v2596_v33 = vpack.c.bf16 %v2595_v28, %v2595_v28 }
 0xf1d   :  { %2630 = vmatmul.mubr.bf16.vlgmr.msra.gmra.mxu0 %v2596_v33  ;;  %3369 = vmatmul.mubr.bf16.vlgmr.msra.gmra.mxu1 %v2596_v33 }
 0xfdd   :  { %v2631_v56 = vpop.f32.mrf.mxu0  ;;  %v2672_v32 = vpop.f32.mrf.mxu1 }
 0xfde   :  { %v2632_v36 = vadd.f32 %v2631_v56, %v4793_v60  ;;  %v2673_v17 = vadd.f32 %v2672_v32, %v4810_v16 }
 0xfdf   :  { %v2633_v14 = vpop.f32.mrf.mxu0  ;;  %v3370_v22 = vpop.f32.mrf.mxu1 }
 0xfe0   :  { %v2678_v12 = vadd.f32 %v2632_v36, %v1663_v59  ;;  %v2634_v19 = vadd.f32 %v2633_v14, %v4802_v55  ;;  %v1729_v55 = vadd.f32 %v5235_v30, %v4814_v27 }
 0xfe1   :  { %v2635_v29 = vpop.f32.mrf.mxu0  ;;  %v2675_v7 = vpop.f32.mrf.mxu1 }
 0xfe2   :  { %v2834_v24 = vmul.f32 -1.442695, %v2678_v12  ;;  %v2685_v23 = vadd.f32 %v2634_v19, %v1665_v58 }
 0xfe3   :  { %v2636_v20 = vpop.f32.mrf.mxu0  ;;  %v3371_v10 = vpop.f32.mrf.mxu1 }
 0xfe4   :  { %3657 = vpow2.f32 %v2834_v24  ;;  %v2835_v11 = vmul.f32 -1.442695, %v2685_v23 }
 0xfe6   :  { %3659 = vpow2.f32 %v2835_v11 }
 0xff1   :  { %v3658_v13 = vpop.eup %3657 }
 0xff2   :  { %v2682_v0 = vadd.f32 1.0, %v3658_v13 }
 0xff3   :  { %v3660_v60 = vpop.eup %3659 }
 0xff4   :  { %3661 = vrcp.f32 %v2682_v0  ;;  %v2689_v3 = vadd.f32 1.0, %v3660_v60 }
 0xff6   :  { %3663 = vrcp.f32 %v2689_v3 }
0x1001   :  { %v3662_v57 = vpop.eup %3661 }
0x1002   :  { %v2692_v15 = vmul.f32 %v3662_v57, %v2673_v17 }
0x1003   :  { %v3664_v31 = vpop.eup %3663 }
0x1004   :  { %v2693_v34 = vadd.f32 %v2692_v15, %v1729_v55  ;;  %v2695_v35 = vsub.f32 1.0, %v3664_v31  ;;  %v2697_v40 = vmul.f32 %v3664_v31, %v2595_v28 }
0x1006   :  { %3665 = vtanh.f32 %v2693_v34 }
0x1013   :  { %v3666_v37 = vpop.eup %3665 }
0x1014   :  { %v2696_v39 = vmul.f32 %v3666_v37, %v2695_v35 }
0x1016   :  { %v2698_v41 = vadd.f32 %v2697_v40, %v2696_v39 }
0x1018   :  { %2699 = vst [vmem:[%s5187_s9] sm:$0xff] %v2698_v41 }

</bundles_post_ra>
